<compile_context>
chip_gen: v5e
topology: v5e:2x2
jax: 0.10.0
libtpu: 0.0.40
codegen_flags: <defaults>
</compile_context>

<pallas_src>
import jax
import jax.numpy as jnp
from jax.experimental import pallas as pl
from jax.experimental.pallas import tpu as pltpu


# ------------------------------ fused kernel -------------------------------- #

def _make_fused_kernel(Bp, Bv, T, F, E, L_enc, L_dec):
    H = E
    G4, G8 = 4 * H, 8 * H
    f32 = jnp.float32

    def kernel(*refs):
        it = iter(refs)
        x_ref = next(it)
        msk_ref = next(it)
        enc_w = [(next(it), next(it), next(it)) for _ in range(L_enc)]
        dec0_w = (next(it), next(it), next(it))            # W_eff, b_eff, W_hh fused
        decr_w = [(next(it), next(it), next(it)) for _ in range(L_dec - 1)]
        out_w_ref = next(it)
        out_b_ref = next(it)
        rec_ref = next(it)
        loss_ref = next(it)
        enc_seq = [next(it), next(it)]
        dec_f = [next(it), next(it)]
        dec_b = [next(it), next(it)]

        # ---- constant lane masks (built once, hoisted out of all loops) ---- #
        lane4 = jax.lax.broadcasted_iota(jnp.int32, (Bp, G4), 1)
        g4 = (lane4 >= 2 * H) & (lane4 < 3 * H)
        s4 = jnp.where(g4, 1.0, 0.5).astype(f32)

        lane8 = jax.lax.broadcasted_iota(jnp.int32, (Bp, G8), 1)
        g8 = (lane8 >= 4 * H) & (lane8 < 6 * H)
        s8 = jnp.where(g8, 1.0, 0.5).astype(f32)
        bwd8 = (((lane8 >= 1 * H) & (lane8 < 2 * H)) |
                ((lane8 >= 3 * H) & (lane8 < 4 * H)) |
                ((lane8 >= 5 * H) & (lane8 < 6 * H)) |
                (lane8 >= 7 * H))

        def activate(gates, g_mask, scale):
            # sigmoid(x) = 0.5*(1+tanh(x/2)) -> one tanh pass over the whole gates.
            t = jnp.tanh(gates * scale)
            return jnp.where(g_mask, t, 0.5 * (t + 1.0))

        # ------------------------------ encoder ------------------------------ #
        latent = None
        for l in range(L_enc):
            w_ih = enc_w[l][0][...]
            w_hh = enc_w[l][1][...]
            bias = enc_w[l][2][...]
            x_in = x_ref[...] if l == 0 else enc_seq[(l - 1) % 2][...]
            # Hoisted input projection for all timesteps, kept as a value.
            proj = jnp.dot(x_in, w_ih, preferred_element_type=f32) + bias  # (T*Bp,4H)
            h = jnp.zeros((Bp, H), f32)
            c = jnp.zeros((Bp, H), f32)
            last = (l == L_enc - 1)
            for t in range(T):
                gates = proj[t * Bp:(t + 1) * Bp, :] + jnp.dot(
                    h, w_hh, preferred_element_type=f32)
                act = activate(gates, g4, s4)
                c = act[:, H:2 * H] * c + act[:, 0:H] * act[:, 2 * H:3 * H]
                h = act[:, 3 * H:4 * H] * jnp.tanh(c)
                if not last:
                    enc_seq[l % 2][pl.ds(t * Bp, Bp), :] = h
            if last:
                latent = h                      # == nn.LSTM hidden[-1], (Bp, E)

        # ------------------------------ decoder ------------------------------ #
        # Both directions fused: h = [h_f | h_b] (Bp,2H); gates (Bp,8H) are
        # gate-block interleaved [i_f,i_b,f_f,f_b,g_f,g_b,o_f,o_b] so the cell
        # update is vectorized over 2H and the recurrence is one matmul per step.
        for l in range(L_dec):
            if l == 0:
                w_eff = dec0_w[0][...]          # (E, T*8H): repeat_interleave folded
                b_eff = dec0_w[1][...]          # (1, T*8H)
                w_hh = dec0_w[2][...]           # (2H, 8H) block-diag, interleaved
                proj_all = jnp.dot(latent, w_eff, preferred_element_type=f32) + b_eff
            else:
                w_in = decr_w[l - 1][0][...]    # (2H, 8H) interleaved columns
                b_in = decr_w[l - 1][1][...]    # (1, 8H)
                w_hh = decr_w[l - 1][2][...]
                prev_f = dec_f[(l - 1) % 2][...]
                prev_b = dec_b[(l - 1) % 2][...]
                proj_all = (jnp.dot(prev_f, w_in[0:H, :], preferred_element_type=f32)
                            + jnp.dot(prev_b, w_in[H:2 * H, :],
                                      preferred_element_type=f32)
                            + b_in)             # (T*Bp, 8H): row block t = input[t]
            h = jnp.zeros((Bp, 2 * H), f32)
            c = jnp.zeros((Bp, 2 * H), f32)
            for t in range(T):
                tr = T - 1 - t                  # backward dir walks time in reverse
                if l == 0:
                    gates_in = proj_all[:, t * G8:(t + 1) * G8]
                else:
                    pf = proj_all[t * Bp:(t + 1) * Bp, :]
                    pb = proj_all[tr * Bp:(tr + 1) * Bp, :]
                    gates_in = jnp.where(bwd8, pb, pf)
                gates = gates_in + jnp.dot(h, w_hh, preferred_element_type=f32)
                act = activate(gates, g8, s8)
                c = act[:, 2 * H:4 * H] * c + act[:, 0:2 * H] * act[:, 4 * H:6 * H]
                h = act[:, 6 * H:8 * H] * jnp.tanh(c)
                dec_f[l % 2][pl.ds(t * Bp, Bp), :] = h[:, 0:H]
                dec_b[l % 2][pl.ds(tr * Bp, Bp), :] = h[:, H:2 * H]

        # ----------------------- output Linear + masked MSE ------------------- #
        df = dec_f[(L_dec - 1) % 2][...]                                  # (T*Bp, E)
        db = dec_b[(L_dec - 1) % 2][...]                                  # (T*Bp, E)
        w_out = out_w_ref[...]                                            # (2E, F)
        rec = (jnp.dot(df, w_out[0:H, :], preferred_element_type=f32)
               + jnp.dot(db, w_out[H:2 * H, :], preferred_element_type=f32)
               + out_b_ref[...])                                          # (T*Bp, F)
        rec_ref[...] = rec
        diff = (rec - x_ref[...]) * msk_ref[...]                          # mask padding
        loss_ref[...] = jnp.sum(diff * diff, keepdims=True) * (1.0 / (T * Bv * F))

    return kernel


# ------------------------------- model glue --------------------------------- #

def lstm_ae_forward(x, enc_params, dec_params, out_w, out_b, emb_dim):
    B, T, F = x.shape
    E = emb_dim
    H = E
    L_enc, L_dec = len(enc_params), len(dec_params)
    f32 = jnp.float32
    Bp = max(8, ((B + 7) // 8) * 8)              # pad batch to the f32 sublane tile

    xp = jnp.pad(x.astype(f32), ((0, Bp - B), (0, 0), (0, 0)))
    x2d = jnp.transpose(xp, (1, 0, 2)).reshape(T * Bp, F)      # time-major 2-D view
    rowmask = (jnp.arange(Bp) < B).astype(f32)
    mask2d = jnp.broadcast_to(rowmask[None, :, None], (T, Bp, F)).reshape(T * Bp, F)

    def interleave_cols(wf, wb):
        # per-gate column interleave -> fused layout [i_f,i_b,f_f,f_b,g_f,g_b,o_f,o_b]
        parts = []
        for k in range(4):
            parts.append(wf[:, k * H:(k + 1) * H])
            parts.append(wb[:, k * H:(k + 1) * H])
        return jnp.concatenate(parts, axis=1)

    def blockdiag_hh(whf, whb):
        z = jnp.zeros_like(whf)
        return jnp.concatenate([interleave_cols(whf, z),
                                interleave_cols(z, whb)], axis=0)          # (2H, 8H)

    # Decoder layer 0: fold th.repeat_interleave(latent, T, 1).reshape(-1, T, E)
    # into the input weights (fwd uses stacked[t], bwd uses stacked[T-1-t]).
    idx = (jnp.arange(T)[:, None] * E + jnp.arange(E)[None, :]) // T       # (T, E)
    sel = (idx[:, None, :] == jnp.arange(E)[None, :, None]).astype(f32)    # (T, E, E)
    (wif0, whf0, bf0), (wib0, whb0, bb0) = dec_params[0]
    w_eff0 = jnp.concatenate(
        [interleave_cols(sel[t] @ wif0, sel[T - 1 - t] @ wib0) for t in range(T)],
        axis=1)                                                            # (E, T*8H)
    b_eff0 = jnp.tile(interleave_cols(bf0, bb0), (1, T))                   # (1, T*8H)

    flat = [x2d, mask2d]
    for dirs in enc_params:
        flat += [dirs[0][0], dirs[0][1], dirs[0][2]]
    flat += [w_eff0, b_eff0, blockdiag_hh(whf0, whb0)]
    for l in range(1, L_dec):
        (wif, whf, bf), (wib, whb, bb) = dec_params[l]
        flat += [interleave_cols(wif, wib), interleave_cols(bf, bb),
                 blockdiag_hh(whf, whb)]
    flat += [out_w, out_b]

    scratch = [
        pltpu.VMEM((T * Bp, H), f32), pltpu.VMEM((T * Bp, H), f32),  # enc ping/pong
        pltpu.VMEM((T * Bp, H), f32), pltpu.VMEM((T * Bp, H), f32),  # dec fwd
        pltpu.VMEM((T * Bp, H), f32), pltpu.VMEM((T * Bp, H), f32),  # dec bwd
    ]

    rec2d, loss = pl.pallas_call(
        _make_fused_kernel(Bp, B, T, F, E, L_enc, L_dec),
        out_shape=(jax.ShapeDtypeStruct((T * Bp, F), f32),
                   jax.ShapeDtypeStruct((1, 1), f32)),
        scratch_shapes=scratch,
    )(*flat)

    rec = jnp.transpose(rec2d.reshape(T, Bp, F), (1, 0, 2))[:B]
    return loss[0, 0], rec


def init_lstm_params(key, input_size, hidden_size, num_layers, bidirectional):
    """Deterministic PyTorch-style uniform(-1/sqrt(H), 1/sqrt(H)) init."""
    k = float(1.0 / (hidden_size ** 0.5))
    num_dirs = 2 if bidirectional else 1
    params = []
    for layer in range(num_layers):
        layer_in = input_size if layer == 0 else hidden_size * num_dirs
        dirs = []
        for _ in range(num_dirs):
            key, k1, k2, k3, k4 = jax.random.split(key, 5)
            w_ih = jax.random.uniform(k1, (layer_in, 4 * hidden_size),
                                      jnp.float32, -k, k)
            w_hh = jax.random.uniform(k2, (hidden_size, 4 * hidden_size),
                                      jnp.float32, -k, k)
            b_ih = jax.random.uniform(k3, (4 * hidden_size,), jnp.float32, -k, k)
            b_hh = jax.random.uniform(k4, (4 * hidden_size,), jnp.float32, -k, k)
            dirs.append((w_ih, w_hh, (b_ih + b_hh)[None, :]))
        params.append(dirs)
    return params, key


# ---------------------------- pure-JAX reference ----------------------------- #

def _ref_lstm_dir(x_tbi, w_ih, w_hh, b):
    T, B, _ = x_tbi.shape
    H = w_hh.shape[0]

    def step(carry, x_t):
        h, c = carry
        gates = x_t @ w_ih + h @ w_hh + b
        i = jax.nn.sigmoid(gates[:, 0 * H:1 * H])
        f = jax.nn.sigmoid(gates[:, 1 * H:2 * H])
        g = jnp.tanh(gates[:, 2 * H:3 * H])
        o = jax.nn.sigmoid(gates[:, 3 * H:4 * H])
        c = f * c + i * g
        h = o * jnp.tanh(c)
        return (h, c), h

    init = (jnp.zeros((B, H), jnp.float32), jnp.zeros((B, H), jnp.float32))
    _, hs = jax.lax.scan(step, init, x_tbi)
    return hs


def _ref_lstm_forward(x_btf, params, bidirectional):
    x = jnp.transpose(x_btf, (1, 0, 2))
    for dirs in params:
        h_f = _ref_lstm_dir(x, *dirs[0])
        if bidirectional:
            h_b = _ref_lstm_dir(x[::-1], *dirs[1])[::-1]
            x = jnp.concatenate([h_f, h_b], axis=-1)
        else:
            x = h_f
    return jnp.transpose(x, (1, 0, 2))


def _ref_forward(x, enc_params, dec_params, out_w, out_b, emb_dim):
    B, T, F = x.shape
    latent = _ref_lstm_forward(x, enc_params, False)[:, -1, :]
    idx = (jnp.arange(T)[:, None] * emb_dim + jnp.arange(emb_dim)[None, :]) // T
    stacked = latent[:, idx]
    dec_out = _ref_lstm_forward(stacked, dec_params, True)
    rec = (dec_out.reshape(B * T, 2 * emb_dim) @ out_w + out_b).reshape(B, T, F)
    loss = jnp.mean((rec - x) ** 2)
    return loss, rec


# ----------------------------------- main ------------------------------------ #

if __name__ == "__main__":
    B, T, F, E, L = 4, 8, 8, 32, 2   # batch, seq, n_features, emb_dim, lstm_layers

    key = jax.random.PRNGKey(0)
    key, kx = jax.random.split(key)
    x = jax.random.normal(kx, (B, T, F), jnp.float32)

    enc_params, key = init_lstm_params(key, F, E, L, bidirectional=False)
    dec_params, key = init_lstm_params(key, E, E, L, bidirectional=True)
    klin = float(1.0 / ((2 * E) ** 0.5))
    key, kw, kb = jax.random.split(key, 3)
    out_w = jax.random.uniform(kw, (2 * E, F), jnp.float32, -klin, klin)
    out_b = jax.random.uniform(kb, (1, F), jnp.float32, -klin, klin)

    fwd = jax.jit(lstm_ae_forward, static_argnums=(5,))
    loss, rec = fwd(x, enc_params, dec_params, out_w, out_b, E)
    jax.block_until_ready((loss, rec))

    ref_loss, ref_rec = _ref_forward(x, enc_params, dec_params, out_w, out_b, E)
    assert rec.shape == (B, T, F) and loss.shape == ()
    assert jnp.allclose(rec, ref_rec, atol=1e-2, rtol=1e-2)
    assert jnp.allclose(loss, ref_loss, atol=1e-2, rtol=1e-2)

    print("KERNEL_OK")
</pallas_src>

<mosaic_0001>
module attributes {stable_mosaic.version = 11 : i64} {
  func.func @kernel(%arg0: memref<64x8xf32, #tpu.memory_space<vmem>>, %arg1: memref<64x8xf32, #tpu.memory_space<vmem>>, %arg2: memref<8x128xf32, #tpu.memory_space<vmem>>, %arg3: memref<32x128xf32, #tpu.memory_space<vmem>>, %arg4: memref<1x128xf32, #tpu.memory_space<vmem>>, %arg5: memref<32x128xf32, #tpu.memory_space<vmem>>, %arg6: memref<32x128xf32, #tpu.memory_space<vmem>>, %arg7: memref<1x128xf32, #tpu.memory_space<vmem>>, %arg8: memref<32x2048xf32, #tpu.memory_space<vmem>>, %arg9: memref<1x2048xf32, #tpu.memory_space<vmem>>, %arg10: memref<64x256xf32, #tpu.memory_space<vmem>>, %arg11: memref<64x256xf32, #tpu.memory_space<vmem>>, %arg12: memref<1x256xf32, #tpu.memory_space<vmem>>, %arg13: memref<64x256xf32, #tpu.memory_space<vmem>>, %arg14: memref<64x8xf32, #tpu.memory_space<vmem>>, %arg15: memref<1x8xf32, #tpu.memory_space<vmem>>, %arg16: memref<64x8xf32, #tpu.memory_space<vmem>>, %arg17: memref<1x1xf32, #tpu.memory_space<vmem>>, %arg18: memref<64x32xf32, #tpu.memory_space<vmem>>, %arg19: memref<64x32xf32, #tpu.memory_space<vmem>>, %arg20: memref<64x32xf32, #tpu.memory_space<vmem>>, %arg21: memref<64x32xf32, #tpu.memory_space<vmem>>, %arg22: memref<64x32xf32, #tpu.memory_space<vmem>>, %arg23: memref<64x32xf32, #tpu.memory_space<vmem>>) attributes {dimension_semantics = [], scalar_prefetch = 0 : i64, scratch_operands = 6 : i64, tpu.core_type = #tpu.core_type<tc>} {
    %0 = tpu.iota {dimensions = array<i32: 1>} : vector<8x128xi32>
    %c64_i32 = arith.constant 64 : i32
    %1 = vector.broadcast %c64_i32 : i32 to vector<8x128xi32>
    %2 = arith.cmpi sge, %0, %1 : vector<8x128xi32>
    %c96_i32 = arith.constant 96 : i32
    %3 = vector.broadcast %c96_i32 : i32 to vector<8x128xi32>
    %4 = arith.cmpi slt, %0, %3 : vector<8x128xi32>
    %5 = arith.andi %2, %4 : vector<8x128xi1>
    %cst = arith.constant 1.000000e+00 : f32
    %cst_0 = arith.constant 5.000000e-01 : f32
    %6 = vector.broadcast %cst : f32 to vector<8x128xf32>
    %7 = vector.broadcast %cst_0 : f32 to vector<8x128xf32>
    %8 = arith.select %5, %6, %7 : vector<8x128xi1>, vector<8x128xf32>
    %9 = tpu.iota {dimensions = array<i32: 1>} : vector<8x256xi32>
    %c128_i32 = arith.constant 128 : i32
    %10 = vector.broadcast %c128_i32 : i32 to vector<8x256xi32>
    %11 = arith.cmpi sge, %9, %10 : vector<8x256xi32>
    %c192_i32 = arith.constant 192 : i32
    %12 = vector.broadcast %c192_i32 : i32 to vector<8x256xi32>
    %13 = arith.cmpi slt, %9, %12 : vector<8x256xi32>
    %14 = arith.andi %11, %13 : vector<8x256xi1>
    %cst_1 = arith.constant 1.000000e+00 : f32
    %cst_2 = arith.constant 5.000000e-01 : f32
    %15 = vector.broadcast %cst_1 : f32 to vector<8x256xf32>
    %16 = vector.broadcast %cst_2 : f32 to vector<8x256xf32>
    %17 = arith.select %14, %15, %16 : vector<8x256xi1>, vector<8x256xf32>
    %c32_i32 = arith.constant 32 : i32
    %18 = vector.broadcast %c32_i32 : i32 to vector<8x256xi32>
    %19 = arith.cmpi sge, %9, %18 : vector<8x256xi32>
    %c64_i32_3 = arith.constant 64 : i32
    %20 = vector.broadcast %c64_i32_3 : i32 to vector<8x256xi32>
    %21 = arith.cmpi slt, %9, %20 : vector<8x256xi32>
    %22 = arith.andi %19, %21 : vector<8x256xi1>
    %c96_i32_4 = arith.constant 96 : i32
    %23 = vector.broadcast %c96_i32_4 : i32 to vector<8x256xi32>
    %24 = arith.cmpi sge, %9, %23 : vector<8x256xi32>
    %c128_i32_5 = arith.constant 128 : i32
    %25 = vector.broadcast %c128_i32_5 : i32 to vector<8x256xi32>
    %26 = arith.cmpi slt, %9, %25 : vector<8x256xi32>
    %27 = arith.andi %24, %26 : vector<8x256xi1>
    %28 = arith.ori %22, %27 : vector<8x256xi1>
    %c160_i32 = arith.constant 160 : i32
    %29 = vector.broadcast %c160_i32 : i32 to vector<8x256xi32>
    %30 = arith.cmpi sge, %9, %29 : vector<8x256xi32>
    %c192_i32_6 = arith.constant 192 : i32
    %31 = vector.broadcast %c192_i32_6 : i32 to vector<8x256xi32>
    %32 = arith.cmpi slt, %9, %31 : vector<8x256xi32>
    %33 = arith.andi %30, %32 : vector<8x256xi1>
    %34 = arith.ori %28, %33 : vector<8x256xi1>
    %c224_i32 = arith.constant 224 : i32
    %35 = vector.broadcast %c224_i32 : i32 to vector<8x256xi32>
    %36 = arith.cmpi sge, %9, %35 : vector<8x256xi32>
    %37 = arith.ori %34, %36 : vector<8x256xi1>
    %c0 = arith.constant 0 : index
    %c0_7 = arith.constant 0 : index
    %38 = vector.load %arg2[%c0, %c0_7] : memref<8x128xf32, #tpu.memory_space<vmem>>, vector<8x128xf32>
    %c0_8 = arith.constant 0 : index
    %c0_9 = arith.constant 0 : index
    %39 = vector.load %arg3[%c0_8, %c0_9] : memref<32x128xf32, #tpu.memory_space<vmem>>, vector<32x128xf32>
    %c0_10 = arith.constant 0 : index
    %c0_11 = arith.constant 0 : index
    %40 = vector.load %arg4[%c0_10, %c0_11] : memref<1x128xf32, #tpu.memory_space<vmem>>, vector<1x128xf32>
    %c0_12 = arith.constant 0 : index
    %c0_13 = arith.constant 0 : index
    %41 = vector.load %arg0[%c0_12, %c0_13] : memref<64x8xf32, #tpu.memory_space<vmem>>, vector<64x8xf32>
    %cst_14 = arith.constant dense<0.000000e+00> : vector<64x128xf32>
    %42 = tpu.matmul %41, %38, %cst_14 {dimension_numbers = #tpu.dot_dimension_numbers<[1], [0], [0], [1], [0, 0, 1, 1], [], []>} : vector<64x8xf32>, vector<8x128xf32>, vector<64x128xf32> -> vector<64x128xf32>
    %43 = vector.broadcast %40 : vector<1x128xf32> to vector<64x128xf32>
    %44 = arith.addf %42, %43 : vector<64x128xf32>
    %cst_15 = arith.constant 0.000000e+00 : f32
    %45 = vector.broadcast %cst_15 : f32 to vector<8x32xf32>
    %cst_16 = arith.constant 0.000000e+00 : f32
    %46 = vector.broadcast %cst_16 : f32 to vector<8x32xf32>
    %47 = vector.extract_strided_slice %44 {offsets = [0, 0], sizes = [8, 128], strides = [1, 1]} : vector<64x128xf32> to vector<8x128xf32>
    %cst_17 = arith.constant dense<0.000000e+00> : vector<8x128xf32>
    %48 = tpu.matmul %45, %39, %cst_17 {dimension_numbers = #tpu.dot_dimension_numbers<[1], [0], [0], [1], [0, 0, 1, 1], [], []>} : vector<8x32xf32>, vector<32x128xf32>, vector<8x128xf32> -> vector<8x128xf32>
    %49 = arith.addf %47, %48 : vector<8x128xf32>
    %50 = arith.mulf %49, %8 : vector<8x128xf32>
    %51 = math.tanh %50 : vector<8x128xf32>
    %cst_18 = arith.constant 1.000000e+00 : f32
    %52 = vector.broadcast %cst_18 : f32 to vector<8x128xf32>
    %53 = arith.addf %51, %52 : vector<8x128xf32>
    %cst_19 = arith.constant 5.000000e-01 : f32
    %54 = vector.broadcast %cst_19 : f32 to vector<8x128xf32>
    %55 = arith.mulf %54, %53 : vector<8x128xf32>
    %56 = arith.select %5, %51, %55 : vector<8x128xi1>, vector<8x128xf32>
    %57 = vector.extract_strided_slice %56 {offsets = [0, 32], sizes = [8, 32], strides = [1, 1]} : vector<8x128xf32> to vector<8x32xf32>
    %58 = arith.mulf %57, %46 : vector<8x32xf32>
    %59 = vector.extract_strided_slice %56 {offsets = [0, 0], sizes = [8, 32], strides = [1, 1]} : vector<8x128xf32> to vector<8x32xf32>
    %60 = vector.extract_strided_slice %56 {offsets = [0, 64], sizes = [8, 32], strides = [1, 1]} : vector<8x128xf32> to vector<8x32xf32>
    %61 = arith.mulf %59, %60 : vector<8x32xf32>
    %62 = arith.addf %58, %61 : vector<8x32xf32>
    %63 = vector.extract_strided_slice %56 {offsets = [0, 96], sizes = [8, 32], strides = [1, 1]} : vector<8x128xf32> to vector<8x32xf32>
    %64 = math.tanh %62 : vector<8x32xf32>
    %65 = arith.mulf %63, %64 : vector<8x32xf32>
    %c0_20 = arith.constant 0 : index
    %c0_21 = arith.constant 0 : index
    %66 = vector.load %arg18[%c0_20, %c0_21] : memref<64x32xf32, #tpu.memory_space<vmem>>, vector<8x32xf32>
    tpu.vector_store %arg18[%c0_20, %c0_21], %65 {strides = array<i32>} : memref<64x32xf32, #tpu.memory_space<vmem>>, vector<8x32xf32>,
    %67 = vector.extract_strided_slice %44 {offsets = [8, 0], sizes = [8, 128], strides = [1, 1]} : vector<64x128xf32> to vector<8x128xf32>
    %cst_22 = arith.constant dense<0.000000e+00> : vector<8x128xf32>
    %68 = tpu.matmul %65, %39, %cst_22 {dimension_numbers = #tpu.dot_dimension_numbers<[1], [0], [0], [1], [0, 0, 1, 1], [], []>} : vector<8x32xf32>, vector<32x128xf32>, vector<8x128xf32> -> vector<8x128xf32>
    %69 = arith.addf %67, %68 : vector<8x128xf32>
    %70 = arith.mulf %69, %8 : vector<8x128xf32>
    %71 = math.tanh %70 : vector<8x128xf32>
    %cst_23 = arith.constant 1.000000e+00 : f32
    %72 = vector.broadcast %cst_23 : f32 to vector<8x128xf32>
    %73 = arith.addf %71, %72 : vector<8x128xf32>
    %cst_24 = arith.constant 5.000000e-01 : f32
    %74 = vector.broadcast %cst_24 : f32 to vector<8x128xf32>
    %75 = arith.mulf %74, %73 : vector<8x128xf32>
    %76 = arith.select %5, %71, %75 : vector<8x128xi1>, vector<8x128xf32>
    %77 = vector.extract_strided_slice %76 {offsets = [0, 32], sizes = [8, 32], strides = [1, 1]} : vector<8x128xf32> to vector<8x32xf32>
    %78 = arith.mulf %77, %62 : vector<8x32xf32>
    %79 = vector.extract_strided_slice %76 {offsets = [0, 0], sizes = [8, 32], strides = [1, 1]} : vector<8x128xf32> to vector<8x32xf32>
    %80 = vector.extract_strided_slice %76 {offsets = [0, 64], sizes = [8, 32], strides = [1, 1]} : vector<8x128xf32> to vector<8x32xf32>
    %81 = arith.mulf %79, %80 : vector<8x32xf32>
    %82 = arith.addf %78, %81 : vector<8x32xf32>
    %83 = vector.extract_strided_slice %76 {offsets = [0, 96], sizes = [8, 32], strides = [1, 1]} : vector<8x128xf32> to vector<8x32xf32>
    %84 = math.tanh %82 : vector<8x32xf32>
    %85 = arith.mulf %83, %84 : vector<8x32xf32>
    %c8 = arith.constant 8 : index
    %c0_25 = arith.constant 0 : index
    %86 = vector.load %arg18[%c8, %c0_25] : memref<64x32xf32, #tpu.memory_space<vmem>>, vector<8x32xf32>
    tpu.vector_store %arg18[%c8, %c0_25], %85 {strides = array<i32>} : memref<64x32xf32, #tpu.memory_space<vmem>>, vector<8x32xf32>,
    %87 = vector.extract_strided_slice %44 {offsets = [16, 0], sizes = [8, 128], strides = [1, 1]} : vector<64x128xf32> to vector<8x128xf32>
    %cst_26 = arith.constant dense<0.000000e+00> : vector<8x128xf32>
    %88 = tpu.matmul %85, %39, %cst_26 {dimension_numbers = #tpu.dot_dimension_numbers<[1], [0], [0], [1], [0, 0, 1, 1], [], []>} : vector<8x32xf32>, vector<32x128xf32>, vector<8x128xf32> -> vector<8x128xf32>
    %89 = arith.addf %87, %88 : vector<8x128xf32>
    %90 = arith.mulf %89, %8 : vector<8x128xf32>
    %91 = math.tanh %90 : vector<8x128xf32>
    %cst_27 = arith.constant 1.000000e+00 : f32
    %92 = vector.broadcast %cst_27 : f32 to vector<8x128xf32>
    %93 = arith.addf %91, %92 : vector<8x128xf32>
    %cst_28 = arith.constant 5.000000e-01 : f32
    %94 = vector.broadcast %cst_28 : f32 to vector<8x128xf32>
    %95 = arith.mulf %94, %93 : vector<8x128xf32>
    %96 = arith.select %5, %91, %95 : vector<8x128xi1>, vector<8x128xf32>
    %97 = vector.extract_strided_slice %96 {offsets = [0, 32], sizes = [8, 32], strides = [1, 1]} : vector<8x128xf32> to vector<8x32xf32>
    %98 = arith.mulf %97, %82 : vector<8x32xf32>
    %99 = vector.extract_strided_slice %96 {offsets = [0, 0], sizes = [8, 32], strides = [1, 1]} : vector<8x128xf32> to vector<8x32xf32>
    %100 = vector.extract_strided_slice %96 {offsets = [0, 64], sizes = [8, 32], strides = [1, 1]} : vector<8x128xf32> to vector<8x32xf32>
    %101 = arith.mulf %99, %100 : vector<8x32xf32>
    %102 = arith.addf %98, %101 : vector<8x32xf32>
    %103 = vector.extract_strided_slice %96 {offsets = [0, 96], sizes = [8, 32], strides = [1, 1]} : vector<8x128xf32> to vector<8x32xf32>
    %104 = math.tanh %102 : vector<8x32xf32>
    %105 = arith.mulf %103, %104 : vector<8x32xf32>
    %c16 = arith.constant 16 : index
    %c0_29 = arith.constant 0 : index
    %106 = vector.load %arg18[%c16, %c0_29] : memref<64x32xf32, #tpu.memory_space<vmem>>, vector<8x32xf32>
    tpu.vector_store %arg18[%c16, %c0_29], %105 {strides = array<i32>} : memref<64x32xf32, #tpu.memory_space<vmem>>, vector<8x32xf32>,
    %107 = vector.extract_strided_slice %44 {offsets = [24, 0], sizes = [8, 128], strides = [1, 1]} : vector<64x128xf32> to vector<8x128xf32>
    %cst_30 = arith.constant dense<0.000000e+00> : vector<8x128xf32>
    %108 = tpu.matmul %105, %39, %cst_30 {dimension_numbers = #tpu.dot_dimension_numbers<[1], [0], [0], [1], [0, 0, 1, 1], [], []>} : vector<8x32xf32>, vector<32x128xf32>, vector<8x128xf32> -> vector<8x128xf32>
    %109 = arith.addf %107, %108 : vector<8x128xf32>
    %110 = arith.mulf %109, %8 : vector<8x128xf32>
    %111 = math.tanh %110 : vector<8x128xf32>
    %cst_31 = arith.constant 1.000000e+00 : f32
    %112 = vector.broadcast %cst_31 : f32 to vector<8x128xf32>
    %113 = arith.addf %111, %112 : vector<8x128xf32>
    %cst_32 = arith.constant 5.000000e-01 : f32
    %114 = vector.broadcast %cst_32 : f32 to vector<8x128xf32>
    %115 = arith.mulf %114, %113 : vector<8x128xf32>
    %116 = arith.select %5, %111, %115 : vector<8x128xi1>, vector<8x128xf32>
    %117 = vector.extract_strided_slice %116 {offsets = [0, 32], sizes = [8, 32], strides = [1, 1]} : vector<8x128xf32> to vector<8x32xf32>
    %118 = arith.mulf %117, %102 : vector<8x32xf32>
    %119 = vector.extract_strided_slice %116 {offsets = [0, 0], sizes = [8, 32], strides = [1, 1]} : vector<8x128xf32> to vector<8x32xf32>
    %120 = vector.extract_strided_slice %116 {offsets = [0, 64], sizes = [8, 32], strides = [1, 1]} : vector<8x128xf32> to vector<8x32xf32>
    %121 = arith.mulf %119, %120 : vector<8x32xf32>
    %122 = arith.addf %118, %121 : vector<8x32xf32>
    %123 = vector.extract_strided_slice %116 {offsets = [0, 96], sizes = [8, 32], strides = [1, 1]} : vector<8x128xf32> to vector<8x32xf32>
    %124 = math.tanh %122 : vector<8x32xf32>
    %125 = arith.mulf %123, %124 : vector<8x32xf32>
    %c24 = arith.constant 24 : index
    %c0_33 = arith.constant 0 : index
    %126 = vector.load %arg18[%c24, %c0_33] : memref<64x32xf32, #tpu.memory_space<vmem>>, vector<8x32xf32>
    tpu.vector_store %arg18[%c24, %c0_33], %125 {strides = array<i32>} : memref<64x32xf32, #tpu.memory_space<vmem>>, vector<8x32xf32>,
    %127 = vector.extract_strided_slice %44 {offsets = [32, 0], sizes = [8, 128], strides = [1, 1]} : vector<64x128xf32> to vector<8x128xf32>
    %cst_34 = arith.constant dense<0.000000e+00> : vector<8x128xf32>
    %128 = tpu.matmul %125, %39, %cst_34 {dimension_numbers = #tpu.dot_dimension_numbers<[1], [0], [0], [1], [0, 0, 1, 1], [], []>} : vector<8x32xf32>, vector<32x128xf32>, vector<8x128xf32> -> vector<8x128xf32>
    %129 = arith.addf %127, %128 : vector<8x128xf32>
    %130 = arith.mulf %129, %8 : vector<8x128xf32>
    %131 = math.tanh %130 : vector<8x128xf32>
    %cst_35 = arith.constant 1.000000e+00 : f32
    %132 = vector.broadcast %cst_35 : f32 to vector<8x128xf32>
    %133 = arith.addf %131, %132 : vector<8x128xf32>
    %cst_36 = arith.constant 5.000000e-01 : f32
    %134 = vector.broadcast %cst_36 : f32 to vector<8x128xf32>
    %135 = arith.mulf %134, %133 : vector<8x128xf32>
    %136 = arith.select %5, %131, %135 : vector<8x128xi1>, vector<8x128xf32>
    %137 = vector.extract_strided_slice %136 {offsets = [0, 32], sizes = [8, 32], strides = [1, 1]} : vector<8x128xf32> to vector<8x32xf32>
    %138 = arith.mulf %137, %122 : vector<8x32xf32>
    %139 = vector.extract_strided_slice %136 {offsets = [0, 0], sizes = [8, 32], strides = [1, 1]} : vector<8x128xf32> to vector<8x32xf32>
    %140 = vector.extract_strided_slice %136 {offsets = [0, 64], sizes = [8, 32], strides = [1, 1]} : vector<8x128xf32> to vector<8x32xf32>
    %141 = arith.mulf %139, %140 : vector<8x32xf32>
    %142 = arith.addf %138, %141 : vector<8x32xf32>
    %143 = vector.extract_strided_slice %136 {offsets = [0, 96], sizes = [8, 32], strides = [1, 1]} : vector<8x128xf32> to vector<8x32xf32>
    %144 = math.tanh %142 : vector<8x32xf32>
    %145 = arith.mulf %143, %144 : vector<8x32xf32>
    %c32 = arith.constant 32 : index
    %c0_37 = arith.constant 0 : index
    %146 = vector.load %arg18[%c32, %c0_37] : memref<64x32xf32, #tpu.memory_space<vmem>>, vector<8x32xf32>
    tpu.vector_store %arg18[%c32, %c0_37], %145 {strides = array<i32>} : memref<64x32xf32, #tpu.memory_space<vmem>>, vector<8x32xf32>,
    %147 = vector.extract_strided_slice %44 {offsets = [40, 0], sizes = [8, 128], strides = [1, 1]} : vector<64x128xf32> to vector<8x128xf32>
    %cst_38 = arith.constant dense<0.000000e+00> : vector<8x128xf32>
    %148 = tpu.matmul %145, %39, %cst_38 {dimension_numbers = #tpu.dot_dimension_numbers<[1], [0], [0], [1], [0, 0, 1, 1], [], []>} : vector<8x32xf32>, vector<32x128xf32>, vector<8x128xf32> -> vector<8x128xf32>
    %149 = arith.addf %147, %148 : vector<8x128xf32>
    %150 = arith.mulf %149, %8 : vector<8x128xf32>
    %151 = math.tanh %150 : vector<8x128xf32>
    %cst_39 = arith.constant 1.000000e+00 : f32
    %152 = vector.broadcast %cst_39 : f32 to vector<8x128xf32>
    %153 = arith.addf %151, %152 : vector<8x128xf32>
    %cst_40 = arith.constant 5.000000e-01 : f32
    %154 = vector.broadcast %cst_40 : f32 to vector<8x128xf32>
    %155 = arith.mulf %154, %153 : vector<8x128xf32>
    %156 = arith.select %5, %151, %155 : vector<8x128xi1>, vector<8x128xf32>
    %157 = vector.extract_strided_slice %156 {offsets = [0, 32], sizes = [8, 32], strides = [1, 1]} : vector<8x128xf32> to vector<8x32xf32>
    %158 = arith.mulf %157, %142 : vector<8x32xf32>
    %159 = vector.extract_strided_slice %156 {offsets = [0, 0], sizes = [8, 32], strides = [1, 1]} : vector<8x128xf32> to vector<8x32xf32>
    %160 = vector.extract_strided_slice %156 {offsets = [0, 64], sizes = [8, 32], strides = [1, 1]} : vector<8x128xf32> to vector<8x32xf32>
    %161 = arith.mulf %159, %160 : vector<8x32xf32>
    %162 = arith.addf %158, %161 : vector<8x32xf32>
    %163 = vector.extract_strided_slice %156 {offsets = [0, 96], sizes = [8, 32], strides = [1, 1]} : vector<8x128xf32> to vector<8x32xf32>
    %164 = math.tanh %162 : vector<8x32xf32>
    %165 = arith.mulf %163, %164 : vector<8x32xf32>
    %c40 = arith.constant 40 : index
    %c0_41 = arith.constant 0 : index
    %166 = vector.load %arg18[%c40, %c0_41] : memref<64x32xf32, #tpu.memory_space<vmem>>, vector<8x32xf32>
    tpu.vector_store %arg18[%c40, %c0_41], %165 {strides = array<i32>} : memref<64x32xf32, #tpu.memory_space<vmem>>, vector<8x32xf32>,
    %167 = vector.extract_strided_slice %44 {offsets = [48, 0], sizes = [8, 128], strides = [1, 1]} : vector<64x128xf32> to vector<8x128xf32>
    %cst_42 = arith.constant dense<0.000000e+00> : vector<8x128xf32>
    %168 = tpu.matmul %165, %39, %cst_42 {dimension_numbers = #tpu.dot_dimension_numbers<[1], [0], [0], [1], [0, 0, 1, 1], [], []>} : vector<8x32xf32>, vector<32x128xf32>, vector<8x128xf32> -> vector<8x128xf32>
    %169 = arith.addf %167, %168 : vector<8x128xf32>
    %170 = arith.mulf %169, %8 : vector<8x128xf32>
    %171 = math.tanh %170 : vector<8x128xf32>
    %cst_43 = arith.constant 1.000000e+00 : f32
    %172 = vector.broadcast %cst_43 : f32 to vector<8x128xf32>
    %173 = arith.addf %171, %172 : vector<8x128xf32>
    %cst_44 = arith.constant 5.000000e-01 : f32
    %174 = vector.broadcast %cst_44 : f32 to vector<8x128xf32>
    %175 = arith.mulf %174, %173 : vector<8x128xf32>
    %176 = arith.select %5, %171, %175 : vector<8x128xi1>, vector<8x128xf32>
    %177 = vector.extract_strided_slice %176 {offsets = [0, 32], sizes = [8, 32], strides = [1, 1]} : vector<8x128xf32> to vector<8x32xf32>
    %178 = arith.mulf %177, %162 : vector<8x32xf32>
    %179 = vector.extract_strided_slice %176 {offsets = [0, 0], sizes = [8, 32], strides = [1, 1]} : vector<8x128xf32> to vector<8x32xf32>
    %180 = vector.extract_strided_slice %176 {offsets = [0, 64], sizes = [8, 32], strides = [1, 1]} : vector<8x128xf32> to vector<8x32xf32>
    %181 = arith.mulf %179, %180 : vector<8x32xf32>
    %182 = arith.addf %178, %181 : vector<8x32xf32>
    %183 = vector.extract_strided_slice %176 {offsets = [0, 96], sizes = [8, 32], strides = [1, 1]} : vector<8x128xf32> to vector<8x32xf32>
    %184 = math.tanh %182 : vector<8x32xf32>
    %185 = arith.mulf %183, %184 : vector<8x32xf32>
    %c48 = arith.constant 48 : index
    %c0_45 = arith.constant 0 : index
    %186 = vector.load %arg18[%c48, %c0_45] : memref<64x32xf32, #tpu.memory_space<vmem>>, vector<8x32xf32>
    tpu.vector_store %arg18[%c48, %c0_45], %185 {strides = array<i32>} : memref<64x32xf32, #tpu.memory_space<vmem>>, vector<8x32xf32>,
    %187 = vector.extract_strided_slice %44 {offsets = [56, 0], sizes = [8, 128], strides = [1, 1]} : vector<64x128xf32> to vector<8x128xf32>
    %cst_46 = arith.constant dense<0.000000e+00> : vector<8x128xf32>
    %188 = tpu.matmul %185, %39, %cst_46 {dimension_numbers = #tpu.dot_dimension_numbers<[1], [0], [0], [1], [0, 0, 1, 1], [], []>} : vector<8x32xf32>, vector<32x128xf32>, vector<8x128xf32> -> vector<8x128xf32>
    %189 = arith.addf %187, %188 : vector<8x128xf32>
    %190 = arith.mulf %189, %8 : vector<8x128xf32>
    %191 = math.tanh %190 : vector<8x128xf32>
    %cst_47 = arith.constant 1.000000e+00 : f32
    %192 = vector.broadcast %cst_47 : f32 to vector<8x128xf32>
    %193 = arith.addf %191, %192 : vector<8x128xf32>
    %cst_48 = arith.constant 5.000000e-01 : f32
    %194 = vector.broadcast %cst_48 : f32 to vector<8x128xf32>
    %195 = arith.mulf %194, %193 : vector<8x128xf32>
    %196 = arith.select %5, %191, %195 : vector<8x128xi1>, vector<8x128xf32>
    %197 = vector.extract_strided_slice %196 {offsets = [0, 32], sizes = [8, 32], strides = [1, 1]} : vector<8x128xf32> to vector<8x32xf32>
    %198 = arith.mulf %197, %182 : vector<8x32xf32>
    %199 = vector.extract_strided_slice %196 {offsets = [0, 0], sizes = [8, 32], strides = [1, 1]} : vector<8x128xf32> to vector<8x32xf32>
    %200 = vector.extract_strided_slice %196 {offsets = [0, 64], sizes = [8, 32], strides = [1, 1]} : vector<8x128xf32> to vector<8x32xf32>
    %201 = arith.mulf %199, %200 : vector<8x32xf32>
    %202 = arith.addf %198, %201 : vector<8x32xf32>
    %203 = vector.extract_strided_slice %196 {offsets = [0, 96], sizes = [8, 32], strides = [1, 1]} : vector<8x128xf32> to vector<8x32xf32>
    %204 = math.tanh %202 : vector<8x32xf32>
    %205 = arith.mulf %203, %204 : vector<8x32xf32>
    %c56 = arith.constant 56 : index
    %c0_49 = arith.constant 0 : index
    %206 = vector.load %arg18[%c56, %c0_49] : memref<64x32xf32, #tpu.memory_space<vmem>>, vector<8x32xf32>
    tpu.vector_store %arg18[%c56, %c0_49], %205 {strides = array<i32>} : memref<64x32xf32, #tpu.memory_space<vmem>>, vector<8x32xf32>,
    %c0_50 = arith.constant 0 : index
    %c0_51 = arith.constant 0 : index
    %207 = vector.load %arg5[%c0_50, %c0_51] : memref<32x128xf32, #tpu.memory_space<vmem>>, vector<32x128xf32>
    %c0_52 = arith.constant 0 : index
    %c0_53 = arith.constant 0 : index
    %208 = vector.load %arg6[%c0_52, %c0_53] : memref<32x128xf32, #tpu.memory_space<vmem>>, vector<32x128xf32>
    %c0_54 = arith.constant 0 : index
    %c0_55 = arith.constant 0 : index
    %209 = vector.load %arg7[%c0_54, %c0_55] : memref<1x128xf32, #tpu.memory_space<vmem>>, vector<1x128xf32>
    %c0_56 = arith.constant 0 : index
    %c0_57 = arith.constant 0 : index
    %210 = vector.load %arg18[%c0_56, %c0_57] : memref<64x32xf32, #tpu.memory_space<vmem>>, vector<64x32xf32>
    %cst_58 = arith.constant dense<0.000000e+00> : vector<64x128xf32>
    %211 = tpu.matmul %210, %207, %cst_58 {dimension_numbers = #tpu.dot_dimension_numbers<[1], [0], [0], [1], [0, 0, 1, 1], [], []>} : vector<64x32xf32>, vector<32x128xf32>, vector<64x128xf32> -> vector<64x128xf32>
    %212 = vector.broadcast %209 : vector<1x128xf32> to vector<64x128xf32>
    %213 = arith.addf %211, %212 : vector<64x128xf32>
    %cst_59 = arith.constant 0.000000e+00 : f32
    %214 = vector.broadcast %cst_59 : f32 to vector<8x32xf32>
    %cst_60 = arith.constant 0.000000e+00 : f32
    %215 = vector.broadcast %cst_60 : f32 to vector<8x32xf32>
    %216 = vector.extract_strided_slice %213 {offsets = [0, 0], sizes = [8, 128], strides = [1, 1]} : vector<64x128xf32> to vector<8x128xf32>
    %cst_61 = arith.constant dense<0.000000e+00> : vector<8x128xf32>
    %217 = tpu.matmul %214, %208, %cst_61 {dimension_numbers = #tpu.dot_dimension_numbers<[1], [0], [0], [1], [0, 0, 1, 1], [], []>} : vector<8x32xf32>, vector<32x128xf32>, vector<8x128xf32> -> vector<8x128xf32>
    %218 = arith.addf %216, %217 : vector<8x128xf32>
    %219 = arith.mulf %218, %8 : vector<8x128xf32>
    %220 = math.tanh %219 : vector<8x128xf32>
    %cst_62 = arith.constant 1.000000e+00 : f32
    %221 = vector.broadcast %cst_62 : f32 to vector<8x128xf32>
    %222 = arith.addf %220, %221 : vector<8x128xf32>
    %cst_63 = arith.constant 5.000000e-01 : f32
    %223 = vector.broadcast %cst_63 : f32 to vector<8x128xf32>
    %224 = arith.mulf %223, %222 : vector<8x128xf32>
    %225 = arith.select %5, %220, %224 : vector<8x128xi1>, vector<8x128xf32>
    %226 = vector.extract_strided_slice %225 {offsets = [0, 32], sizes = [8, 32], strides = [1, 1]} : vector<8x128xf32> to vector<8x32xf32>
    %227 = arith.mulf %226, %215 : vector<8x32xf32>
    %228 = vector.extract_strided_slice %225 {offsets = [0, 0], sizes = [8, 32], strides = [1, 1]} : vector<8x128xf32> to vector<8x32xf32>
    %229 = vector.extract_strided_slice %225 {offsets = [0, 64], sizes = [8, 32], strides = [1, 1]} : vector<8x128xf32> to vector<8x32xf32>
    %230 = arith.mulf %228, %229 : vector<8x32xf32>
    %231 = arith.addf %227, %230 : vector<8x32xf32>
    %232 = vector.extract_strided_slice %225 {offsets = [0, 96], sizes = [8, 32], strides = [1, 1]} : vector<8x128xf32> to vector<8x32xf32>
    %233 = math.tanh %231 : vector<8x32xf32>
    %234 = arith.mulf %232, %233 : vector<8x32xf32>
    %235 = vector.extract_strided_slice %213 {offsets = [8, 0], sizes = [8, 128], strides = [1, 1]} : vector<64x128xf32> to vector<8x128xf32>
    %cst_64 = arith.constant dense<0.000000e+00> : vector<8x128xf32>
    %236 = tpu.matmul %234, %208, %cst_64 {dimension_numbers = #tpu.dot_dimension_numbers<[1], [0], [0], [1], [0, 0, 1, 1], [], []>} : vector<8x32xf32>, vector<32x128xf32>, vector<8x128xf32> -> vector<8x128xf32>
    %237 = arith.addf %235, %236 : vector<8x128xf32>
    %238 = arith.mulf %237, %8 : vector<8x128xf32>
    %239 = math.tanh %238 : vector<8x128xf32>
    %cst_65 = arith.constant 1.000000e+00 : f32
    %240 = vector.broadcast %cst_65 : f32 to vector<8x128xf32>
    %241 = arith.addf %239, %240 : vector<8x128xf32>
    %cst_66 = arith.constant 5.000000e-01 : f32
    %242 = vector.broadcast %cst_66 : f32 to vector<8x128xf32>
    %243 = arith.mulf %242, %241 : vector<8x128xf32>
    %244 = arith.select %5, %239, %243 : vector<8x128xi1>, vector<8x128xf32>
    %245 = vector.extract_strided_slice %244 {offsets = [0, 32], sizes = [8, 32], strides = [1, 1]} : vector<8x128xf32> to vector<8x32xf32>
    %246 = arith.mulf %245, %231 : vector<8x32xf32>
    %247 = vector.extract_strided_slice %244 {offsets = [0, 0], sizes = [8, 32], strides = [1, 1]} : vector<8x128xf32> to vector<8x32xf32>
    %248 = vector.extract_strided_slice %244 {offsets = [0, 64], sizes = [8, 32], strides = [1, 1]} : vector<8x128xf32> to vector<8x32xf32>
    %249 = arith.mulf %247, %248 : vector<8x32xf32>
    %250 = arith.addf %246, %249 : vector<8x32xf32>
    %251 = vector.extract_strided_slice %244 {offsets = [0, 96], sizes = [8, 32], strides = [1, 1]} : vector<8x128xf32> to vector<8x32xf32>
    %252 = math.tanh %250 : vector<8x32xf32>
    %253 = arith.mulf %251, %252 : vector<8x32xf32>
    %254 = vector.extract_strided_slice %213 {offsets = [16, 0], sizes = [8, 128], strides = [1, 1]} : vector<64x128xf32> to vector<8x128xf32>
    %cst_67 = arith.constant dense<0.000000e+00> : vector<8x128xf32>
    %255 = tpu.matmul %253, %208, %cst_67 {dimension_numbers = #tpu.dot_dimension_numbers<[1], [0], [0], [1], [0, 0, 1, 1], [], []>} : vector<8x32xf32>, vector<32x128xf32>, vector<8x128xf32> -> vector<8x128xf32>
    %256 = arith.addf %254, %255 : vector<8x128xf32>
    %257 = arith.mulf %256, %8 : vector<8x128xf32>
    %258 = math.tanh %257 : vector<8x128xf32>
    %cst_68 = arith.constant 1.000000e+00 : f32
    %259 = vector.broadcast %cst_68 : f32 to vector<8x128xf32>
    %260 = arith.addf %258, %259 : vector<8x128xf32>
    %cst_69 = arith.constant 5.000000e-01 : f32
    %261 = vector.broadcast %cst_69 : f32 to vector<8x128xf32>
    %262 = arith.mulf %261, %260 : vector<8x128xf32>
    %263 = arith.select %5, %258, %262 : vector<8x128xi1>, vector<8x128xf32>
    %264 = vector.extract_strided_slice %263 {offsets = [0, 32], sizes = [8, 32], strides = [1, 1]} : vector<8x128xf32> to vector<8x32xf32>
    %265 = arith.mulf %264, %250 : vector<8x32xf32>
    %266 = vector.extract_strided_slice %263 {offsets = [0, 0], sizes = [8, 32], strides = [1, 1]} : vector<8x128xf32> to vector<8x32xf32>
    %267 = vector.extract_strided_slice %263 {offsets = [0, 64], sizes = [8, 32], strides = [1, 1]} : vector<8x128xf32> to vector<8x32xf32>
    %268 = arith.mulf %266, %267 : vector<8x32xf32>
    %269 = arith.addf %265, %268 : vector<8x32xf32>
    %270 = vector.extract_strided_slice %263 {offsets = [0, 96], sizes = [8, 32], strides = [1, 1]} : vector<8x128xf32> to vector<8x32xf32>
    %271 = math.tanh %269 : vector<8x32xf32>
    %272 = arith.mulf %270, %271 : vector<8x32xf32>
    %273 = vector.extract_strided_slice %213 {offsets = [24, 0], sizes = [8, 128], strides = [1, 1]} : vector<64x128xf32> to vector<8x128xf32>
    %cst_70 = arith.constant dense<0.000000e+00> : vector<8x128xf32>
    %274 = tpu.matmul %272, %208, %cst_70 {dimension_numbers = #tpu.dot_dimension_numbers<[1], [0], [0], [1], [0, 0, 1, 1], [], []>} : vector<8x32xf32>, vector<32x128xf32>, vector<8x128xf32> -> vector<8x128xf32>
    %275 = arith.addf %273, %274 : vector<8x128xf32>
    %276 = arith.mulf %275, %8 : vector<8x128xf32>
    %277 = math.tanh %276 : vector<8x128xf32>
    %cst_71 = arith.constant 1.000000e+00 : f32
    %278 = vector.broadcast %cst_71 : f32 to vector<8x128xf32>
    %279 = arith.addf %277, %278 : vector<8x128xf32>
    %cst_72 = arith.constant 5.000000e-01 : f32
    %280 = vector.broadcast %cst_72 : f32 to vector<8x128xf32>
    %281 = arith.mulf %280, %279 : vector<8x128xf32>
    %282 = arith.select %5, %277, %281 : vector<8x128xi1>, vector<8x128xf32>
    %283 = vector.extract_strided_slice %282 {offsets = [0, 32], sizes = [8, 32], strides = [1, 1]} : vector<8x128xf32> to vector<8x32xf32>
    %284 = arith.mulf %283, %269 : vector<8x32xf32>
    %285 = vector.extract_strided_slice %282 {offsets = [0, 0], sizes = [8, 32], strides = [1, 1]} : vector<8x128xf32> to vector<8x32xf32>
    %286 = vector.extract_strided_slice %282 {offsets = [0, 64], sizes = [8, 32], strides = [1, 1]} : vector<8x128xf32> to vector<8x32xf32>
    %287 = arith.mulf %285, %286 : vector<8x32xf32>
    %288 = arith.addf %284, %287 : vector<8x32xf32>
    %289 = vector.extract_strided_slice %282 {offsets = [0, 96], sizes = [8, 32], strides = [1, 1]} : vector<8x128xf32> to vector<8x32xf32>
    %290 = math.tanh %288 : vector<8x32xf32>
    %291 = arith.mulf %289, %290 : vector<8x32xf32>
    %292 = vector.extract_strided_slice %213 {offsets = [32, 0], sizes = [8, 128], strides = [1, 1]} : vector<64x128xf32> to vector<8x128xf32>
    %cst_73 = arith.constant dense<0.000000e+00> : vector<8x128xf32>
    %293 = tpu.matmul %291, %208, %cst_73 {dimension_numbers = #tpu.dot_dimension_numbers<[1], [0], [0], [1], [0, 0, 1, 1], [], []>} : vector<8x32xf32>, vector<32x128xf32>, vector<8x128xf32> -> vector<8x128xf32>
    %294 = arith.addf %292, %293 : vector<8x128xf32>
    %295 = arith.mulf %294, %8 : vector<8x128xf32>
    %296 = math.tanh %295 : vector<8x128xf32>
    %cst_74 = arith.constant 1.000000e+00 : f32
    %297 = vector.broadcast %cst_74 : f32 to vector<8x128xf32>
    %298 = arith.addf %296, %297 : vector<8x128xf32>
    %cst_75 = arith.constant 5.000000e-01 : f32
    %299 = vector.broadcast %cst_75 : f32 to vector<8x128xf32>
    %300 = arith.mulf %299, %298 : vector<8x128xf32>
    %301 = arith.select %5, %296, %300 : vector<8x128xi1>, vector<8x128xf32>
    %302 = vector.extract_strided_slice %301 {offsets = [0, 32], sizes = [8, 32], strides = [1, 1]} : vector<8x128xf32> to vector<8x32xf32>
    %303 = arith.mulf %302, %288 : vector<8x32xf32>
    %304 = vector.extract_strided_slice %301 {offsets = [0, 0], sizes = [8, 32], strides = [1, 1]} : vector<8x128xf32> to vector<8x32xf32>
    %305 = vector.extract_strided_slice %301 {offsets = [0, 64], sizes = [8, 32], strides = [1, 1]} : vector<8x128xf32> to vector<8x32xf32>
    %306 = arith.mulf %304, %305 : vector<8x32xf32>
    %307 = arith.addf %303, %306 : vector<8x32xf32>
    %308 = vector.extract_strided_slice %301 {offsets = [0, 96], sizes = [8, 32], strides = [1, 1]} : vector<8x128xf32> to vector<8x32xf32>
    %309 = math.tanh %307 : vector<8x32xf32>
    %310 = arith.mulf %308, %309 : vector<8x32xf32>
    %311 = vector.extract_strided_slice %213 {offsets = [40, 0], sizes = [8, 128], strides = [1, 1]} : vector<64x128xf32> to vector<8x128xf32>
    %cst_76 = arith.constant dense<0.000000e+00> : vector<8x128xf32>
    %312 = tpu.matmul %310, %208, %cst_76 {dimension_numbers = #tpu.dot_dimension_numbers<[1], [0], [0], [1], [0, 0, 1, 1], [], []>} : vector<8x32xf32>, vector<32x128xf32>, vector<8x128xf32> -> vector<8x128xf32>
    %313 = arith.addf %311, %312 : vector<8x128xf32>
    %314 = arith.mulf %313, %8 : vector<8x128xf32>
    %315 = math.tanh %314 : vector<8x128xf32>
    %cst_77 = arith.constant 1.000000e+00 : f32
    %316 = vector.broadcast %cst_77 : f32 to vector<8x128xf32>
    %317 = arith.addf %315, %316 : vector<8x128xf32>
    %cst_78 = arith.constant 5.000000e-01 : f32
    %318 = vector.broadcast %cst_78 : f32 to vector<8x128xf32>
    %319 = arith.mulf %318, %317 : vector<8x128xf32>
    %320 = arith.select %5, %315, %319 : vector<8x128xi1>, vector<8x128xf32>
    %321 = vector.extract_strided_slice %320 {offsets = [0, 32], sizes = [8, 32], strides = [1, 1]} : vector<8x128xf32> to vector<8x32xf32>
    %322 = arith.mulf %321, %307 : vector<8x32xf32>
    %323 = vector.extract_strided_slice %320 {offsets = [0, 0], sizes = [8, 32], strides = [1, 1]} : vector<8x128xf32> to vector<8x32xf32>
    %324 = vector.extract_strided_slice %320 {offsets = [0, 64], sizes = [8, 32], strides = [1, 1]} : vector<8x128xf32> to vector<8x32xf32>
    %325 = arith.mulf %323, %324 : vector<8x32xf32>
    %326 = arith.addf %322, %325 : vector<8x32xf32>
    %327 = vector.extract_strided_slice %320 {offsets = [0, 96], sizes = [8, 32], strides = [1, 1]} : vector<8x128xf32> to vector<8x32xf32>
    %328 = math.tanh %326 : vector<8x32xf32>
    %329 = arith.mulf %327, %328 : vector<8x32xf32>
    %330 = vector.extract_strided_slice %213 {offsets = [48, 0], sizes = [8, 128], strides = [1, 1]} : vector<64x128xf32> to vector<8x128xf32>
    %cst_79 = arith.constant dense<0.000000e+00> : vector<8x128xf32>
    %331 = tpu.matmul %329, %208, %cst_79 {dimension_numbers = #tpu.dot_dimension_numbers<[1], [0], [0], [1], [0, 0, 1, 1], [], []>} : vector<8x32xf32>, vector<32x128xf32>, vector<8x128xf32> -> vector<8x128xf32>
    %332 = arith.addf %330, %331 : vector<8x128xf32>
    %333 = arith.mulf %332, %8 : vector<8x128xf32>
    %334 = math.tanh %333 : vector<8x128xf32>
    %cst_80 = arith.constant 1.000000e+00 : f32
    %335 = vector.broadcast %cst_80 : f32 to vector<8x128xf32>
    %336 = arith.addf %334, %335 : vector<8x128xf32>
    %cst_81 = arith.constant 5.000000e-01 : f32
    %337 = vector.broadcast %cst_81 : f32 to vector<8x128xf32>
    %338 = arith.mulf %337, %336 : vector<8x128xf32>
    %339 = arith.select %5, %334, %338 : vector<8x128xi1>, vector<8x128xf32>
    %340 = vector.extract_strided_slice %339 {offsets = [0, 32], sizes = [8, 32], strides = [1, 1]} : vector<8x128xf32> to vector<8x32xf32>
    %341 = arith.mulf %340, %326 : vector<8x32xf32>
    %342 = vector.extract_strided_slice %339 {offsets = [0, 0], sizes = [8, 32], strides = [1, 1]} : vector<8x128xf32> to vector<8x32xf32>
    %343 = vector.extract_strided_slice %339 {offsets = [0, 64], sizes = [8, 32], strides = [1, 1]} : vector<8x128xf32> to vector<8x32xf32>
    %344 = arith.mulf %342, %343 : vector<8x32xf32>
    %345 = arith.addf %341, %344 : vector<8x32xf32>
    %346 = vector.extract_strided_slice %339 {offsets = [0, 96], sizes = [8, 32], strides = [1, 1]} : vector<8x128xf32> to vector<8x32xf32>
    %347 = math.tanh %345 : vector<8x32xf32>
    %348 = arith.mulf %346, %347 : vector<8x32xf32>
    %349 = vector.extract_strided_slice %213 {offsets = [56, 0], sizes = [8, 128], strides = [1, 1]} : vector<64x128xf32> to vector<8x128xf32>
    %cst_82 = arith.constant dense<0.000000e+00> : vector<8x128xf32>
    %350 = tpu.matmul %348, %208, %cst_82 {dimension_numbers = #tpu.dot_dimension_numbers<[1], [0], [0], [1], [0, 0, 1, 1], [], []>} : vector<8x32xf32>, vector<32x128xf32>, vector<8x128xf32> -> vector<8x128xf32>
    %351 = arith.addf %349, %350 : vector<8x128xf32>
    %352 = arith.mulf %351, %8 : vector<8x128xf32>
    %353 = math.tanh %352 : vector<8x128xf32>
    %cst_83 = arith.constant 1.000000e+00 : f32
    %354 = vector.broadcast %cst_83 : f32 to vector<8x128xf32>
    %355 = arith.addf %353, %354 : vector<8x128xf32>
    %cst_84 = arith.constant 5.000000e-01 : f32
    %356 = vector.broadcast %cst_84 : f32 to vector<8x128xf32>
    %357 = arith.mulf %356, %355 : vector<8x128xf32>
    %358 = arith.select %5, %353, %357 : vector<8x128xi1>, vector<8x128xf32>
    %359 = vector.extract_strided_slice %358 {offsets = [0, 32], sizes = [8, 32], strides = [1, 1]} : vector<8x128xf32> to vector<8x32xf32>
    %360 = arith.mulf %359, %345 : vector<8x32xf32>
    %361 = vector.extract_strided_slice %358 {offsets = [0, 0], sizes = [8, 32], strides = [1, 1]} : vector<8x128xf32> to vector<8x32xf32>
    %362 = vector.extract_strided_slice %358 {offsets = [0, 64], sizes = [8, 32], strides = [1, 1]} : vector<8x128xf32> to vector<8x32xf32>
    %363 = arith.mulf %361, %362 : vector<8x32xf32>
    %364 = arith.addf %360, %363 : vector<8x32xf32>
    %365 = vector.extract_strided_slice %358 {offsets = [0, 96], sizes = [8, 32], strides = [1, 1]} : vector<8x128xf32> to vector<8x32xf32>
    %366 = math.tanh %364 : vector<8x32xf32>
    %367 = arith.mulf %365, %366 : vector<8x32xf32>
    %c0_85 = arith.constant 0 : index
    %c0_86 = arith.constant 0 : index
    %368 = vector.load %arg8[%c0_85, %c0_86] : memref<32x2048xf32, #tpu.memory_space<vmem>>, vector<32x2048xf32>
    %c0_87 = arith.constant 0 : index
    %c0_88 = arith.constant 0 : index
    %369 = vector.load %arg9[%c0_87, %c0_88] : memref<1x2048xf32, #tpu.memory_space<vmem>>, vector<1x2048xf32>
    %c0_89 = arith.constant 0 : index
    %c0_90 = arith.constant 0 : index
    %370 = vector.load %arg10[%c0_89, %c0_90] : memref<64x256xf32, #tpu.memory_space<vmem>>, vector<64x256xf32>
    %cst_91 = arith.constant dense<0.000000e+00> : vector<8x2048xf32>
    %371 = tpu.matmul %367, %368, %cst_91 {dimension_numbers = #tpu.dot_dimension_numbers<[1], [0], [0], [1], [0, 0, 1, 1], [], []>} : vector<8x32xf32>, vector<32x2048xf32>, vector<8x2048xf32> -> vector<8x2048xf32>
    %372 = vector.broadcast %369 : vector<1x2048xf32> to vector<8x2048xf32>
    %373 = arith.addf %371, %372 : vector<8x2048xf32>
    %cst_92 = arith.constant 0.000000e+00 : f32
    %374 = vector.broadcast %cst_92 : f32 to vector<8x64xf32>
    %cst_93 = arith.constant 0.000000e+00 : f32
    %375 = vector.broadcast %cst_93 : f32 to vector<8x64xf32>
    %376 = vector.extract_strided_slice %373 {offsets = [0, 0], sizes = [8, 256], strides = [1, 1]} : vector<8x2048xf32> to vector<8x256xf32>
    %cst_94 = arith.constant dense<0.000000e+00> : vector<8x256xf32>
    %377 = tpu.matmul %374, %370, %cst_94 {dimension_numbers = #tpu.dot_dimension_numbers<[1], [0], [0], [1], [0, 0, 1, 1], [], []>} : vector<8x64xf32>, vector<64x256xf32>, vector<8x256xf32> -> vector<8x256xf32>
    %378 = arith.addf %376, %377 : vector<8x256xf32>
    %379 = arith.mulf %378, %17 : vector<8x256xf32>
    %380 = math.tanh %379 : vector<8x256xf32>
    %cst_95 = arith.constant 1.000000e+00 : f32
    %381 = vector.broadcast %cst_95 : f32 to vector<8x256xf32>
    %382 = arith.addf %380, %381 : vector<8x256xf32>
    %cst_96 = arith.constant 5.000000e-01 : f32
    %383 = vector.broadcast %cst_96 : f32 to vector<8x256xf32>
    %384 = arith.mulf %383, %382 : vector<8x256xf32>
    %385 = arith.select %14, %380, %384 : vector<8x256xi1>, vector<8x256xf32>
    %386 = vector.extract_strided_slice %385 {offsets = [0, 64], sizes = [8, 64], strides = [1, 1]} : vector<8x256xf32> to vector<8x64xf32>
    %387 = arith.mulf %386, %375 : vector<8x64xf32>
    %388 = vector.extract_strided_slice %385 {offsets = [0, 0], sizes = [8, 64], strides = [1, 1]} : vector<8x256xf32> to vector<8x64xf32>
    %389 = vector.extract_strided_slice %385 {offsets = [0, 128], sizes = [8, 64], strides = [1, 1]} : vector<8x256xf32> to vector<8x64xf32>
    %390 = arith.mulf %388, %389 : vector<8x64xf32>
    %391 = arith.addf %387, %390 : vector<8x64xf32>
    %392 = vector.extract_strided_slice %385 {offsets = [0, 192], sizes = [8, 64], strides = [1, 1]} : vector<8x256xf32> to vector<8x64xf32>
    %393 = math.tanh %391 : vector<8x64xf32>
    %394 = arith.mulf %392, %393 : vector<8x64xf32>
    %395 = vector.extract_strided_slice %394 {offsets = [0, 0], sizes = [8, 32], strides = [1, 1]} : vector<8x64xf32> to vector<8x32xf32>
    %c0_97 = arith.constant 0 : index
    %c0_98 = arith.constant 0 : index
    %396 = vector.load %arg20[%c0_97, %c0_98] : memref<64x32xf32, #tpu.memory_space<vmem>>, vector<8x32xf32>
    tpu.vector_store %arg20[%c0_97, %c0_98], %395 {strides = array<i32>} : memref<64x32xf32, #tpu.memory_space<vmem>>, vector<8x32xf32>,
    %397 = vector.extract_strided_slice %394 {offsets = [0, 32], sizes = [8, 32], strides = [1, 1]} : vector<8x64xf32> to vector<8x32xf32>
    %c56_99 = arith.constant 56 : index
    %c0_100 = arith.constant 0 : index
    %398 = vector.load %arg22[%c56_99, %c0_100] : memref<64x32xf32, #tpu.memory_space<vmem>>, vector<8x32xf32>
    tpu.vector_store %arg22[%c56_99, %c0_100], %397 {strides = array<i32>} : memref<64x32xf32, #tpu.memory_space<vmem>>, vector<8x32xf32>,
    %399 = vector.extract_strided_slice %373 {offsets = [0, 256], sizes = [8, 256], strides = [1, 1]} : vector<8x2048xf32> to vector<8x256xf32>
    %cst_101 = arith.constant dense<0.000000e+00> : vector<8x256xf32>
    %400 = tpu.matmul %394, %370, %cst_101 {dimension_numbers = #tpu.dot_dimension_numbers<[1], [0], [0], [1], [0, 0, 1, 1], [], []>} : vector<8x64xf32>, vector<64x256xf32>, vector<8x256xf32> -> vector<8x256xf32>
    %401 = arith.addf %399, %400 : vector<8x256xf32>
    %402 = arith.mulf %401, %17 : vector<8x256xf32>
    %403 = math.tanh %402 : vector<8x256xf32>
    %cst_102 = arith.constant 1.000000e+00 : f32
    %404 = vector.broadcast %cst_102 : f32 to vector<8x256xf32>
    %405 = arith.addf %403, %404 : vector<8x256xf32>
    %cst_103 = arith.constant 5.000000e-01 : f32
    %406 = vector.broadcast %cst_103 : f32 to vector<8x256xf32>
    %407 = arith.mulf %406, %405 : vector<8x256xf32>
    %408 = arith.select %14, %403, %407 : vector<8x256xi1>, vector<8x256xf32>
    %409 = vector.extract_strided_slice %408 {offsets = [0, 64], sizes = [8, 64], strides = [1, 1]} : vector<8x256xf32> to vector<8x64xf32>
    %410 = arith.mulf %409, %391 : vector<8x64xf32>
    %411 = vector.extract_strided_slice %408 {offsets = [0, 0], sizes = [8, 64], strides = [1, 1]} : vector<8x256xf32> to vector<8x64xf32>
    %412 = vector.extract_strided_slice %408 {offsets = [0, 128], sizes = [8, 64], strides = [1, 1]} : vector<8x256xf32> to vector<8x64xf32>
    %413 = arith.mulf %411, %412 : vector<8x64xf32>
    %414 = arith.addf %410, %413 : vector<8x64xf32>
    %415 = vector.extract_strided_slice %408 {offsets = [0, 192], sizes = [8, 64], strides = [1, 1]} : vector<8x256xf32> to vector<8x64xf32>
    %416 = math.tanh %414 : vector<8x64xf32>
    %417 = arith.mulf %415, %416 : vector<8x64xf32>
    %418 = vector.extract_strided_slice %417 {offsets = [0, 0], sizes = [8, 32], strides = [1, 1]} : vector<8x64xf32> to vector<8x32xf32>
    %c8_104 = arith.constant 8 : index
    %c0_105 = arith.constant 0 : index
    %419 = vector.load %arg20[%c8_104, %c0_105] : memref<64x32xf32, #tpu.memory_space<vmem>>, vector<8x32xf32>
    tpu.vector_store %arg20[%c8_104, %c0_105], %418 {strides = array<i32>} : memref<64x32xf32, #tpu.memory_space<vmem>>, vector<8x32xf32>,
    %420 = vector.extract_strided_slice %417 {offsets = [0, 32], sizes = [8, 32], strides = [1, 1]} : vector<8x64xf32> to vector<8x32xf32>
    %c48_106 = arith.constant 48 : index
    %c0_107 = arith.constant 0 : index
    %421 = vector.load %arg22[%c48_106, %c0_107] : memref<64x32xf32, #tpu.memory_space<vmem>>, vector<8x32xf32>
    tpu.vector_store %arg22[%c48_106, %c0_107], %420 {strides = array<i32>} : memref<64x32xf32, #tpu.memory_space<vmem>>, vector<8x32xf32>,
    %422 = vector.extract_strided_slice %373 {offsets = [0, 512], sizes = [8, 256], strides = [1, 1]} : vector<8x2048xf32> to vector<8x256xf32>
    %cst_108 = arith.constant dense<0.000000e+00> : vector<8x256xf32>
    %423 = tpu.matmul %417, %370, %cst_108 {dimension_numbers = #tpu.dot_dimension_numbers<[1], [0], [0], [1], [0, 0, 1, 1], [], []>} : vector<8x64xf32>, vector<64x256xf32>, vector<8x256xf32> -> vector<8x256xf32>
    %424 = arith.addf %422, %423 : vector<8x256xf32>
    %425 = arith.mulf %424, %17 : vector<8x256xf32>
    %426 = math.tanh %425 : vector<8x256xf32>
    %cst_109 = arith.constant 1.000000e+00 : f32
    %427 = vector.broadcast %cst_109 : f32 to vector<8x256xf32>
    %428 = arith.addf %426, %427 : vector<8x256xf32>
    %cst_110 = arith.constant 5.000000e-01 : f32
    %429 = vector.broadcast %cst_110 : f32 to vector<8x256xf32>
    %430 = arith.mulf %429, %428 : vector<8x256xf32>
    %431 = arith.select %14, %426, %430 : vector<8x256xi1>, vector<8x256xf32>
    %432 = vector.extract_strided_slice %431 {offsets = [0, 64], sizes = [8, 64], strides = [1, 1]} : vector<8x256xf32> to vector<8x64xf32>
    %433 = arith.mulf %432, %414 : vector<8x64xf32>
    %434 = vector.extract_strided_slice %431 {offsets = [0, 0], sizes = [8, 64], strides = [1, 1]} : vector<8x256xf32> to vector<8x64xf32>
    %435 = vector.extract_strided_slice %431 {offsets = [0, 128], sizes = [8, 64], strides = [1, 1]} : vector<8x256xf32> to vector<8x64xf32>
    %436 = arith.mulf %434, %435 : vector<8x64xf32>
    %437 = arith.addf %433, %436 : vector<8x64xf32>
    %438 = vector.extract_strided_slice %431 {offsets = [0, 192], sizes = [8, 64], strides = [1, 1]} : vector<8x256xf32> to vector<8x64xf32>
    %439 = math.tanh %437 : vector<8x64xf32>
    %440 = arith.mulf %438, %439 : vector<8x64xf32>
    %441 = vector.extract_strided_slice %440 {offsets = [0, 0], sizes = [8, 32], strides = [1, 1]} : vector<8x64xf32> to vector<8x32xf32>
    %c16_111 = arith.constant 16 : index
    %c0_112 = arith.constant 0 : index
    %442 = vector.load %arg20[%c16_111, %c0_112] : memref<64x32xf32, #tpu.memory_space<vmem>>, vector<8x32xf32>
    tpu.vector_store %arg20[%c16_111, %c0_112], %441 {strides = array<i32>} : memref<64x32xf32, #tpu.memory_space<vmem>>, vector<8x32xf32>,
    %443 = vector.extract_strided_slice %440 {offsets = [0, 32], sizes = [8, 32], strides = [1, 1]} : vector<8x64xf32> to vector<8x32xf32>
    %c40_113 = arith.constant 40 : index
    %c0_114 = arith.constant 0 : index
    %444 = vector.load %arg22[%c40_113, %c0_114] : memref<64x32xf32, #tpu.memory_space<vmem>>, vector<8x32xf32>
    tpu.vector_store %arg22[%c40_113, %c0_114], %443 {strides = array<i32>} : memref<64x32xf32, #tpu.memory_space<vmem>>, vector<8x32xf32>,
    %445 = vector.extract_strided_slice %373 {offsets = [0, 768], sizes = [8, 256], strides = [1, 1]} : vector<8x2048xf32> to vector<8x256xf32>
    %cst_115 = arith.constant dense<0.000000e+00> : vector<8x256xf32>
    %446 = tpu.matmul %440, %370, %cst_115 {dimension_numbers = #tpu.dot_dimension_numbers<[1], [0], [0], [1], [0, 0, 1, 1], [], []>} : vector<8x64xf32>, vector<64x256xf32>, vector<8x256xf32> -> vector<8x256xf32>
    %447 = arith.addf %445, %446 : vector<8x256xf32>
    %448 = arith.mulf %447, %17 : vector<8x256xf32>
    %449 = math.tanh %448 : vector<8x256xf32>
    %cst_116 = arith.constant 1.000000e+00 : f32
    %450 = vector.broadcast %cst_116 : f32 to vector<8x256xf32>
    %451 = arith.addf %449, %450 : vector<8x256xf32>
    %cst_117 = arith.constant 5.000000e-01 : f32
    %452 = vector.broadcast %cst_117 : f32 to vector<8x256xf32>
    %453 = arith.mulf %452, %451 : vector<8x256xf32>
    %454 = arith.select %14, %449, %453 : vector<8x256xi1>, vector<8x256xf32>
    %455 = vector.extract_strided_slice %454 {offsets = [0, 64], sizes = [8, 64], strides = [1, 1]} : vector<8x256xf32> to vector<8x64xf32>
    %456 = arith.mulf %455, %437 : vector<8x64xf32>
    %457 = vector.extract_strided_slice %454 {offsets = [0, 0], sizes = [8, 64], strides = [1, 1]} : vector<8x256xf32> to vector<8x64xf32>
    %458 = vector.extract_strided_slice %454 {offsets = [0, 128], sizes = [8, 64], strides = [1, 1]} : vector<8x256xf32> to vector<8x64xf32>
    %459 = arith.mulf %457, %458 : vector<8x64xf32>
    %460 = arith.addf %456, %459 : vector<8x64xf32>
    %461 = vector.extract_strided_slice %454 {offsets = [0, 192], sizes = [8, 64], strides = [1, 1]} : vector<8x256xf32> to vector<8x64xf32>
    %462 = math.tanh %460 : vector<8x64xf32>
    %463 = arith.mulf %461, %462 : vector<8x64xf32>
    %464 = vector.extract_strided_slice %463 {offsets = [0, 0], sizes = [8, 32], strides = [1, 1]} : vector<8x64xf32> to vector<8x32xf32>
    %c24_118 = arith.constant 24 : index
    %c0_119 = arith.constant 0 : index
    %465 = vector.load %arg20[%c24_118, %c0_119] : memref<64x32xf32, #tpu.memory_space<vmem>>, vector<8x32xf32>
    tpu.vector_store %arg20[%c24_118, %c0_119], %464 {strides = array<i32>} : memref<64x32xf32, #tpu.memory_space<vmem>>, vector<8x32xf32>,
    %466 = vector.extract_strided_slice %463 {offsets = [0, 32], sizes = [8, 32], strides = [1, 1]} : vector<8x64xf32> to vector<8x32xf32>
    %c32_120 = arith.constant 32 : index
    %c0_121 = arith.constant 0 : index
    %467 = vector.load %arg22[%c32_120, %c0_121] : memref<64x32xf32, #tpu.memory_space<vmem>>, vector<8x32xf32>
    tpu.vector_store %arg22[%c32_120, %c0_121], %466 {strides = array<i32>} : memref<64x32xf32, #tpu.memory_space<vmem>>, vector<8x32xf32>,
    %468 = vector.extract_strided_slice %373 {offsets = [0, 1024], sizes = [8, 256], strides = [1, 1]} : vector<8x2048xf32> to vector<8x256xf32>
    %cst_122 = arith.constant dense<0.000000e+00> : vector<8x256xf32>
    %469 = tpu.matmul %463, %370, %cst_122 {dimension_numbers = #tpu.dot_dimension_numbers<[1], [0], [0], [1], [0, 0, 1, 1], [], []>} : vector<8x64xf32>, vector<64x256xf32>, vector<8x256xf32> -> vector<8x256xf32>
    %470 = arith.addf %468, %469 : vector<8x256xf32>
    %471 = arith.mulf %470, %17 : vector<8x256xf32>
    %472 = math.tanh %471 : vector<8x256xf32>
    %cst_123 = arith.constant 1.000000e+00 : f32
    %473 = vector.broadcast %cst_123 : f32 to vector<8x256xf32>
    %474 = arith.addf %472, %473 : vector<8x256xf32>
    %cst_124 = arith.constant 5.000000e-01 : f32
    %475 = vector.broadcast %cst_124 : f32 to vector<8x256xf32>
    %476 = arith.mulf %475, %474 : vector<8x256xf32>
    %477 = arith.select %14, %472, %476 : vector<8x256xi1>, vector<8x256xf32>
    %478 = vector.extract_strided_slice %477 {offsets = [0, 64], sizes = [8, 64], strides = [1, 1]} : vector<8x256xf32> to vector<8x64xf32>
    %479 = arith.mulf %478, %460 : vector<8x64xf32>
    %480 = vector.extract_strided_slice %477 {offsets = [0, 0], sizes = [8, 64], strides = [1, 1]} : vector<8x256xf32> to vector<8x64xf32>
    %481 = vector.extract_strided_slice %477 {offsets = [0, 128], sizes = [8, 64], strides = [1, 1]} : vector<8x256xf32> to vector<8x64xf32>
    %482 = arith.mulf %480, %481 : vector<8x64xf32>
    %483 = arith.addf %479, %482 : vector<8x64xf32>
    %484 = vector.extract_strided_slice %477 {offsets = [0, 192], sizes = [8, 64], strides = [1, 1]} : vector<8x256xf32> to vector<8x64xf32>
    %485 = math.tanh %483 : vector<8x64xf32>
    %486 = arith.mulf %484, %485 : vector<8x64xf32>
    %487 = vector.extract_strided_slice %486 {offsets = [0, 0], sizes = [8, 32], strides = [1, 1]} : vector<8x64xf32> to vector<8x32xf32>
    %c32_125 = arith.constant 32 : index
    %c0_126 = arith.constant 0 : index
    %488 = vector.load %arg20[%c32_125, %c0_126] : memref<64x32xf32, #tpu.memory_space<vmem>>, vector<8x32xf32>
    tpu.vector_store %arg20[%c32_125, %c0_126], %487 {strides = array<i32>} : memref<64x32xf32, #tpu.memory_space<vmem>>, vector<8x32xf32>,
    %489 = vector.extract_strided_slice %486 {offsets = [0, 32], sizes = [8, 32], strides = [1, 1]} : vector<8x64xf32> to vector<8x32xf32>
    %c24_127 = arith.constant 24 : index
    %c0_128 = arith.constant 0 : index
    %490 = vector.load %arg22[%c24_127, %c0_128] : memref<64x32xf32, #tpu.memory_space<vmem>>, vector<8x32xf32>
    tpu.vector_store %arg22[%c24_127, %c0_128], %489 {strides = array<i32>} : memref<64x32xf32, #tpu.memory_space<vmem>>, vector<8x32xf32>,
    %491 = vector.extract_strided_slice %373 {offsets = [0, 1280], sizes = [8, 256], strides = [1, 1]} : vector<8x2048xf32> to vector<8x256xf32>
    %cst_129 = arith.constant dense<0.000000e+00> : vector<8x256xf32>
    %492 = tpu.matmul %486, %370, %cst_129 {dimension_numbers = #tpu.dot_dimension_numbers<[1], [0], [0], [1], [0, 0, 1, 1], [], []>} : vector<8x64xf32>, vector<64x256xf32>, vector<8x256xf32> -> vector<8x256xf32>
    %493 = arith.addf %491, %492 : vector<8x256xf32>
    %494 = arith.mulf %493, %17 : vector<8x256xf32>
    %495 = math.tanh %494 : vector<8x256xf32>
    %cst_130 = arith.constant 1.000000e+00 : f32
    %496 = vector.broadcast %cst_130 : f32 to vector<8x256xf32>
    %497 = arith.addf %495, %496 : vector<8x256xf32>
    %cst_131 = arith.constant 5.000000e-01 : f32
    %498 = vector.broadcast %cst_131 : f32 to vector<8x256xf32>
    %499 = arith.mulf %498, %497 : vector<8x256xf32>
    %500 = arith.select %14, %495, %499 : vector<8x256xi1>, vector<8x256xf32>
    %501 = vector.extract_strided_slice %500 {offsets = [0, 64], sizes = [8, 64], strides = [1, 1]} : vector<8x256xf32> to vector<8x64xf32>
    %502 = arith.mulf %501, %483 : vector<8x64xf32>
    %503 = vector.extract_strided_slice %500 {offsets = [0, 0], sizes = [8, 64], strides = [1, 1]} : vector<8x256xf32> to vector<8x64xf32>
    %504 = vector.extract_strided_slice %500 {offsets = [0, 128], sizes = [8, 64], strides = [1, 1]} : vector<8x256xf32> to vector<8x64xf32>
    %505 = arith.mulf %503, %504 : vector<8x64xf32>
    %506 = arith.addf %502, %505 : vector<8x64xf32>
    %507 = vector.extract_strided_slice %500 {offsets = [0, 192], sizes = [8, 64], strides = [1, 1]} : vector<8x256xf32> to vector<8x64xf32>
    %508 = math.tanh %506 : vector<8x64xf32>
    %509 = arith.mulf %507, %508 : vector<8x64xf32>
    %510 = vector.extract_strided_slice %509 {offsets = [0, 0], sizes = [8, 32], strides = [1, 1]} : vector<8x64xf32> to vector<8x32xf32>
    %c40_132 = arith.constant 40 : index
    %c0_133 = arith.constant 0 : index
    %511 = vector.load %arg20[%c40_132, %c0_133] : memref<64x32xf32, #tpu.memory_space<vmem>>, vector<8x32xf32>
    tpu.vector_store %arg20[%c40_132, %c0_133], %510 {strides = array<i32>} : memref<64x32xf32, #tpu.memory_space<vmem>>, vector<8x32xf32>,
    %512 = vector.extract_strided_slice %509 {offsets = [0, 32], sizes = [8, 32], strides = [1, 1]} : vector<8x64xf32> to vector<8x32xf32>
    %c16_134 = arith.constant 16 : index
    %c0_135 = arith.constant 0 : index
    %513 = vector.load %arg22[%c16_134, %c0_135] : memref<64x32xf32, #tpu.memory_space<vmem>>, vector<8x32xf32>
    tpu.vector_store %arg22[%c16_134, %c0_135], %512 {strides = array<i32>} : memref<64x32xf32, #tpu.memory_space<vmem>>, vector<8x32xf32>,
    %514 = vector.extract_strided_slice %373 {offsets = [0, 1536], sizes = [8, 256], strides = [1, 1]} : vector<8x2048xf32> to vector<8x256xf32>
    %cst_136 = arith.constant dense<0.000000e+00> : vector<8x256xf32>
    %515 = tpu.matmul %509, %370, %cst_136 {dimension_numbers = #tpu.dot_dimension_numbers<[1], [0], [0], [1], [0, 0, 1, 1], [], []>} : vector<8x64xf32>, vector<64x256xf32>, vector<8x256xf32> -> vector<8x256xf32>
    %516 = arith.addf %514, %515 : vector<8x256xf32>
    %517 = arith.mulf %516, %17 : vector<8x256xf32>
    %518 = math.tanh %517 : vector<8x256xf32>
    %cst_137 = arith.constant 1.000000e+00 : f32
    %519 = vector.broadcast %cst_137 : f32 to vector<8x256xf32>
    %520 = arith.addf %518, %519 : vector<8x256xf32>
    %cst_138 = arith.constant 5.000000e-01 : f32
    %521 = vector.broadcast %cst_138 : f32 to vector<8x256xf32>
    %522 = arith.mulf %521, %520 : vector<8x256xf32>
    %523 = arith.select %14, %518, %522 : vector<8x256xi1>, vector<8x256xf32>
    %524 = vector.extract_strided_slice %523 {offsets = [0, 64], sizes = [8, 64], strides = [1, 1]} : vector<8x256xf32> to vector<8x64xf32>
    %525 = arith.mulf %524, %506 : vector<8x64xf32>
    %526 = vector.extract_strided_slice %523 {offsets = [0, 0], sizes = [8, 64], strides = [1, 1]} : vector<8x256xf32> to vector<8x64xf32>
    %527 = vector.extract_strided_slice %523 {offsets = [0, 128], sizes = [8, 64], strides = [1, 1]} : vector<8x256xf32> to vector<8x64xf32>
    %528 = arith.mulf %526, %527 : vector<8x64xf32>
    %529 = arith.addf %525, %528 : vector<8x64xf32>
    %530 = vector.extract_strided_slice %523 {offsets = [0, 192], sizes = [8, 64], strides = [1, 1]} : vector<8x256xf32> to vector<8x64xf32>
    %531 = math.tanh %529 : vector<8x64xf32>
    %532 = arith.mulf %530, %531 : vector<8x64xf32>
    %533 = vector.extract_strided_slice %532 {offsets = [0, 0], sizes = [8, 32], strides = [1, 1]} : vector<8x64xf32> to vector<8x32xf32>
    %c48_139 = arith.constant 48 : index
    %c0_140 = arith.constant 0 : index
    %534 = vector.load %arg20[%c48_139, %c0_140] : memref<64x32xf32, #tpu.memory_space<vmem>>, vector<8x32xf32>
    tpu.vector_store %arg20[%c48_139, %c0_140], %533 {strides = array<i32>} : memref<64x32xf32, #tpu.memory_space<vmem>>, vector<8x32xf32>,
    %535 = vector.extract_strided_slice %532 {offsets = [0, 32], sizes = [8, 32], strides = [1, 1]} : vector<8x64xf32> to vector<8x32xf32>
    %c8_141 = arith.constant 8 : index
    %c0_142 = arith.constant 0 : index
    %536 = vector.load %arg22[%c8_141, %c0_142] : memref<64x32xf32, #tpu.memory_space<vmem>>, vector<8x32xf32>
    tpu.vector_store %arg22[%c8_141, %c0_142], %535 {strides = array<i32>} : memref<64x32xf32, #tpu.memory_space<vmem>>, vector<8x32xf32>,
    %537 = vector.extract_strided_slice %373 {offsets = [0, 1792], sizes = [8, 256], strides = [1, 1]} : vector<8x2048xf32> to vector<8x256xf32>
    %cst_143 = arith.constant dense<0.000000e+00> : vector<8x256xf32>
    %538 = tpu.matmul %532, %370, %cst_143 {dimension_numbers = #tpu.dot_dimension_numbers<[1], [0], [0], [1], [0, 0, 1, 1], [], []>} : vector<8x64xf32>, vector<64x256xf32>, vector<8x256xf32> -> vector<8x256xf32>
    %539 = arith.addf %537, %538 : vector<8x256xf32>
    %540 = arith.mulf %539, %17 : vector<8x256xf32>
    %541 = math.tanh %540 : vector<8x256xf32>
    %cst_144 = arith.constant 1.000000e+00 : f32
    %542 = vector.broadcast %cst_144 : f32 to vector<8x256xf32>
    %543 = arith.addf %541, %542 : vector<8x256xf32>
    %cst_145 = arith.constant 5.000000e-01 : f32
    %544 = vector.broadcast %cst_145 : f32 to vector<8x256xf32>
    %545 = arith.mulf %544, %543 : vector<8x256xf32>
    %546 = arith.select %14, %541, %545 : vector<8x256xi1>, vector<8x256xf32>
    %547 = vector.extract_strided_slice %546 {offsets = [0, 64], sizes = [8, 64], strides = [1, 1]} : vector<8x256xf32> to vector<8x64xf32>
    %548 = arith.mulf %547, %529 : vector<8x64xf32>
    %549 = vector.extract_strided_slice %546 {offsets = [0, 0], sizes = [8, 64], strides = [1, 1]} : vector<8x256xf32> to vector<8x64xf32>
    %550 = vector.extract_strided_slice %546 {offsets = [0, 128], sizes = [8, 64], strides = [1, 1]} : vector<8x256xf32> to vector<8x64xf32>
    %551 = arith.mulf %549, %550 : vector<8x64xf32>
    %552 = arith.addf %548, %551 : vector<8x64xf32>
    %553 = vector.extract_strided_slice %546 {offsets = [0, 192], sizes = [8, 64], strides = [1, 1]} : vector<8x256xf32> to vector<8x64xf32>
    %554 = math.tanh %552 : vector<8x64xf32>
    %555 = arith.mulf %553, %554 : vector<8x64xf32>
    %556 = vector.extract_strided_slice %555 {offsets = [0, 0], sizes = [8, 32], strides = [1, 1]} : vector<8x64xf32> to vector<8x32xf32>
    %c56_146 = arith.constant 56 : index
    %c0_147 = arith.constant 0 : index
    %557 = vector.load %arg20[%c56_146, %c0_147] : memref<64x32xf32, #tpu.memory_space<vmem>>, vector<8x32xf32>
    tpu.vector_store %arg20[%c56_146, %c0_147], %556 {strides = array<i32>} : memref<64x32xf32, #tpu.memory_space<vmem>>, vector<8x32xf32>,
    %558 = vector.extract_strided_slice %555 {offsets = [0, 32], sizes = [8, 32], strides = [1, 1]} : vector<8x64xf32> to vector<8x32xf32>
    %c0_148 = arith.constant 0 : index
    %c0_149 = arith.constant 0 : index
    %559 = vector.load %arg22[%c0_148, %c0_149] : memref<64x32xf32, #tpu.memory_space<vmem>>, vector<8x32xf32>
    tpu.vector_store %arg22[%c0_148, %c0_149], %558 {strides = array<i32>} : memref<64x32xf32, #tpu.memory_space<vmem>>, vector<8x32xf32>,
    %c0_150 = arith.constant 0 : index
    %c0_151 = arith.constant 0 : index
    %560 = vector.load %arg11[%c0_150, %c0_151] : memref<64x256xf32, #tpu.memory_space<vmem>>, vector<64x256xf32>
    %c0_152 = arith.constant 0 : index
    %c0_153 = arith.constant 0 : index
    %561 = vector.load %arg12[%c0_152, %c0_153] : memref<1x256xf32, #tpu.memory_space<vmem>>, vector<1x256xf32>
    %c0_154 = arith.constant 0 : index
    %c0_155 = arith.constant 0 : index
    %562 = vector.load %arg13[%c0_154, %c0_155] : memref<64x256xf32, #tpu.memory_space<vmem>>, vector<64x256xf32>
    %c0_156 = arith.constant 0 : index
    %c0_157 = arith.constant 0 : index
    %563 = vector.load %arg20[%c0_156, %c0_157] : memref<64x32xf32, #tpu.memory_space<vmem>>, vector<64x32xf32>
    %c0_158 = arith.constant 0 : index
    %c0_159 = arith.constant 0 : index
    %564 = vector.load %arg22[%c0_158, %c0_159] : memref<64x32xf32, #tpu.memory_space<vmem>>, vector<64x32xf32>
    %565 = vector.extract_strided_slice %560 {offsets = [0, 0], sizes = [32, 256], strides = [1, 1]} : vector<64x256xf32> to vector<32x256xf32>
    %cst_160 = arith.constant dense<0.000000e+00> : vector<64x256xf32>
    %566 = tpu.matmul %563, %565, %cst_160 {dimension_numbers = #tpu.dot_dimension_numbers<[1], [0], [0], [1], [0, 0, 1, 1], [], []>} : vector<64x32xf32>, vector<32x256xf32>, vector<64x256xf32> -> vector<64x256xf32>
    %567 = vector.extract_strided_slice %560 {offsets = [32, 0], sizes = [32, 256], strides = [1, 1]} : vector<64x256xf32> to vector<32x256xf32>
    %cst_161 = arith.constant dense<0.000000e+00> : vector<64x256xf32>
    %568 = tpu.matmul %564, %567, %cst_161 {dimension_numbers = #tpu.dot_dimension_numbers<[1], [0], [0], [1], [0, 0, 1, 1], [], []>} : vector<64x32xf32>, vector<32x256xf32>, vector<64x256xf32> -> vector<64x256xf32>
    %569 = arith.addf %566, %568 : vector<64x256xf32>
    %570 = vector.broadcast %561 : vector<1x256xf32> to vector<64x256xf32>
    %571 = arith.addf %569, %570 : vector<64x256xf32>
    %cst_162 = arith.constant 0.000000e+00 : f32
    %572 = vector.broadcast %cst_162 : f32 to vector<8x64xf32>
    %cst_163 = arith.constant 0.000000e+00 : f32
    %573 = vector.broadcast %cst_163 : f32 to vector<8x64xf32>
    %574 = vector.extract_strided_slice %571 {offsets = [0, 0], sizes = [8, 256], strides = [1, 1]} : vector<64x256xf32> to vector<8x256xf32>
    %575 = vector.extract_strided_slice %571 {offsets = [56, 0], sizes = [8, 256], strides = [1, 1]} : vector<64x256xf32> to vector<8x256xf32>
    %576 = arith.select %37, %575, %574 : vector<8x256xi1>, vector<8x256xf32>
    %cst_164 = arith.constant dense<0.000000e+00> : vector<8x256xf32>
    %577 = tpu.matmul %572, %562, %cst_164 {dimension_numbers = #tpu.dot_dimension_numbers<[1], [0], [0], [1], [0, 0, 1, 1], [], []>} : vector<8x64xf32>, vector<64x256xf32>, vector<8x256xf32> -> vector<8x256xf32>
    %578 = arith.addf %576, %577 : vector<8x256xf32>
    %579 = arith.mulf %578, %17 : vector<8x256xf32>
    %580 = math.tanh %579 : vector<8x256xf32>
    %cst_165 = arith.constant 1.000000e+00 : f32
    %581 = vector.broadcast %cst_165 : f32 to vector<8x256xf32>
    %582 = arith.addf %580, %581 : vector<8x256xf32>
    %cst_166 = arith.constant 5.000000e-01 : f32
    %583 = vector.broadcast %cst_166 : f32 to vector<8x256xf32>
    %584 = arith.mulf %583, %582 : vector<8x256xf32>
    %585 = arith.select %14, %580, %584 : vector<8x256xi1>, vector<8x256xf32>
    %586 = vector.extract_strided_slice %585 {offsets = [0, 64], sizes = [8, 64], strides = [1, 1]} : vector<8x256xf32> to vector<8x64xf32>
    %587 = arith.mulf %586, %573 : vector<8x64xf32>
    %588 = vector.extract_strided_slice %585 {offsets = [0, 0], sizes = [8, 64], strides = [1, 1]} : vector<8x256xf32> to vector<8x64xf32>
    %589 = vector.extract_strided_slice %585 {offsets = [0, 128], sizes = [8, 64], strides = [1, 1]} : vector<8x256xf32> to vector<8x64xf32>
    %590 = arith.mulf %588, %589 : vector<8x64xf32>
    %591 = arith.addf %587, %590 : vector<8x64xf32>
    %592 = vector.extract_strided_slice %585 {offsets = [0, 192], sizes = [8, 64], strides = [1, 1]} : vector<8x256xf32> to vector<8x64xf32>
    %593 = math.tanh %591 : vector<8x64xf32>
    %594 = arith.mulf %592, %593 : vector<8x64xf32>
    %595 = vector.extract_strided_slice %594 {offsets = [0, 0], sizes = [8, 32], strides = [1, 1]} : vector<8x64xf32> to vector<8x32xf32>
    %c0_167 = arith.constant 0 : index
    %c0_168 = arith.constant 0 : index
    %596 = vector.load %arg21[%c0_167, %c0_168] : memref<64x32xf32, #tpu.memory_space<vmem>>, vector<8x32xf32>
    tpu.vector_store %arg21[%c0_167, %c0_168], %595 {strides = array<i32>} : memref<64x32xf32, #tpu.memory_space<vmem>>, vector<8x32xf32>,
    %597 = vector.extract_strided_slice %594 {offsets = [0, 32], sizes = [8, 32], strides = [1, 1]} : vector<8x64xf32> to vector<8x32xf32>
    %c56_169 = arith.constant 56 : index
    %c0_170 = arith.constant 0 : index
    %598 = vector.load %arg23[%c56_169, %c0_170] : memref<64x32xf32, #tpu.memory_space<vmem>>, vector<8x32xf32>
    tpu.vector_store %arg23[%c56_169, %c0_170], %597 {strides = array<i32>} : memref<64x32xf32, #tpu.memory_space<vmem>>, vector<8x32xf32>,
    %599 = vector.extract_strided_slice %571 {offsets = [8, 0], sizes = [8, 256], strides = [1, 1]} : vector<64x256xf32> to vector<8x256xf32>
    %600 = vector.extract_strided_slice %571 {offsets = [48, 0], sizes = [8, 256], strides = [1, 1]} : vector<64x256xf32> to vector<8x256xf32>
    %601 = arith.select %37, %600, %599 : vector<8x256xi1>, vector<8x256xf32>
    %cst_171 = arith.constant dense<0.000000e+00> : vector<8x256xf32>
    %602 = tpu.matmul %594, %562, %cst_171 {dimension_numbers = #tpu.dot_dimension_numbers<[1], [0], [0], [1], [0, 0, 1, 1], [], []>} : vector<8x64xf32>, vector<64x256xf32>, vector<8x256xf32> -> vector<8x256xf32>
    %603 = arith.addf %601, %602 : vector<8x256xf32>
    %604 = arith.mulf %603, %17 : vector<8x256xf32>
    %605 = math.tanh %604 : vector<8x256xf32>
    %cst_172 = arith.constant 1.000000e+00 : f32
    %606 = vector.broadcast %cst_172 : f32 to vector<8x256xf32>
    %607 = arith.addf %605, %606 : vector<8x256xf32>
    %cst_173 = arith.constant 5.000000e-01 : f32
    %608 = vector.broadcast %cst_173 : f32 to vector<8x256xf32>
    %609 = arith.mulf %608, %607 : vector<8x256xf32>
    %610 = arith.select %14, %605, %609 : vector<8x256xi1>, vector<8x256xf32>
    %611 = vector.extract_strided_slice %610 {offsets = [0, 64], sizes = [8, 64], strides = [1, 1]} : vector<8x256xf32> to vector<8x64xf32>
    %612 = arith.mulf %611, %591 : vector<8x64xf32>
    %613 = vector.extract_strided_slice %610 {offsets = [0, 0], sizes = [8, 64], strides = [1, 1]} : vector<8x256xf32> to vector<8x64xf32>
    %614 = vector.extract_strided_slice %610 {offsets = [0, 128], sizes = [8, 64], strides = [1, 1]} : vector<8x256xf32> to vector<8x64xf32>
    %615 = arith.mulf %613, %614 : vector<8x64xf32>
    %616 = arith.addf %612, %615 : vector<8x64xf32>
    %617 = vector.extract_strided_slice %610 {offsets = [0, 192], sizes = [8, 64], strides = [1, 1]} : vector<8x256xf32> to vector<8x64xf32>
    %618 = math.tanh %616 : vector<8x64xf32>
    %619 = arith.mulf %617, %618 : vector<8x64xf32>
    %620 = vector.extract_strided_slice %619 {offsets = [0, 0], sizes = [8, 32], strides = [1, 1]} : vector<8x64xf32> to vector<8x32xf32>
    %c8_174 = arith.constant 8 : index
    %c0_175 = arith.constant 0 : index
    %621 = vector.load %arg21[%c8_174, %c0_175] : memref<64x32xf32, #tpu.memory_space<vmem>>, vector<8x32xf32>
    tpu.vector_store %arg21[%c8_174, %c0_175], %620 {strides = array<i32>} : memref<64x32xf32, #tpu.memory_space<vmem>>, vector<8x32xf32>,
    %622 = vector.extract_strided_slice %619 {offsets = [0, 32], sizes = [8, 32], strides = [1, 1]} : vector<8x64xf32> to vector<8x32xf32>
    %c48_176 = arith.constant 48 : index
    %c0_177 = arith.constant 0 : index
    %623 = vector.load %arg23[%c48_176, %c0_177] : memref<64x32xf32, #tpu.memory_space<vmem>>, vector<8x32xf32>
    tpu.vector_store %arg23[%c48_176, %c0_177], %622 {strides = array<i32>} : memref<64x32xf32, #tpu.memory_space<vmem>>, vector<8x32xf32>,
    %624 = vector.extract_strided_slice %571 {offsets = [16, 0], sizes = [8, 256], strides = [1, 1]} : vector<64x256xf32> to vector<8x256xf32>
    %625 = vector.extract_strided_slice %571 {offsets = [40, 0], sizes = [8, 256], strides = [1, 1]} : vector<64x256xf32> to vector<8x256xf32>
    %626 = arith.select %37, %625, %624 : vector<8x256xi1>, vector<8x256xf32>
    %cst_178 = arith.constant dense<0.000000e+00> : vector<8x256xf32>
    %627 = tpu.matmul %619, %562, %cst_178 {dimension_numbers = #tpu.dot_dimension_numbers<[1], [0], [0], [1], [0, 0, 1, 1], [], []>} : vector<8x64xf32>, vector<64x256xf32>, vector<8x256xf32> -> vector<8x256xf32>
    %628 = arith.addf %626, %627 : vector<8x256xf32>
    %629 = arith.mulf %628, %17 : vector<8x256xf32>
    %630 = math.tanh %629 : vector<8x256xf32>
    %cst_179 = arith.constant 1.000000e+00 : f32
    %631 = vector.broadcast %cst_179 : f32 to vector<8x256xf32>
    %632 = arith.addf %630, %631 : vector<8x256xf32>
    %cst_180 = arith.constant 5.000000e-01 : f32
    %633 = vector.broadcast %cst_180 : f32 to vector<8x256xf32>
    %634 = arith.mulf %633, %632 : vector<8x256xf32>
    %635 = arith.select %14, %630, %634 : vector<8x256xi1>, vector<8x256xf32>
    %636 = vector.extract_strided_slice %635 {offsets = [0, 64], sizes = [8, 64], strides = [1, 1]} : vector<8x256xf32> to vector<8x64xf32>
    %637 = arith.mulf %636, %616 : vector<8x64xf32>
    %638 = vector.extract_strided_slice %635 {offsets = [0, 0], sizes = [8, 64], strides = [1, 1]} : vector<8x256xf32> to vector<8x64xf32>
    %639 = vector.extract_strided_slice %635 {offsets = [0, 128], sizes = [8, 64], strides = [1, 1]} : vector<8x256xf32> to vector<8x64xf32>
    %640 = arith.mulf %638, %639 : vector<8x64xf32>
    %641 = arith.addf %637, %640 : vector<8x64xf32>
    %642 = vector.extract_strided_slice %635 {offsets = [0, 192], sizes = [8, 64], strides = [1, 1]} : vector<8x256xf32> to vector<8x64xf32>
    %643 = math.tanh %641 : vector<8x64xf32>
    %644 = arith.mulf %642, %643 : vector<8x64xf32>
    %645 = vector.extract_strided_slice %644 {offsets = [0, 0], sizes = [8, 32], strides = [1, 1]} : vector<8x64xf32> to vector<8x32xf32>
    %c16_181 = arith.constant 16 : index
    %c0_182 = arith.constant 0 : index
    %646 = vector.load %arg21[%c16_181, %c0_182] : memref<64x32xf32, #tpu.memory_space<vmem>>, vector<8x32xf32>
    tpu.vector_store %arg21[%c16_181, %c0_182], %645 {strides = array<i32>} : memref<64x32xf32, #tpu.memory_space<vmem>>, vector<8x32xf32>,
    %647 = vector.extract_strided_slice %644 {offsets = [0, 32], sizes = [8, 32], strides = [1, 1]} : vector<8x64xf32> to vector<8x32xf32>
    %c40_183 = arith.constant 40 : index
    %c0_184 = arith.constant 0 : index
    %648 = vector.load %arg23[%c40_183, %c0_184] : memref<64x32xf32, #tpu.memory_space<vmem>>, vector<8x32xf32>
    tpu.vector_store %arg23[%c40_183, %c0_184], %647 {strides = array<i32>} : memref<64x32xf32, #tpu.memory_space<vmem>>, vector<8x32xf32>,
    %649 = vector.extract_strided_slice %571 {offsets = [24, 0], sizes = [8, 256], strides = [1, 1]} : vector<64x256xf32> to vector<8x256xf32>
    %650 = vector.extract_strided_slice %571 {offsets = [32, 0], sizes = [8, 256], strides = [1, 1]} : vector<64x256xf32> to vector<8x256xf32>
    %651 = arith.select %37, %650, %649 : vector<8x256xi1>, vector<8x256xf32>
    %cst_185 = arith.constant dense<0.000000e+00> : vector<8x256xf32>
    %652 = tpu.matmul %644, %562, %cst_185 {dimension_numbers = #tpu.dot_dimension_numbers<[1], [0], [0], [1], [0, 0, 1, 1], [], []>} : vector<8x64xf32>, vector<64x256xf32>, vector<8x256xf32> -> vector<8x256xf32>
    %653 = arith.addf %651, %652 : vector<8x256xf32>
    %654 = arith.mulf %653, %17 : vector<8x256xf32>
    %655 = math.tanh %654 : vector<8x256xf32>
    %cst_186 = arith.constant 1.000000e+00 : f32
    %656 = vector.broadcast %cst_186 : f32 to vector<8x256xf32>
    %657 = arith.addf %655, %656 : vector<8x256xf32>
    %cst_187 = arith.constant 5.000000e-01 : f32
    %658 = vector.broadcast %cst_187 : f32 to vector<8x256xf32>
    %659 = arith.mulf %658, %657 : vector<8x256xf32>
    %660 = arith.select %14, %655, %659 : vector<8x256xi1>, vector<8x256xf32>
    %661 = vector.extract_strided_slice %660 {offsets = [0, 64], sizes = [8, 64], strides = [1, 1]} : vector<8x256xf32> to vector<8x64xf32>
    %662 = arith.mulf %661, %641 : vector<8x64xf32>
    %663 = vector.extract_strided_slice %660 {offsets = [0, 0], sizes = [8, 64], strides = [1, 1]} : vector<8x256xf32> to vector<8x64xf32>
    %664 = vector.extract_strided_slice %660 {offsets = [0, 128], sizes = [8, 64], strides = [1, 1]} : vector<8x256xf32> to vector<8x64xf32>
    %665 = arith.mulf %663, %664 : vector<8x64xf32>
    %666 = arith.addf %662, %665 : vector<8x64xf32>
    %667 = vector.extract_strided_slice %660 {offsets = [0, 192], sizes = [8, 64], strides = [1, 1]} : vector<8x256xf32> to vector<8x64xf32>
    %668 = math.tanh %666 : vector<8x64xf32>
    %669 = arith.mulf %667, %668 : vector<8x64xf32>
    %670 = vector.extract_strided_slice %669 {offsets = [0, 0], sizes = [8, 32], strides = [1, 1]} : vector<8x64xf32> to vector<8x32xf32>
    %c24_188 = arith.constant 24 : index
    %c0_189 = arith.constant 0 : index
    %671 = vector.load %arg21[%c24_188, %c0_189] : memref<64x32xf32, #tpu.memory_space<vmem>>, vector<8x32xf32>
    tpu.vector_store %arg21[%c24_188, %c0_189], %670 {strides = array<i32>} : memref<64x32xf32, #tpu.memory_space<vmem>>, vector<8x32xf32>,
    %672 = vector.extract_strided_slice %669 {offsets = [0, 32], sizes = [8, 32], strides = [1, 1]} : vector<8x64xf32> to vector<8x32xf32>
    %c32_190 = arith.constant 32 : index
    %c0_191 = arith.constant 0 : index
    %673 = vector.load %arg23[%c32_190, %c0_191] : memref<64x32xf32, #tpu.memory_space<vmem>>, vector<8x32xf32>
    tpu.vector_store %arg23[%c32_190, %c0_191], %672 {strides = array<i32>} : memref<64x32xf32, #tpu.memory_space<vmem>>, vector<8x32xf32>,
    %674 = vector.extract_strided_slice %571 {offsets = [32, 0], sizes = [8, 256], strides = [1, 1]} : vector<64x256xf32> to vector<8x256xf32>
    %675 = vector.extract_strided_slice %571 {offsets = [24, 0], sizes = [8, 256], strides = [1, 1]} : vector<64x256xf32> to vector<8x256xf32>
    %676 = arith.select %37, %675, %674 : vector<8x256xi1>, vector<8x256xf32>
    %cst_192 = arith.constant dense<0.000000e+00> : vector<8x256xf32>
    %677 = tpu.matmul %669, %562, %cst_192 {dimension_numbers = #tpu.dot_dimension_numbers<[1], [0], [0], [1], [0, 0, 1, 1], [], []>} : vector<8x64xf32>, vector<64x256xf32>, vector<8x256xf32> -> vector<8x256xf32>
    %678 = arith.addf %676, %677 : vector<8x256xf32>
    %679 = arith.mulf %678, %17 : vector<8x256xf32>
    %680 = math.tanh %679 : vector<8x256xf32>
    %cst_193 = arith.constant 1.000000e+00 : f32
    %681 = vector.broadcast %cst_193 : f32 to vector<8x256xf32>
    %682 = arith.addf %680, %681 : vector<8x256xf32>
    %cst_194 = arith.constant 5.000000e-01 : f32
    %683 = vector.broadcast %cst_194 : f32 to vector<8x256xf32>
    %684 = arith.mulf %683, %682 : vector<8x256xf32>
    %685 = arith.select %14, %680, %684 : vector<8x256xi1>, vector<8x256xf32>
    %686 = vector.extract_strided_slice %685 {offsets = [0, 64], sizes = [8, 64], strides = [1, 1]} : vector<8x256xf32> to vector<8x64xf32>
    %687 = arith.mulf %686, %666 : vector<8x64xf32>
    %688 = vector.extract_strided_slice %685 {offsets = [0, 0], sizes = [8, 64], strides = [1, 1]} : vector<8x256xf32> to vector<8x64xf32>
    %689 = vector.extract_strided_slice %685 {offsets = [0, 128], sizes = [8, 64], strides = [1, 1]} : vector<8x256xf32> to vector<8x64xf32>
    %690 = arith.mulf %688, %689 : vector<8x64xf32>
    %691 = arith.addf %687, %690 : vector<8x64xf32>
    %692 = vector.extract_strided_slice %685 {offsets = [0, 192], sizes = [8, 64], strides = [1, 1]} : vector<8x256xf32> to vector<8x64xf32>
    %693 = math.tanh %691 : vector<8x64xf32>
    %694 = arith.mulf %692, %693 : vector<8x64xf32>
    %695 = vector.extract_strided_slice %694 {offsets = [0, 0], sizes = [8, 32], strides = [1, 1]} : vector<8x64xf32> to vector<8x32xf32>
    %c32_195 = arith.constant 32 : index
    %c0_196 = arith.constant 0 : index
    %696 = vector.load %arg21[%c32_195, %c0_196] : memref<64x32xf32, #tpu.memory_space<vmem>>, vector<8x32xf32>
    tpu.vector_store %arg21[%c32_195, %c0_196], %695 {strides = array<i32>} : memref<64x32xf32, #tpu.memory_space<vmem>>, vector<8x32xf32>,
    %697 = vector.extract_strided_slice %694 {offsets = [0, 32], sizes = [8, 32], strides = [1, 1]} : vector<8x64xf32> to vector<8x32xf32>
    %c24_197 = arith.constant 24 : index
    %c0_198 = arith.constant 0 : index
    %698 = vector.load %arg23[%c24_197, %c0_198] : memref<64x32xf32, #tpu.memory_space<vmem>>, vector<8x32xf32>
    tpu.vector_store %arg23[%c24_197, %c0_198], %697 {strides = array<i32>} : memref<64x32xf32, #tpu.memory_space<vmem>>, vector<8x32xf32>,
    %699 = vector.extract_strided_slice %571 {offsets = [40, 0], sizes = [8, 256], strides = [1, 1]} : vector<64x256xf32> to vector<8x256xf32>
    %700 = vector.extract_strided_slice %571 {offsets = [16, 0], sizes = [8, 256], strides = [1, 1]} : vector<64x256xf32> to vector<8x256xf32>
    %701 = arith.select %37, %700, %699 : vector<8x256xi1>, vector<8x256xf32>
    %cst_199 = arith.constant dense<0.000000e+00> : vector<8x256xf32>
    %702 = tpu.matmul %694, %562, %cst_199 {dimension_numbers = #tpu.dot_dimension_numbers<[1], [0], [0], [1], [0, 0, 1, 1], [], []>} : vector<8x64xf32>, vector<64x256xf32>, vector<8x256xf32> -> vector<8x256xf32>
    %703 = arith.addf %701, %702 : vector<8x256xf32>
    %704 = arith.mulf %703, %17 : vector<8x256xf32>
    %705 = math.tanh %704 : vector<8x256xf32>
    %cst_200 = arith.constant 1.000000e+00 : f32
    %706 = vector.broadcast %cst_200 : f32 to vector<8x256xf32>
    %707 = arith.addf %705, %706 : vector<8x256xf32>
    %cst_201 = arith.constant 5.000000e-01 : f32
    %708 = vector.broadcast %cst_201 : f32 to vector<8x256xf32>
    %709 = arith.mulf %708, %707 : vector<8x256xf32>
    %710 = arith.select %14, %705, %709 : vector<8x256xi1>, vector<8x256xf32>
    %711 = vector.extract_strided_slice %710 {offsets = [0, 64], sizes = [8, 64], strides = [1, 1]} : vector<8x256xf32> to vector<8x64xf32>
    %712 = arith.mulf %711, %691 : vector<8x64xf32>
    %713 = vector.extract_strided_slice %710 {offsets = [0, 0], sizes = [8, 64], strides = [1, 1]} : vector<8x256xf32> to vector<8x64xf32>
    %714 = vector.extract_strided_slice %710 {offsets = [0, 128], sizes = [8, 64], strides = [1, 1]} : vector<8x256xf32> to vector<8x64xf32>
    %715 = arith.mulf %713, %714 : vector<8x64xf32>
    %716 = arith.addf %712, %715 : vector<8x64xf32>
    %717 = vector.extract_strided_slice %710 {offsets = [0, 192], sizes = [8, 64], strides = [1, 1]} : vector<8x256xf32> to vector<8x64xf32>
    %718 = math.tanh %716 : vector<8x64xf32>
    %719 = arith.mulf %717, %718 : vector<8x64xf32>
    %720 = vector.extract_strided_slice %719 {offsets = [0, 0], sizes = [8, 32], strides = [1, 1]} : vector<8x64xf32> to vector<8x32xf32>
    %c40_202 = arith.constant 40 : index
    %c0_203 = arith.constant 0 : index
    %721 = vector.load %arg21[%c40_202, %c0_203] : memref<64x32xf32, #tpu.memory_space<vmem>>, vector<8x32xf32>
    tpu.vector_store %arg21[%c40_202, %c0_203], %720 {strides = array<i32>} : memref<64x32xf32, #tpu.memory_space<vmem>>, vector<8x32xf32>,
    %722 = vector.extract_strided_slice %719 {offsets = [0, 32], sizes = [8, 32], strides = [1, 1]} : vector<8x64xf32> to vector<8x32xf32>
    %c16_204 = arith.constant 16 : index
    %c0_205 = arith.constant 0 : index
    %723 = vector.load %arg23[%c16_204, %c0_205] : memref<64x32xf32, #tpu.memory_space<vmem>>, vector<8x32xf32>
    tpu.vector_store %arg23[%c16_204, %c0_205], %722 {strides = array<i32>} : memref<64x32xf32, #tpu.memory_space<vmem>>, vector<8x32xf32>,
    %724 = vector.extract_strided_slice %571 {offsets = [48, 0], sizes = [8, 256], strides = [1, 1]} : vector<64x256xf32> to vector<8x256xf32>
    %725 = vector.extract_strided_slice %571 {offsets = [8, 0], sizes = [8, 256], strides = [1, 1]} : vector<64x256xf32> to vector<8x256xf32>
    %726 = arith.select %37, %725, %724 : vector<8x256xi1>, vector<8x256xf32>
    %cst_206 = arith.constant dense<0.000000e+00> : vector<8x256xf32>
    %727 = tpu.matmul %719, %562, %cst_206 {dimension_numbers = #tpu.dot_dimension_numbers<[1], [0], [0], [1], [0, 0, 1, 1], [], []>} : vector<8x64xf32>, vector<64x256xf32>, vector<8x256xf32> -> vector<8x256xf32>
    %728 = arith.addf %726, %727 : vector<8x256xf32>
    %729 = arith.mulf %728, %17 : vector<8x256xf32>
    %730 = math.tanh %729 : vector<8x256xf32>
    %cst_207 = arith.constant 1.000000e+00 : f32
    %731 = vector.broadcast %cst_207 : f32 to vector<8x256xf32>
    %732 = arith.addf %730, %731 : vector<8x256xf32>
    %cst_208 = arith.constant 5.000000e-01 : f32
    %733 = vector.broadcast %cst_208 : f32 to vector<8x256xf32>
    %734 = arith.mulf %733, %732 : vector<8x256xf32>
    %735 = arith.select %14, %730, %734 : vector<8x256xi1>, vector<8x256xf32>
    %736 = vector.extract_strided_slice %735 {offsets = [0, 64], sizes = [8, 64], strides = [1, 1]} : vector<8x256xf32> to vector<8x64xf32>
    %737 = arith.mulf %736, %716 : vector<8x64xf32>
    %738 = vector.extract_strided_slice %735 {offsets = [0, 0], sizes = [8, 64], strides = [1, 1]} : vector<8x256xf32> to vector<8x64xf32>
    %739 = vector.extract_strided_slice %735 {offsets = [0, 128], sizes = [8, 64], strides = [1, 1]} : vector<8x256xf32> to vector<8x64xf32>
    %740 = arith.mulf %738, %739 : vector<8x64xf32>
    %741 = arith.addf %737, %740 : vector<8x64xf32>
    %742 = vector.extract_strided_slice %735 {offsets = [0, 192], sizes = [8, 64], strides = [1, 1]} : vector<8x256xf32> to vector<8x64xf32>
    %743 = math.tanh %741 : vector<8x64xf32>
    %744 = arith.mulf %742, %743 : vector<8x64xf32>
    %745 = vector.extract_strided_slice %744 {offsets = [0, 0], sizes = [8, 32], strides = [1, 1]} : vector<8x64xf32> to vector<8x32xf32>
    %c48_209 = arith.constant 48 : index
    %c0_210 = arith.constant 0 : index
    %746 = vector.load %arg21[%c48_209, %c0_210] : memref<64x32xf32, #tpu.memory_space<vmem>>, vector<8x32xf32>
    tpu.vector_store %arg21[%c48_209, %c0_210], %745 {strides = array<i32>} : memref<64x32xf32, #tpu.memory_space<vmem>>, vector<8x32xf32>,
    %747 = vector.extract_strided_slice %744 {offsets = [0, 32], sizes = [8, 32], strides = [1, 1]} : vector<8x64xf32> to vector<8x32xf32>
    %c8_211 = arith.constant 8 : index
    %c0_212 = arith.constant 0 : index
    %748 = vector.load %arg23[%c8_211, %c0_212] : memref<64x32xf32, #tpu.memory_space<vmem>>, vector<8x32xf32>
    tpu.vector_store %arg23[%c8_211, %c0_212], %747 {strides = array<i32>} : memref<64x32xf32, #tpu.memory_space<vmem>>, vector<8x32xf32>,
    %749 = vector.extract_strided_slice %571 {offsets = [56, 0], sizes = [8, 256], strides = [1, 1]} : vector<64x256xf32> to vector<8x256xf32>
    %750 = vector.extract_strided_slice %571 {offsets = [0, 0], sizes = [8, 256], strides = [1, 1]} : vector<64x256xf32> to vector<8x256xf32>
    %751 = arith.select %37, %750, %749 : vector<8x256xi1>, vector<8x256xf32>
    %cst_213 = arith.constant dense<0.000000e+00> : vector<8x256xf32>
    %752 = tpu.matmul %744, %562, %cst_213 {dimension_numbers = #tpu.dot_dimension_numbers<[1], [0], [0], [1], [0, 0, 1, 1], [], []>} : vector<8x64xf32>, vector<64x256xf32>, vector<8x256xf32> -> vector<8x256xf32>
    %753 = arith.addf %751, %752 : vector<8x256xf32>
    %754 = arith.mulf %753, %17 : vector<8x256xf32>
    %755 = math.tanh %754 : vector<8x256xf32>
    %cst_214 = arith.constant 1.000000e+00 : f32
    %756 = vector.broadcast %cst_214 : f32 to vector<8x256xf32>
    %757 = arith.addf %755, %756 : vector<8x256xf32>
    %cst_215 = arith.constant 5.000000e-01 : f32
    %758 = vector.broadcast %cst_215 : f32 to vector<8x256xf32>
    %759 = arith.mulf %758, %757 : vector<8x256xf32>
    %760 = arith.select %14, %755, %759 : vector<8x256xi1>, vector<8x256xf32>
    %761 = vector.extract_strided_slice %760 {offsets = [0, 64], sizes = [8, 64], strides = [1, 1]} : vector<8x256xf32> to vector<8x64xf32>
    %762 = arith.mulf %761, %741 : vector<8x64xf32>
    %763 = vector.extract_strided_slice %760 {offsets = [0, 0], sizes = [8, 64], strides = [1, 1]} : vector<8x256xf32> to vector<8x64xf32>
    %764 = vector.extract_strided_slice %760 {offsets = [0, 128], sizes = [8, 64], strides = [1, 1]} : vector<8x256xf32> to vector<8x64xf32>
    %765 = arith.mulf %763, %764 : vector<8x64xf32>
    %766 = arith.addf %762, %765 : vector<8x64xf32>
    %767 = vector.extract_strided_slice %760 {offsets = [0, 192], sizes = [8, 64], strides = [1, 1]} : vector<8x256xf32> to vector<8x64xf32>
    %768 = math.tanh %766 : vector<8x64xf32>
    %769 = arith.mulf %767, %768 : vector<8x64xf32>
    %770 = vector.extract_strided_slice %769 {offsets = [0, 0], sizes = [8, 32], strides = [1, 1]} : vector<8x64xf32> to vector<8x32xf32>
    %c56_216 = arith.constant 56 : index
    %c0_217 = arith.constant 0 : index
    %771 = vector.load %arg21[%c56_216, %c0_217] : memref<64x32xf32, #tpu.memory_space<vmem>>, vector<8x32xf32>
    tpu.vector_store %arg21[%c56_216, %c0_217], %770 {strides = array<i32>} : memref<64x32xf32, #tpu.memory_space<vmem>>, vector<8x32xf32>,
    %772 = vector.extract_strided_slice %769 {offsets = [0, 32], sizes = [8, 32], strides = [1, 1]} : vector<8x64xf32> to vector<8x32xf32>
    %c0_218 = arith.constant 0 : index
    %c0_219 = arith.constant 0 : index
    %773 = vector.load %arg23[%c0_218, %c0_219] : memref<64x32xf32, #tpu.memory_space<vmem>>, vector<8x32xf32>
    tpu.vector_store %arg23[%c0_218, %c0_219], %772 {strides = array<i32>} : memref<64x32xf32, #tpu.memory_space<vmem>>, vector<8x32xf32>,
    %c0_220 = arith.constant 0 : index
    %c0_221 = arith.constant 0 : index
    %774 = vector.load %arg21[%c0_220, %c0_221] : memref<64x32xf32, #tpu.memory_space<vmem>>, vector<64x32xf32>
    %c0_222 = arith.constant 0 : index
    %c0_223 = arith.constant 0 : index
    %775 = vector.load %arg23[%c0_222, %c0_223] : memref<64x32xf32, #tpu.memory_space<vmem>>, vector<64x32xf32>
    %c0_224 = arith.constant 0 : index
    %c0_225 = arith.constant 0 : index
    %776 = vector.load %arg14[%c0_224, %c0_225] : memref<64x8xf32, #tpu.memory_space<vmem>>, vector<64x8xf32>
    %777 = vector.extract_strided_slice %776 {offsets = [0, 0], sizes = [32, 8], strides = [1, 1]} : vector<64x8xf32> to vector<32x8xf32>
    %cst_226 = arith.constant dense<0.000000e+00> : vector<64x8xf32>
    %778 = tpu.matmul %774, %777, %cst_226 {dimension_numbers = #tpu.dot_dimension_numbers<[1], [0], [0], [1], [0, 0, 1, 1], [], []>} : vector<64x32xf32>, vector<32x8xf32>, vector<64x8xf32> -> vector<64x8xf32>
    %779 = vector.extract_strided_slice %776 {offsets = [32, 0], sizes = [32, 8], strides = [1, 1]} : vector<64x8xf32> to vector<32x8xf32>
    %cst_227 = arith.constant dense<0.000000e+00> : vector<64x8xf32>
    %780 = tpu.matmul %775, %779, %cst_227 {dimension_numbers = #tpu.dot_dimension_numbers<[1], [0], [0], [1], [0, 0, 1, 1], [], []>} : vector<64x32xf32>, vector<32x8xf32>, vector<64x8xf32> -> vector<64x8xf32>
    %781 = arith.addf %778, %780 : vector<64x8xf32>
    %c0_228 = arith.constant 0 : index
    %c0_229 = arith.constant 0 : index
    %782 = vector.load %arg15[%c0_228, %c0_229] : memref<1x8xf32, #tpu.memory_space<vmem>>, vector<1x8xf32>
    %783 = vector.broadcast %782 : vector<1x8xf32> to vector<64x8xf32>
    %784 = arith.addf %781, %783 : vector<64x8xf32>
    %c0_230 = arith.constant 0 : index
    %c0_231 = arith.constant 0 : index
    %785 = vector.load %arg16[%c0_230, %c0_231] : memref<64x8xf32, #tpu.memory_space<vmem>>, vector<64x8xf32>
    tpu.vector_store %arg16[%c0_230, %c0_231], %784 {strides = array<i32>} : memref<64x8xf32, #tpu.memory_space<vmem>>, vector<64x8xf32>,
    %c0_232 = arith.constant 0 : index
    %c0_233 = arith.constant 0 : index
    %786 = vector.load %arg0[%c0_232, %c0_233] : memref<64x8xf32, #tpu.memory_space<vmem>>, vector<64x8xf32>
    %787 = arith.subf %784, %786 : vector<64x8xf32>
    %c0_234 = arith.constant 0 : index
    %c0_235 = arith.constant 0 : index
    %788 = vector.load %arg1[%c0_234, %c0_235] : memref<64x8xf32, #tpu.memory_space<vmem>>, vector<64x8xf32>
    %789 = arith.mulf %787, %788 : vector<64x8xf32>
    %790 = arith.mulf %789, %789 : vector<64x8xf32>
    %791 = vector.shape_cast %790 : vector<64x8xf32> to vector<1x64x8xf32>
    %cst_236 = arith.constant dense<0.000000e+00> : vector<1xf32>
    %792 = vector.multi_reduction <add>, %791, %cst_236 [1, 2] : vector<1x64x8xf32> to vector<1xf32>
    %793 = vector.shape_cast %792 : vector<1xf32> to vector<1x1x1xf32>
    %794 = vector.extract %793[0, 0, 0] : f32 from vector<1x1x1xf32>
    %795 = vector.broadcast %794 : f32 to vector<1x1xf32>
    %cst_237 = arith.constant 3.906250e-03 : f32
    %796 = vector.broadcast %cst_237 : f32 to vector<1x1xf32>
    %797 = arith.mulf %795, %796 : vector<1x1xf32>
    %c0_238 = arith.constant 0 : index
    %c0_239 = arith.constant 0 : index
    %798 = vector.load %arg17[%c0_238, %c0_239] : memref<1x1xf32, #tpu.memory_space<vmem>>, vector<1x1xf32>
    tpu.vector_store %arg17[%c0_238, %c0_239], %797 {strides = array<i32>} : memref<1x1xf32, #tpu.memory_space<vmem>>, vector<1x1xf32>,
    return
  }
}

</mosaic_0001>

<bundles_post_ra>
// kernel: lstm_ae_forward.1
= control target key start
LH: loop header
LB: loop body
LE: loop exit
PB: predicated region body
PF: predicated region fallthrough
CT: control target
= control target key end

     0   :  { %s5373_s0 = inlined_call_operand.vmem [shape: f32[64,8], index: 0, kind: input, shape index: {}]   ;;  %s5374_s1 = inlined_call_operand.vmem [shape: f32[64,8], index: 1, kind: input, shape index: {}]   ;;  %s5375_s2 = inlined_call_operand.vmem [shape: f32[8,128], index: 2, kind: input, shape index: {}]   ;;  %s5376_s3 = inlined_call_operand.vmem [shape: f32[32,128], index: 3, kind: input, shape index: {}]   ;;  %s5377_s4 = inlined_call_operand.vmem [shape: f32[1,128], index: 4, kind: input, shape index: {}]   ;;  %s5378_s5 = inlined_call_operand.vmem [shape: f32[32,128], index: 5, kind: input, shape index: {}]   ;;  %s5379_s6 = inlined_call_operand.vmem [shape: f32[32,128], index: 6, kind: input, shape index: {}]   ;;  %s5380_s7 = inlined_call_operand.vmem [shape: f32[1,128], index: 7, kind: input, shape index: {}]   ;;  %s5381_s8 = inlined_call_operand.vmem [shape: f32[32,2048], index: 8, kind: input, shape index: {}]   ;;  %s5382_s9 = inlined_call_operand.vmem [shape: f32[1,2048], index: 9, kind: input, shape index: {}]   ;;  %s5383_s10 = inlined_call_operand.vmem [shape: f32[64,256], index: 10, kind: input, shape index: {}]   ;;  %s5384_s11 = inlined_call_operand.vmem [shape: f32[64,256], index: 11, kind: input, shape index: {}]   ;;  %s5385_s12 = inlined_call_operand.vmem [shape: f32[1,256], index: 12, kind: input, shape index: {}]   ;;  %s5386_s13 = inlined_call_operand.vmem [shape: f32[64,256], index: 13, kind: input, shape index: {}]   ;;  %s5387_s14 = inlined_call_operand.vmem [shape: f32[64,8], index: 14, kind: input, shape index: {}]   ;;  %s5388_s15 = inlined_call_operand.vmem [shape: f32[1,8], index: 15, kind: input, shape index: {}]   ;;  %s5389_s16 = inlined_call_operand.vmem [shape: f32[64,8], index: 16, kind: output, shape index: {0}]   ;;  %s5390_s17 = inlined_call_operand.hbm [shape: f32[1,1], index: 17, kind: output, shape index: {1}]  }
   0x1   :  { %5393 = sst [smem:[#allocation11_spill]] %s5373_s0 }
   0x2   :  { %5394 = sst [smem:[#allocation12_spill]] %s5374_s1 }
   0x3   :  { %v3617_v0 = vld [vmem:[%s5376_s3 + $0x18] sm:$0xff]  ;;  %v3622_v1 = vld [vmem:[%s5376_s3 + $0x10] sm:$0xff]  ;;  %v95_v2 = vld [vmem:[%s5375_s2] sm:$0xff]  ;;  %vm112_vm0 = vcmask 64512   ;;  %s5395_s18 = sld [smem:[#allocation11_spill]] }
   0x4   :  { %194 = vmatpush.msra.mxu1 %v3617_v0  ;;  %152 = vmatpush.msra.mxu0 %v95_v2  ;;  %v3634_v4 = vld [vmem:[%s5376_s3 + $0x8] sm:$0xff] }
   0x5   :  { %244 = vmatpush.msra.mxu2 %v3617_v0  ;;  %3318 = vmatpush.msra.mxu3 %v95_v2 }
   0x6   :  { %195 = vmatpush.msra.mxu1 %v3622_v1 }
   0x9   :  { %v101_v3 = vld [vmem:[%s5395_s18] sm:$0xff] }
   0xa   :  { %3196 = vmatmul.msk.f32.vlgmr.msra.gmra.mxu0 %vm112_vm0, %v101_v3 }
   0xb   :  { %23 = vsyncpa [#allocation9], 0  ;;  %v3642_v5 = vld [vmem:[%s5376_s3] sm:$0xff]  ;;  %245 = vmatpush.msra.mxu2 %v3622_v1  ;;  %294 = vmatpush.msrb.mxu3 %v3617_v0  ;;  %v3519_v6 = vmov 0.0   ;;  %v56_v7 = vlaneseq  ;;  %v3520_v13 = vmov 0.5   ;;  %s3522_s22 = smov 32  }
   0xc   :  { %196 = vmatpush.msra.mxu1 %v3634_v4  ;;  %v3671_v9 = vld [vmem:[%s5377_s4] ss:$0 sm:$0xff]  ;;  %s3521_s4 = smov 64   ;;  %v102_v30 = vld [vmem:[%s5395_s18 + $0x8] sm:$0xff]  ;;  %vm178_vm4 = vcmask 261120   ;;  %v107_v48 = vld [vmem:[%s5395_s18 + $0x30] sm:$0xff] }
   0xd   :  { %246 = vmatpush.msra.mxu2 %v3634_v4  ;;  %295 = vmatpush.msrb.mxu3 %v3622_v1  ;;  %v3666_v8 = vand.u32 127, %v56_v7  ;;  %v106_v47 = vld [vmem:[%s5395_s18 + $0x28] sm:$0xff]  ;;  %v108_v49 = vld [vmem:[%s5395_s18 + $0x38] sm:$0xff]  ;;  %v103_v52 = vld [vmem:[%s5395_s18 + $0x10] sm:$0xff]  ;;  %vm1485_vm6 = vcmask 523264   ;;  %s5404_s28 = sld [smem:[#allocation12_spill]] }
   0xe   :  { %197 = vmatpush.msra.mxu1 %v3642_v5  ;;  %3201 = vmatmul.msk.f32.vlgmr.msra.gmra.mxu3 %vm112_vm0, %v106_v47  ;;  %v1081_v12 = vld [vmem:[%s5381_s8 + $0x128] sm:$0xff]  ;;  %s3185_s30 = sshll.u32 %s5390_s17, 4  ;;  %s3186_s30 = int_to_ptr.hbm [resolvable:$true] %s3185_s30 }
   0xf   :  { %198 = vmatmul.f32.vlgmr.msra.gmra.mxu1 %v3519_v6  ;;  %247 = vmatpush.msra.mxu2 %v3642_v5  ;;  %vm58_vm1 = vcmp.ge.s32.totalorder %v3666_v8, 64  ;;  %vm59_vm2 = vcmp.lt.s32.totalorder %v3666_v8, 96  ;;  %vm71_vm11 = vcmp.ge.s32.totalorder %v3666_v8, 32  ;;  %vm73_vm12 = vcmp.lt.s32.totalorder %v3666_v8, 64 }
  0x10   :  { %296 = vmatpush.msrb.mxu3 %v3634_v4  ;;  %344 = vmatpush.msrb.mxu1 %v3617_v0  ;;  %vm3676_vm3 = vmand %vm58_vm1, %vm59_vm2  ;;  %vm77_vm14 = vcmp.ge.s32.totalorder %v3666_v8, 96  ;;  %vm3174_vm1 = vcmask 0  }
  0x11   :  { %394 = vmatpush.msrb.mxu2 %v3617_v0  ;;  %v3683_v14 = vsel %vm3676_vm3, 1.0, %v3520_v13  ;;  %vm75_vm13 = vmand %vm71_vm11, %vm73_vm12 }
  0x12   :  { %297 = vmatpush.msrb.mxu3 %v3642_v5  ;;  %345 = vmatpush.msrb.mxu1 %v3622_v1  ;;  %vm4953_vm15 = vmor %vm75_vm13, %vm77_vm14 }
  0x13   :  { %395 = vmatpush.msrb.mxu2 %v3622_v1  ;;  %3197 = vmatmul.msk.f32.gmra.mxu0 %vm112_vm0, %v102_v30 }
  0x14   :  { %346 = vmatpush.msrb.mxu1 %v3634_v4  ;;  %444 = vmatpush.msra.mxu3 %v3617_v0 }
  0x15   :  { %396 = vmatpush.msrb.mxu2 %v3634_v4 }
  0x16   :  { %347 = vmatpush.msrb.mxu1 %v3642_v5  ;;  %445 = vmatpush.msra.mxu3 %v3622_v1 }
  0x17   :  { %397 = vmatpush.msrb.mxu2 %v3642_v5  ;;  %3202 = vmatmul.msk.f32.gmra.mxu3 %vm112_vm0, %v107_v48 }
  0x18   :  { %494 = vmatpush.msra.mxu1 %v3617_v0  ;;  %446 = vmatpush.msra.mxu3 %v3634_v4 }
  0x1a   :  { %495 = vmatpush.msra.mxu1 %v3622_v1  ;;  %447 = vmatpush.msra.mxu3 %v3642_v5 }
  0x1b   :  { %3198 = vmatmul.msk.f32.gmra.mxu0 %vm112_vm0, %v103_v52 }
  0x1c   :  { %496 = vmatpush.msra.mxu1 %v3634_v4 }
  0x1e   :  { %497 = vmatpush.msra.mxu1 %v3642_v5 }
  0x1f   :  { %3203 = vmatmul.msk.f32.gmra.mxu3 %vm112_vm0, %v108_v49 }
  0x87   :  { %v154_v10 = vpop.f32.mrf.mxu0 }
  0x88   :  { %v155_v11 = vadd.f32 %v3671_v9, %v154_v10 }
  0x8c   :  { %v199_v15 = vpop.f32.mrf.mxu1 }
  0x8d   :  { %v202_v16 = vadd.f32 %v199_v15, %v155_v11  ;;  %v104_v11 = vld [vmem:[%s5395_s18 + $0x18] sm:$0xff] }
  0x8e   :  { %3199 = vmatmul.msk.f32.gmra.mxu0 %vm112_vm0, %v104_v11 }
  0x8f   :  { %v203_v17 = vmul.f32 %v202_v16, %v3683_v14 }
  0x90   :  { %v157_v32 = vpop.f32.mrf.mxu0 }
  0x91   :  { %3333 = vtanh.f32 %v203_v17  ;;  %v158_v33 = vadd.f32 %v3671_v9, %v157_v32  ;;  %v3732_v54 = vpop.f32.mrf.mxu3 }
  0x97   :  { %v3334_v18 = vpop.eup %3333 }
  0x98   :  { %v205_v19 = vadd.f32 1.0, %v3334_v18  ;;  %v160_v57 = vpop.f32.mrf.mxu0 }
  0x99   :  { %v161_v58 = vadd.f32 %v3671_v9, %v160_v57  ;;  %v583_v57 = vld [vmem:[%s5378_s5 + $0x18] sm:$0xff] }
  0x9a   :  { %v206_v20 = vmul.f32 0.5, %v205_v19  ;;  %v3734_v55 = vpop.f32.mrf.mxu3 }
  0x9c   :  { %v207_v21 = vsel %vm3676_vm3, %v3334_v18, %v206_v20 }
  0x9d   :  { %210 = vrot.lane.b32.xlu0 %v207_v21, %s3521_s4  ;;  %v208_v24 = vmul.f32 0.0, %v207_v21 }
  0xa2   :  { %v3736_v56 = vpop.f32.mrf.mxu3 }
 0x10b   :  { %v163_v18 = vpop.f32.mrf.mxu0 }
 0x10c   :  { %v164_v19 = vadd.f32 %v3671_v9, %v163_v18 }
 0x10f   :  { %v211_v22 = vpop.permute.xlu0 %210 }
 0x110   :  { %v213_v23 = vmul.f32 %v211_v22, %v207_v21 }
 0x112   :  { %215 = vrot.lane.b32.xlu0 %v213_v23, %s3522_s22 }
 0x184   :  { %v216_v25 = vpop.permute.xlu0 %215 }
 0x185   :  { %v218_v26 = vadd.f32 %v216_v25, %v208_v24 }
 0x187   :  { %3335 = vtanh.f32 %v218_v26 }
 0x18d   :  { %v3336_v27 = vpop.eup %3335 }
 0x18e   :  { %221 = vrot.lane.b32.xlu1 %v3336_v27, %s3521_s4 }
 0x200   :  { %v222_v28 = vpop.permute.xlu1 %221 }
 0x201   :  { %v224_v29 = vmul.f32 %v222_v28, %v207_v21 }
 0x203   :  { %226 = vrot.lane.b32.xlu1 %v224_v29, %s3522_s22 }
 0x275   :  { %v227_v31 = vpop.permute.xlu1 %226 }
 0x276   :  { %229 = vst.msk [vmem:[#allocation2] sm:$0xff] %vm178_vm4, %v227_v31  ;;  %3204 = vmatmul.msk.f32.vlgmr.msra.gmra.mxu2 %vm178_vm4, %v227_v31 }
 0x277   :  { %544 = vmatpush.msra.mxu2 %v3617_v0 }
 0x279   :  { %545 = vmatpush.msra.mxu2 %v3622_v1 }
 0x27b   :  { %546 = vmatpush.msra.mxu2 %v3634_v4 }
 0x27d   :  { %547 = vmatpush.msra.mxu2 %v3642_v5 }
 0x2f9   :  { %v249_v34 = vpop.f32.mrf.mxu2 }
 0x2fa   :  { %v252_v35 = vadd.f32 %v249_v34, %v158_v33 }
 0x2fc   :  { %v253_v36 = vmul.f32 %v252_v35, %v3683_v14  ;;  %v105_v35 = vld [vmem:[%s5395_s18 + $0x20] sm:$0xff] }
 0x2fd   :  { %3200 = vmatmul.msk.f32.gmra.mxu0 %vm112_vm0, %v105_v35 }
 0x2fe   :  { %3337 = vtanh.f32 %v253_v36 }
 0x304   :  { %v3338_v37 = vpop.eup %3337 }
 0x305   :  { %v255_v38 = vadd.f32 1.0, %v3338_v37 }
 0x307   :  { %v256_v39 = vmul.f32 0.5, %v255_v38 }
 0x309   :  { %v257_v40 = vsel %vm3676_vm3, %v3338_v37, %v256_v39 }
 0x30a   :  { %260 = vrot.lane.b32.xlu2 %v257_v40, %s3521_s4  ;;  %v258_v43 = vmul.f32 %v257_v40, %v218_v26 }
 0x364   :  { %v261_v41 = vpop.permute.xlu2 %260 }
 0x365   :  { %v263_v42 = vmul.f32 %v261_v41, %v257_v40 }
 0x367   :  { %265 = vrot.lane.b32.xlu2 %v263_v42, %s3522_s22 }
 0x37a   :  { %v166_v37 = vpop.f32.mrf.mxu0 }
 0x37b   :  { %v167_v38 = vadd.f32 %v3671_v9, %v166_v37 }
 0x3c1   :  { %v266_v44 = vpop.permute.xlu2 %265 }
 0x3c2   :  { %v268_v45 = vadd.f32 %v266_v44, %v258_v43 }
 0x3c4   :  { %3339 = vtanh.f32 %v268_v45 }
 0x3ca   :  { %v3340_v46 = vpop.eup %3339 }
 0x3cb   :  { %271 = vrot.lane.b32.xlu0 %v3340_v46, %s3521_s4 }
 0x43d   :  { %v272_v50 = vpop.permute.xlu0 %271 }
 0x43e   :  { %v274_v51 = vmul.f32 %v272_v50, %v257_v40 }
 0x440   :  { %276 = vrot.lane.b32.xlu1 %v274_v51, %s3522_s22 }
 0x4b2   :  { %v277_v53 = vpop.permute.xlu1 %276 }
 0x4b3   :  { %279 = vst.msk [vmem:[#allocation2 + $0x8] sm:$0xff] %vm178_vm4, %v277_v53  ;;  %3205 = vmatmul.msk.f32.vlgmr.msrb.gmra.mxu3 %vm178_vm4, %v277_v53 }
 0x4b4   :  { %636 = vmatpush.msrb.mxu3 %v583_v57 }
 0x536   :  { %v299_v59 = vpop.f32.mrf.mxu3 }
 0x537   :  { %v302_v60 = vadd.f32 %v299_v59, %v161_v58  ;;  %v582_v58 = vld [vmem:[%s5378_s5 + $0x10] sm:$0xff]  ;;  %v581_v59 = vld [vmem:[%s5378_s5 + $0x8] sm:$0xff] }
 0x538   :  { %637 = vmatpush.msrb.mxu3 %v582_v58 }
 0x539   :  { %v303_v61 = vmul.f32 %v302_v60, %v3683_v14  ;;  %v580_v60 = vld [vmem:[%s5378_s5] sm:$0xff] }
 0x53a   :  { %638 = vmatpush.msrb.mxu3 %v581_v59 }
 0x53b   :  { %3341 = vtanh.f32 %v303_v61 }
 0x53c   :  { %639 = vmatpush.msrb.mxu3 %v580_v60 }
 0x541   :  { %v3342_v62 = vpop.eup %3341 }
 0x542   :  { %v305_v63 = vadd.f32 1.0, %v3342_v62 }
 0x544   :  { %v306_v0 = vmul.f32 0.5, %v305_v63  ;;  %v590_v63 = vld [vmem:[#allocation2 + $0x8] sm:$0xff] }
 0x546   :  { %v307_v1 = vsel %vm3676_vm3, %v3342_v62, %v306_v0  ;;  %v589_v62 = vld [vmem:[#allocation2] sm:$0xff] }
 0x547   :  { %310 = vrot.lane.b32.xlu2 %v307_v1, %s3521_s4  ;;  %v308_v4 = vmul.f32 %v307_v1, %v268_v45 }
 0x5a1   :  { %v311_v2 = vpop.permute.xlu2 %310 }
 0x5a2   :  { %v313_v3 = vmul.f32 %v311_v2, %v307_v1 }
 0x5a4   :  { %315 = vrot.lane.b32.xlu0 %v313_v3, %s3522_s22  ;;  %v170_v3 = vadd.f32 %v3671_v9, %v3732_v54 }
 0x616   :  { %v316_v5 = vpop.permute.xlu0 %315 }
 0x617   :  { %v318_v7 = vadd.f32 %v316_v5, %v308_v4 }
 0x619   :  { %3343 = vtanh.f32 %v318_v7 }
 0x61f   :  { %v3344_v10 = vpop.eup %3343 }
 0x620   :  { %321 = vrot.lane.b32.xlu1 %v3344_v10, %s3521_s4 }
 0x692   :  { %v322_v15 = vpop.permute.xlu1 %321 }
 0x693   :  { %v324_v16 = vmul.f32 %v322_v15, %v307_v1 }
 0x695   :  { %326 = vrot.lane.b32.xlu2 %v324_v16, %s3522_s22 }
 0x6ef   :  { %v327_v17 = vpop.permute.xlu2 %326 }
 0x6f0   :  { %329 = vst.msk [vmem:[#allocation2 + $0x10] sm:$0xff] %vm178_vm4, %v327_v17  ;;  %3206 = vmatmul.msk.f32.vlgmr.msrb.gmra.mxu1 %vm178_vm4, %v327_v17 }
 0x6f7   :  { %v591_v0 = vld [vmem:[#allocation2 + $0x10] sm:$0xff] }
 0x76d   :  { %v349_v20 = vpop.f32.mrf.mxu1 }
 0x76e   :  { %v352_v21 = vadd.f32 %v349_v20, %v164_v19 }
 0x770   :  { %v353_v22 = vmul.f32 %v352_v21, %v3683_v14 }
 0x772   :  { %3345 = vtanh.f32 %v353_v22 }
 0x778   :  { %v3346_v23 = vpop.eup %3345 }
 0x779   :  { %v355_v24 = vadd.f32 1.0, %v3346_v23 }
 0x77b   :  { %v356_v25 = vmul.f32 0.5, %v355_v24  ;;  %v3805_v24 = vld [vmem:[%s5379_s6 + $0x18] sm:$0xff] }
 0x77c   :  { %677 = vmatpush.msrb.mxu1 %v3805_v24 }
 0x77d   :  { %v357_v26 = vsel %vm3676_vm3, %v3346_v23, %v356_v25  ;;  %v3810_v25 = vld [vmem:[%s5379_s6 + $0x10] sm:$0xff] }
 0x77e   :  { %360 = vrot.lane.b32.xlu0 %v357_v26, %s3521_s4  ;;  %v358_v29 = vmul.f32 %v357_v26, %v318_v7  ;;  %678 = vmatpush.msrb.mxu1 %v3810_v25 }
 0x7f0   :  { %v361_v27 = vpop.permute.xlu0 %360 }
 0x7f1   :  { %v363_v28 = vmul.f32 %v361_v27, %v357_v26  ;;  %v3824_v27 = vld [vmem:[%s5379_s6] sm:$0xff] }
 0x7f3   :  { %365 = vrot.lane.b32.xlu1 %v363_v28, %s3522_s22 }
 0x865   :  { %v366_v30 = vpop.permute.xlu1 %365 }
 0x866   :  { %v368_v31 = vadd.f32 %v366_v30, %v358_v29  ;;  %v173_v30 = vadd.f32 %v3671_v9, %v3734_v55 }
 0x868   :  { %3347 = vtanh.f32 %v368_v31 }
 0x86e   :  { %v3348_v32 = vpop.eup %3347 }
 0x86f   :  { %371 = vrot.lane.b32.xlu2 %v3348_v32, %s3521_s4 }
 0x8c9   :  { %v372_v33 = vpop.permute.xlu2 %371 }
 0x8ca   :  { %v374_v34 = vmul.f32 %v372_v33, %v357_v26  ;;  %v3817_v26 = vld [vmem:[%s5379_s6 + $0x8] sm:$0xff]  ;;  %v3847_v33 = vld [vmem:[%s5380_s7] ss:$0 sm:$0xff] }
 0x8cb   :  { %679 = vmatpush.msrb.mxu1 %v3817_v26 }
 0x8cc   :  { %376 = vrot.lane.b32.xlu0 %v374_v34, %s3522_s22 }
 0x8cd   :  { %680 = vmatpush.msrb.mxu1 %v3824_v27 }
 0x93e   :  { %v377_v36 = vpop.permute.xlu0 %376 }
 0x93f   :  { %379 = vst.msk [vmem:[#allocation2 + $0x18] sm:$0xff] %vm178_vm4, %v377_v36  ;;  %3207 = vmatmul.msk.f32.vlgmr.msrb.gmra.mxu2 %vm178_vm4, %v377_v36 }
 0x940   :  { %725 = vmatpush.msrb.mxu2 %v3805_v24 }
 0x942   :  { %726 = vmatpush.msrb.mxu2 %v3810_v25 }
 0x944   :  { %727 = vmatpush.msrb.mxu2 %v3817_v26 }
 0x946   :  { %v592_v1 = vld [vmem:[#allocation2 + $0x18] sm:$0xff]  ;;  %728 = vmatpush.msrb.mxu2 %v3824_v27 }
 0x9c2   :  { %v399_v39 = vpop.f32.mrf.mxu2 }
 0x9c3   :  { %v402_v40 = vadd.f32 %v399_v39, %v167_v38 }
 0x9c5   :  { %v403_v41 = vmul.f32 %v402_v40, %v3683_v14 }
 0x9c7   :  { %3349 = vtanh.f32 %v403_v41 }
 0x9cd   :  { %v3350_v42 = vpop.eup %3349 }
 0x9ce   :  { %v405_v43 = vadd.f32 1.0, %v3350_v42 }
 0x9d0   :  { %v406_v44 = vmul.f32 0.5, %v405_v43 }
 0x9d2   :  { %v407_v45 = vsel %vm3676_vm3, %v3350_v42, %v406_v44 }
 0x9d3   :  { %410 = vrot.lane.b32.xlu1 %v407_v45, %s3521_s4  ;;  %v408_v48 = vmul.f32 %v407_v45, %v368_v31 }
 0xa45   :  { %v411_v46 = vpop.permute.xlu1 %410 }
 0xa46   :  { %v413_v47 = vmul.f32 %v411_v46, %v407_v45 }
 0xa48   :  { %415 = vrot.lane.b32.xlu2 %v413_v47, %s3522_s22 }
 0xaa2   :  { %v416_v49 = vpop.permute.xlu2 %415 }
 0xaa3   :  { %v418_v50 = vadd.f32 %v416_v49, %v408_v48 }
 0xaa5   :  { %3351 = vtanh.f32 %v418_v50 }
 0xaab   :  { %v3352_v51 = vpop.eup %3351 }
 0xaac   :  { %421 = vrot.lane.b32.xlu0 %v3352_v51, %s3521_s4 }
 0xb1e   :  { %v422_v52 = vpop.permute.xlu0 %421 }
 0xb1f   :  { %v424_v53 = vmul.f32 %v422_v52, %v407_v45 }
 0xb21   :  { %426 = vrot.lane.b32.xlu1 %v424_v53, %s3522_s22 }
 0xb93   :  { %v427_v61 = vpop.permute.xlu1 %426 }
 0xb94   :  { %429 = vst.msk [vmem:[#allocation2 + $0x20] sm:$0xff] %vm178_vm4, %v427_v61  ;;  %3208 = vmatmul.msk.f32.vlgmr.msra.gmra.mxu3 %vm178_vm4, %v427_v61 }
 0xb9b   :  { %v593_v2 = vld [vmem:[#allocation2 + $0x20] sm:$0xff] }
 0xb9c   :  { %3211 = vmatmul.msk.f32.vlgmr.msrb.gmra.mxu3 %vm178_vm4, %v589_v62 }
 0xba4   :  { %3212 = vmatmul.msk.f32.gmra.mxu3 %vm178_vm4, %v590_v63 }
 0xbac   :  { %3213 = vmatmul.msk.f32.gmra.mxu3 %vm178_vm4, %v591_v0 }
 0xbb4   :  { %3214 = vmatmul.msk.f32.gmra.mxu3 %vm178_vm4, %v592_v1 }
 0xbbc   :  { %3215 = vmatmul.msk.f32.gmra.mxu3 %vm178_vm4, %v593_v2 }
 0xc17   :  { %v449_v4 = vpop.f32.mrf.mxu3 }
 0xc18   :  { %v452_v5 = vadd.f32 %v449_v4, %v170_v3 }
 0xc1a   :  { %v453_v7 = vmul.f32 %v452_v5, %v3683_v14 }
 0xc1c   :  { %3353 = vtanh.f32 %v453_v7 }
 0xc1f   :  { %v641_v35 = vpop.f32.mrf.mxu3 }
 0xc20   :  { %v642_v36 = vadd.f32 %v3847_v33, %v641_v35 }
 0xc22   :  { %v3354_v10 = vpop.eup %3353 }
 0xc23   :  { %v455_v11 = vadd.f32 1.0, %v3354_v10 }
 0xc25   :  { %v456_v15 = vmul.f32 0.5, %v455_v11 }
 0xc27   :  { %v457_v16 = vsel %vm3676_vm3, %v3354_v10, %v456_v15  ;;  %v644_v7 = vpop.f32.mrf.mxu3 }
 0xc28   :  { %460 = vrot.lane.b32.xlu2 %v457_v16, %s3521_s4  ;;  %v458_v19 = vmul.f32 %v457_v16, %v418_v50  ;;  %v645_v10 = vadd.f32 %v3847_v33, %v644_v7 }
 0xc82   :  { %v461_v17 = vpop.permute.xlu2 %460 }
 0xc83   :  { %v463_v18 = vmul.f32 %v461_v17, %v457_v16 }
 0xc85   :  { %465 = vrot.lane.b32.xlu0 %v463_v18, %s3522_s22 }
 0xcf7   :  { %v466_v20 = vpop.permute.xlu0 %465 }
 0xcf8   :  { %v468_v54 = vadd.f32 %v466_v20, %v458_v19 }
 0xcfa   :  { %3355 = vtanh.f32 %v468_v54 }
 0xd00   :  { %v3356_v21 = vpop.eup %3355 }
 0xd01   :  { %471 = vrot.lane.b32.xlu1 %v3356_v21, %s3521_s4 }
 0xd73   :  { %v472_v22 = vpop.permute.xlu1 %471 }
 0xd74   :  { %v474_v23 = vmul.f32 %v472_v22, %v457_v16 }
 0xd76   :  { %476 = vrot.lane.b32.xlu2 %v474_v23, %s3522_s22 }
 0xdd0   :  { %v477_v28 = vpop.permute.xlu2 %476 }
 0xdd1   :  { %479 = vst.msk [vmem:[#allocation2 + $0x28] sm:$0xff] %vm178_vm4, %v477_v28  ;;  %3209 = vmatmul.msk.f32.vlgmr.msra.gmra.mxu1 %vm178_vm4, %v477_v28 }
 0xdd2   :  { %773 = vmatpush.msra.mxu1 %v3805_v24 }
 0xdd4   :  { %774 = vmatpush.msra.mxu1 %v3810_v25 }
 0xdd6   :  { %775 = vmatpush.msra.mxu1 %v3817_v26 }
 0xdd8   :  { %v594_v29 = vld [vmem:[#allocation2 + $0x28] sm:$0xff]  ;;  %776 = vmatpush.msra.mxu1 %v3824_v27 }
 0xdd9   :  { %3216 = vmatmul.msk.f32.gmra.mxu3 %vm178_vm4, %v594_v29  ;;  %681 = vmatmul.f32.vlgmr.msrb.gmra.mxu1 %v3519_v6 }
 0xdda   :  { %869 = vmatpush.msrb.mxu1 %v3805_v24 }
 0xddc   :  { %870 = vmatpush.msrb.mxu1 %v3810_v25 }
 0xdde   :  { %871 = vmatpush.msrb.mxu1 %v3817_v26 }
 0xde0   :  { %872 = vmatpush.msrb.mxu1 %v3824_v27 }
 0xe4e   :  { %v499_v31 = vpop.f32.mrf.mxu1 }
 0xe4f   :  { %v502_v32 = vadd.f32 %v499_v31, %v173_v30 }
 0xe51   :  { %v503_v34 = vmul.f32 %v502_v32, %v3683_v14 }
 0xe53   :  { %3357 = vtanh.f32 %v503_v34  ;;  %v647_v34 = vpop.f32.mrf.mxu3 }
 0xe54   :  { %v648_v35 = vadd.f32 %v3847_v33, %v647_v34 }
 0xe56   :  { %v682_v37 = vpop.f32.mrf.mxu1 }
 0xe57   :  { %v685_v38 = vadd.f32 %v682_v37, %v642_v36 }
 0xe59   :  { %v3358_v39 = vpop.eup %3357  ;;  %v686_v40 = vmul.f32 %v685_v38, %v3683_v14 }
 0xe5a   :  { %v505_v41 = vadd.f32 1.0, %v3358_v39 }
 0xe5b   :  { %3359 = vtanh.f32 %v686_v40 }
 0xe5c   :  { %v506_v55 = vmul.f32 0.5, %v505_v41 }
 0xe5e   :  { %v507_v42 = vsel %vm3676_vm3, %v3358_v39, %v506_v55 }
 0xe5f   :  { %510 = vrot.lane.b32.xlu0 %v507_v42, %s3521_s4  ;;  %v508_v51 = vmul.f32 %v507_v42, %v468_v54 }
 0xe61   :  { %v3360_v43 = vpop.eup %3359 }
 0xe62   :  { %v688_v44 = vadd.f32 1.0, %v3360_v43 }
 0xe64   :  { %v689_v45 = vmul.f32 0.5, %v688_v44 }
 0xe66   :  { %v690_v46 = vsel %vm3676_vm3, %v3360_v43, %v689_v45 }
 0xe67   :  { %693 = vrot.lane.b32.xlu1 %v690_v46, %s3521_s4  ;;  %v691_v58 = vmul.f32 0.0, %v690_v46 }
 0xed1   :  { %v511_v47 = vpop.permute.xlu0 %510 }
 0xed2   :  { %v513_v48 = vmul.f32 %v511_v47, %v507_v42 }
 0xed4   :  { %515 = vrot.lane.b32.xlu2 %v513_v48, %s3522_s22 }
 0xed9   :  { %v694_v49 = vpop.permute.xlu1 %693 }
 0xeda   :  { %v696_v50 = vmul.f32 %v694_v49, %v690_v46 }
 0xedc   :  { %698 = vrot.lane.b32.xlu0 %v696_v50, %s3522_s22 }
 0xf2e   :  { %v516_v52 = vpop.permute.xlu2 %515 }
 0xf2f   :  { %v3860_v53 = vadd.f32 %v516_v52, %v508_v51  ;;  %v650_v51 = vpop.f32.mrf.mxu3 }
 0xf30   :  { %v651_v52 = vadd.f32 %v3847_v33, %v650_v51 }
 0xf31   :  { %3361 = vtanh.f32 %v3860_v53 }
 0xf37   :  { %v3362_v57 = vpop.eup %3361  ;;  %v653_v7 = vpop.f32.mrf.mxu3 }
 0xf38   :  { %521 = vrot.lane.b32.xlu1 %v3362_v57, %s3521_s4 }
 0xf3f   :  { %v656_v34 = vpop.f32.mrf.mxu3 }
 0xf4e   :  { %v699_v59 = vpop.permute.xlu0 %698 }
 0xf4f   :  { %v701_v60 = vadd.f32 %v699_v59, %v691_v58 }
 0xf51   :  { %3363 = vtanh.f32 %v701_v60 }
 0xf57   :  { %v3364_v61 = vpop.eup %3363 }
 0xf58   :  { %704 = vrot.lane.b32.xlu2 %v3364_v61, %s3521_s4 }
 0xfaa   :  { %v522_v62 = vpop.permute.xlu1 %521 }
 0xfab   :  { %v524_v63 = vmul.f32 %v522_v62, %v507_v42 }
 0xfad   :  { %526 = vrot.lane.b32.xlu0 %v524_v63, %s3522_s22 }
 0xfb2   :  { %v705_v0 = vpop.permute.xlu2 %704 }
 0xfb3   :  { %v707_v1 = vmul.f32 %v705_v0, %v690_v46 }
 0xfb5   :  { %709 = vrot.lane.b32.xlu1 %v707_v1, %s3522_s22 }
0x101f   :  { %v527_v2 = vpop.permute.xlu0 %526 }
0x1020   :  { %529 = vst.msk [vmem:[#allocation2 + $0x30] sm:$0xff] %vm178_vm4, %v527_v2  ;;  %3210 = vmatmul.msk.f32.vlgmr.msra.gmra.mxu2 %vm178_vm4, %v527_v2 }
0x1021   :  { %821 = vmatpush.msra.mxu2 %v3805_v24 }
0x1023   :  { %822 = vmatpush.msra.mxu2 %v3810_v25 }
0x1025   :  { %823 = vmatpush.msra.mxu2 %v3817_v26 }
0x1027   :  { %v710_v3 = vpop.permute.xlu1 %709  ;;  %v595_v4 = vld [vmem:[#allocation2 + $0x30] sm:$0xff]  ;;  %824 = vmatpush.msra.mxu2 %v3824_v27 }
0x1028   :  { %3217 = vmatmul.msk.f32.gmra.mxu3 %vm178_vm4, %v595_v4  ;;  %3219 = vmatmul.msk.f32.vlgmr.msrb.gmra.mxu2 %vm178_vm4, %v710_v3 }
0x1029   :  { %917 = vmatpush.msrb.mxu2 %v3805_v24 }
0x102b   :  { %918 = vmatpush.msrb.mxu2 %v3810_v25 }
0x102d   :  { %919 = vmatpush.msrb.mxu2 %v3817_v26 }
0x102f   :  { %920 = vmatpush.msrb.mxu2 %v3824_v27 }
0x10a3   :  { %v3879_v5 = vpop.f32.mrf.mxu2 }
0x10ab   :  { %v730_v11 = vpop.f32.mrf.mxu2 }
0x10ac   :  { %v733_v15 = vadd.f32 %v730_v11, %v645_v10  ;;  %v654_v10 = vadd.f32 %v3847_v33, %v653_v7 }
0x10ae   :  { %v734_v16 = vmul.f32 %v733_v15, %v3683_v14 }
0x10b0   :  { %3365 = vtanh.f32 %v734_v16 }
0x10b6   :  { %v3366_v17 = vpop.eup %3365 }
0x10b7   :  { %v736_v18 = vadd.f32 1.0, %v3366_v17 }
0x10b9   :  { %v737_v19 = vmul.f32 0.5, %v736_v18 }
0x10bb   :  { %v738_v20 = vsel %vm3676_vm3, %v3366_v17, %v737_v19 }
0x10bc   :  { %741 = vrot.lane.b32.xlu2 %v738_v20, %s3521_s4  ;;  %v739_v22 = vmul.f32 %v738_v20, %v701_v60 }
0x1116   :  { %v742_v54 = vpop.permute.xlu2 %741 }
0x1117   :  { %v744_v21 = vmul.f32 %v742_v54, %v738_v20 }
0x1119   :  { %746 = vrot.lane.b32.xlu0 %v744_v21, %s3522_s22 }
0x118b   :  { %v747_v23 = vpop.permute.xlu0 %746 }
0x118c   :  { %v749_v28 = vadd.f32 %v747_v23, %v739_v22 }
0x118e   :  { %3367 = vtanh.f32 %v749_v28 }
0x1194   :  { %v3368_v29 = vpop.eup %3367 }
0x1195   :  { %752 = vrot.lane.b32.xlu1 %v3368_v29, %s3521_s4 }
0x1207   :  { %v753_v30 = vpop.permute.xlu1 %752 }
0x1208   :  { %v755_v31 = vmul.f32 %v753_v30, %v738_v20 }
0x120a   :  { %757 = vrot.lane.b32.xlu2 %v755_v31, %s3522_s22 }
0x1264   :  { %v758_v32 = vpop.permute.xlu2 %757 }
0x1265   :  { %3220 = vmatmul.msk.f32.vlgmr.msra.gmra.mxu1 %vm178_vm4, %v758_v32 }
0x1266   :  { %965 = vmatpush.msra.mxu1 %v3805_v24 }
0x1268   :  { %966 = vmatpush.msra.mxu1 %v3810_v25 }
0x126a   :  { %967 = vmatpush.msra.mxu1 %v3817_v26 }
0x126c   :  { %968 = vmatpush.msra.mxu1 %v3824_v27 }
0x12e2   :  { %v778_v36 = vpop.f32.mrf.mxu1 }
0x12e3   :  { %v781_v37 = vadd.f32 %v778_v36, %v648_v35  ;;  %v657_v35 = vadd.f32 %v3847_v33, %v656_v34 }
0x12e5   :  { %v782_v38 = vmul.f32 %v781_v37, %v3683_v14 }
0x12e7   :  { %3369 = vtanh.f32 %v782_v38 }
0x12ed   :  { %v3370_v39 = vpop.eup %3369 }
0x12ee   :  { %v784_v40 = vadd.f32 1.0, %v3370_v39 }
0x12f0   :  { %v785_v41 = vmul.f32 0.5, %v784_v40 }
0x12f2   :  { %v786_v55 = vsel %vm3676_vm3, %v3370_v39, %v785_v41 }
0x12f3   :  { %789 = vrot.lane.b32.xlu0 %v786_v55, %s3521_s4  ;;  %v787_v44 = vmul.f32 %v786_v55, %v749_v28 }
0x1365   :  { %v790_v42 = vpop.permute.xlu0 %789 }
0x1366   :  { %v792_v43 = vmul.f32 %v790_v42, %v786_v55  ;;  %v176_v42 = vadd.f32 %v3671_v9, %v3736_v56 }
0x1368   :  { %794 = vrot.lane.b32.xlu1 %v792_v43, %s3522_s22  ;;  %v552_v43 = vadd.f32 %v3879_v5, %v176_v42  ;;  %v1092_v42 = vld [vmem:[%s5381_s8 + $0x180] sm:$0xff] }
0x13da   :  { %v795_v45 = vpop.permute.xlu1 %794 }
0x13db   :  { %v797_v46 = vadd.f32 %v795_v45, %v787_v44  ;;  %v553_v44 = vmul.f32 %v552_v43, %v3683_v14  ;;  %v1076_v43 = vld [vmem:[%s5381_s8 + $0x100] sm:$0xff] }
0x13dd   :  { %3371 = vtanh.f32 %v797_v46 }
0x13e3   :  { %v3372_v47 = vpop.eup %3371 }
0x13e4   :  { %800 = vrot.lane.b32.xlu2 %v3372_v47, %s3521_s4 }
0x143e   :  { %v801_v48 = vpop.permute.xlu2 %800 }
0x143f   :  { %v803_v49 = vmul.f32 %v801_v48, %v786_v55 }
0x1441   :  { %805 = vrot.lane.b32.xlu0 %v803_v49, %s3522_s22 }
0x14b3   :  { %v806_v50 = vpop.permute.xlu0 %805 }
0x14b4   :  { %3221 = vmatmul.msk.f32.vlgmr.msra.gmra.mxu2 %vm178_vm4, %v806_v50 }
0x14b5   :  { %1013 = vmatpush.msra.mxu2 %v3805_v24 }
0x14b7   :  { %1014 = vmatpush.msra.mxu2 %v3810_v25 }
0x14b9   :  { %1015 = vmatpush.msra.mxu2 %v3817_v26 }
0x14bb   :  { %1016 = vmatpush.msra.mxu2 %v3824_v27 }
0x1537   :  { %v826_v57 = vpop.f32.mrf.mxu2 }
0x1538   :  { %v829_v58 = vadd.f32 %v826_v57, %v651_v52 }
0x153a   :  { %v830_v59 = vmul.f32 %v829_v58, %v3683_v14 }
0x153c   :  { %3373 = vtanh.f32 %v830_v59 }
0x1542   :  { %v3374_v60 = vpop.eup %3373 }
0x1543   :  { %v832_v61 = vadd.f32 1.0, %v3374_v60 }
0x1545   :  { %v833_v62 = vmul.f32 0.5, %v832_v61  ;;  %v659_v61 = vpop.f32.mrf.mxu3 }
0x1547   :  { %v834_v24 = vsel %vm3676_vm3, %v3374_v60, %v833_v62  ;;  %v660_v62 = vadd.f32 %v3847_v33, %v659_v61  ;;  %v1068_v61 = vld [vmem:[%s5381_s8 + $0xc0] sm:$0xff] }
0x1548   :  { %837 = vrot.lane.b32.xlu1 %v834_v24, %s3521_s4  ;;  %v835_v27 = vmul.f32 %v834_v24, %v797_v46 }
0x15ba   :  { %v838_v25 = vpop.permute.xlu1 %837 }
0x15bb   :  { %v840_v26 = vmul.f32 %v838_v25, %v834_v24 }
0x15bd   :  { %842 = vrot.lane.b32.xlu2 %v840_v26, %s3522_s22 }
0x1617   :  { %v843_v63 = vpop.permute.xlu2 %842 }
0x1618   :  { %v845_v0 = vadd.f32 %v843_v63, %v835_v27 }
0x161a   :  { %3375 = vtanh.f32 %v845_v0 }
0x1620   :  { %v3376_v1 = vpop.eup %3375 }
0x1621   :  { %848 = vrot.lane.b32.xlu0 %v3376_v1, %s3521_s4 }
0x1693   :  { %v849_v2 = vpop.permute.xlu0 %848 }
0x1694   :  { %v851_v3 = vmul.f32 %v849_v2, %v834_v24 }
0x1696   :  { %853 = vrot.lane.b32.xlu1 %v851_v3, %s3522_s22 }
0x1708   :  { %v854_v4 = vpop.permute.xlu1 %853 }
0x1709   :  { %3222 = vmatmul.msk.f32.vlgmr.msrb.gmra.mxu1 %vm178_vm4, %v854_v4 }
0x170a   :  { %1177 = vmatpush.msrb.mxu1 %v1092_v42  ;;  %v1086_v42 = vld [vmem:[%s5381_s8 + $0x150] sm:$0xff] }
0x170c   :  { %1178 = vmatpush.msrb.mxu1 %v1076_v43  ;;  %v4193_v43 = vld [vmem:[%s5383_s10 + $0x20] sm:$0xff] }
0x1786   :  { %v874_v11 = vpop.f32.mrf.mxu1 }
0x1787   :  { %v877_v15 = vadd.f32 %v874_v11, %v654_v10 }
0x1789   :  { %v878_v16 = vmul.f32 %v877_v15, %v3683_v14 }
0x178b   :  { %3377 = vtanh.f32 %v878_v16 }
0x1791   :  { %v3378_v17 = vpop.eup %3377 }
0x1792   :  { %v880_v18 = vadd.f32 1.0, %v3378_v17 }
0x1794   :  { %v881_v19 = vmul.f32 0.5, %v880_v18 }
0x1796   :  { %v882_v20 = vsel %vm3676_vm3, %v3378_v17, %v881_v19 }
0x1797   :  { %885 = vrot.lane.b32.xlu2 %v882_v20, %s3521_s4  ;;  %v883_v22 = vmul.f32 %v882_v20, %v845_v0 }
0x17f1   :  { %v886_v54 = vpop.permute.xlu2 %885 }
0x17f2   :  { %v888_v21 = vmul.f32 %v886_v54, %v882_v20 }
0x17f4   :  { %890 = vrot.lane.b32.xlu0 %v888_v21, %s3522_s22 }
0x1866   :  { %v891_v23 = vpop.permute.xlu0 %890 }
0x1867   :  { %v893_v28 = vadd.f32 %v891_v23, %v883_v22 }
0x1869   :  { %3379 = vtanh.f32 %v893_v28 }
0x186f   :  { %v3380_v29 = vpop.eup %3379 }
0x1870   :  { %896 = vrot.lane.b32.xlu1 %v3380_v29, %s3521_s4 }
0x18e2   :  { %v897_v30 = vpop.permute.xlu1 %896 }
0x18e3   :  { %v899_v31 = vmul.f32 %v897_v30, %v882_v20 }
0x18e5   :  { %901 = vrot.lane.b32.xlu2 %v899_v31, %s3522_s22 }
0x193f   :  { %v902_v32 = vpop.permute.xlu2 %901 }
0x1940   :  { %3223 = vmatmul.msk.f32.vlgmr.msrb.gmra.mxu2 %vm178_vm4, %v902_v32 }
0x19c3   :  { %v922_v36 = vpop.f32.mrf.mxu2 }
0x19c4   :  { %v925_v37 = vadd.f32 %v922_v36, %v657_v35 }
0x19c6   :  { %v926_v38 = vmul.f32 %v925_v37, %v3683_v14 }
0x19c8   :  { %3381 = vtanh.f32 %v926_v38 }
0x19c9   :  { %3383 = vtanh.f32 %v553_v44  ;;  %v1093_v44 = vld [vmem:[%s5381_s8 + $0x188] sm:$0xff] }
0x19ca   :  { %1197 = vmatpush.msrb.mxu2 %v1093_v44  ;;  %v1089_v44 = vld [vmem:[%s5381_s8 + $0x168] sm:$0xff] }
0x19ce   :  { %v3382_v39 = vpop.eup %3381 }
0x19cf   :  { %v928_v40 = vadd.f32 1.0, %v3382_v39  ;;  %v3384_v45 = vpop.eup %3383 }
0x19d0   :  { %v555_v48 = vadd.f32 1.0, %v3384_v45 }
0x19d1   :  { %v929_v41 = vmul.f32 0.5, %v928_v40 }
0x19d2   :  { %v556_v49 = vmul.f32 0.5, %v555_v48  ;;  %v1077_v48 = vld [vmem:[%s5381_s8 + $0x108] sm:$0xff] }
0x19d3   :  { %v930_v55 = vsel %vm3676_vm3, %v3382_v39, %v929_v41  ;;  %1198 = vmatpush.msrb.mxu2 %v1077_v48  ;;  %v1073_v48 = vld [vmem:[%s5381_s8 + $0xe8] sm:$0xff] }
0x19d4   :  { %933 = vrot.lane.b32.xlu0 %v930_v55, %s3521_s4  ;;  %v557_v50 = vsel %vm3676_vm3, %v3384_v45, %v556_v49  ;;  %v931_v51 = vmul.f32 %v930_v55, %v893_v28  ;;  %v1065_v45 = vld [vmem:[%s5381_s8 + $0xa8] sm:$0xff]  ;;  %v1078_v49 = vld [vmem:[%s5381_s8 + $0x110] sm:$0xff] }
0x19d5   :  { %v558_v0 = vmul.f32 %v557_v50, %v3860_v53 }
0x1a46   :  { %v934_v46 = vpop.permute.xlu0 %933 }
0x1a47   :  { %v936_v47 = vmul.f32 %v934_v46, %v930_v55  ;;  %v1094_v46 = vld [vmem:[%s5381_s8 + $0x190] sm:$0xff] }
0x1a48   :  { %1217 = vmatpush.msra.mxu3 %v1094_v46  ;;  %v4205_v46 = vld [vmem:[%s5383_s10 + $0x68] sm:$0xff] }
0x1a49   :  { %938 = vrot.lane.b32.xlu1 %v936_v47, %s3522_s22  ;;  %v1060_v47 = vld [vmem:[%s5381_s8 + $0x80] sm:$0xff] }
0x1a4a   :  { %1179 = vmatpush.msrb.mxu1 %v1060_v47  ;;  %1218 = vmatpush.msra.mxu3 %v1078_v49  ;;  %v4210_v47 = vld [vmem:[%s5383_s10 + $0x10] sm:$0xff] }
0x1a4b   :  { %v1054_v49 = vld [vmem:[%s5381_s8 + $0x50] sm:$0xff] }
0x1a51   :  { %560 = vrot.lane.b32.xlu1 %v557_v50, %s3521_s4 }
0x1abb   :  { %v939_v52 = vpop.permute.xlu1 %938 }
0x1abc   :  { %v941_v9 = vadd.f32 %v939_v52, %v931_v51  ;;  %v1044_v51 = vld [vmem:[%s5381_s8] sm:$0xff]  ;;  %v1061_v52 = vld [vmem:[%s5381_s8 + $0x88] sm:$0xff] }
0x1abd   :  { %1199 = vmatpush.msrb.mxu2 %v1061_v52  ;;  %1180 = vmatpush.msrb.mxu1 %v1044_v51  ;;  %v4228_v51 = vld [vmem:[%s5383_s10] sm:$0xff]  ;;  %v1057_v52 = vld [vmem:[%s5381_s8 + $0x68] sm:$0xff] }
0x1abe   :  { %3385 = vtanh.f32 %v941_v9 }
0x1ac3   :  { %v561_v58 = vpop.permute.xlu1 %560 }
0x1ac4   :  { %v3386_v56 = vpop.eup %3385  ;;  %v563_v59 = vmul.f32 %v561_v58, %v557_v50  ;;  %v1084_v58 = vld [vmem:[%s5381_s8 + $0x140] sm:$0xff] }
0x1ac5   :  { %944 = vrot.lane.b32.xlu2 %v3386_v56, %s3521_s4  ;;  %v1062_v56 = vld [vmem:[%s5381_s8 + $0x90] sm:$0xff] }
0x1ac6   :  { %1219 = vmatpush.msra.mxu3 %v1062_v56  ;;  %v1090_v56 = vld [vmem:[%s5381_s8 + $0x170] sm:$0xff] }
0x1b1f   :  { %v945_v5 = vpop.permute.xlu2 %944 }
0x1b20   :  { %v947_v57 = vmul.f32 %v945_v5, %v930_v55  ;;  %v1095_v5 = vld [vmem:[%s5381_s8 + $0x198] sm:$0xff] }
0x1b22   :  { %949 = vrot.lane.b32.xlu0 %v947_v57, %s3522_s22  ;;  %v1045_v57 = vld [vmem:[%s5381_s8 + $0x8] sm:$0xff] }
0x1b23   :  { %1200 = vmatpush.msrb.mxu2 %v1045_v57  ;;  %v1074_v57 = vld [vmem:[%s5381_s8 + $0xf0] sm:$0xff] }
0x1b2a   :  { %565 = vrot.lane.b32.xlu0 %v563_v59, %s3522_s22  ;;  %v1046_v59 = vld [vmem:[%s5381_s8 + $0x10] sm:$0xff] }
0x1b2b   :  { %1220 = vmatpush.msra.mxu3 %v1046_v59  ;;  %v1058_v59 = vld [vmem:[%s5381_s8 + $0x70] sm:$0xff] }
0x1b94   :  { %v950_v60 = vpop.permute.xlu0 %949 }
0x1b95   :  { %3224 = vmatmul.msk.f32.vlgmr.msra.gmra.mxu1 %vm178_vm4, %v950_v60  ;;  %v1079_v60 = vld [vmem:[%s5381_s8 + $0x118] sm:$0xff] }
0x1b96   :  { %1237 = vmatpush.msra.mxu1 %v1095_v5  ;;  %v4251_v5 = vld [vmem:[%s5383_s10 + $0x48] sm:$0xff] }
0x1b98   :  { %1238 = vmatpush.msra.mxu1 %v1079_v60  ;;  %v4273_v60 = vld [vmem:[%s5383_s10 + $0x28] sm:$0xff] }
0x1b9c   :  { %v566_v63 = vpop.permute.xlu0 %565 }
0x1b9d   :  { %v568_v2 = vadd.f32 %v566_v63, %v558_v0  ;;  %v1103_v63 = vld [vmem:[%s5381_s8 + $0x1d8] sm:$0xff] }
0x1b9e   :  { %v1047_v0 = vld [vmem:[%s5381_s8 + $0x18] sm:$0xff]  ;;  %1397 = vmatpush.msrb.mxu3 %v1103_v63 }
0x1c12   :  { %v970_v24 = vpop.f32.mrf.mxu1 }
0x1c13   :  { %v973_v25 = vadd.f32 %v970_v24, %v660_v62 }
0x1c15   :  { %v974_v26 = vmul.f32 %v973_v25, %v3683_v14  ;;  %v1063_v25 = vld [vmem:[%s5381_s8 + $0x98] sm:$0xff] }
0x1c16   :  { %1239 = vmatpush.msra.mxu1 %v1063_v25 }
0x1c17   :  { %3387 = vtanh.f32 %v974_v26  ;;  %v1096_v26 = vld [vmem:[%s5381_s8 + $0x1a0] sm:$0xff] }
0x1c18   :  { %3389 = vtanh.f32 %v568_v2  ;;  %v1087_v2 = vld [vmem:[%s5381_s8 + $0x158] sm:$0xff]  ;;  %1240 = vmatpush.msra.mxu1 %v1047_v0  ;;  %v4361_v0 = vld [vmem:[%s5382_s9 + $0x8] sm:$0xff] }
0x1c19   :  { %1398 = vmatpush.msrb.mxu3 %v1087_v2 }
0x1c1d   :  { %v3388_v27 = vpop.eup %3387 }
0x1c1e   :  { %v976_v1 = vadd.f32 1.0, %v3388_v27  ;;  %v3390_v7 = vpop.eup %3389 }
0x1c20   :  { %v977_v3 = vmul.f32 0.5, %v976_v1  ;;  %v1080_v1 = vld [vmem:[%s5381_s8 + $0x120] sm:$0xff] }
0x1c22   :  { %v978_v4 = vsel %vm3676_vm3, %v3388_v27, %v977_v3  ;;  %v1052_v27 = vld [vmem:[%s5381_s8 + $0x40] sm:$0xff] }
0x1c23   :  { %981 = vrot.lane.b32.xlu2 %v978_v4, %s3521_s4  ;;  %v979_v53 = vmul.f32 %v978_v4, %v941_v9  ;;  %v1100_v9 = vld [vmem:[%s5381_s8 + $0x1c0] sm:$0xff] }
0x1c24   :  { %v1064_v3 = vld [vmem:[%s5381_s8 + $0xa0] sm:$0xff] }
0x1c2b   :  { %571 = vrot.lane.b32.xlu2 %v3390_v7, %s3521_s4  ;;  %v1048_v7 = vld [vmem:[%s5381_s8 + $0x20] sm:$0xff] }
0x1c7d   :  { %v982_v10 = vpop.permute.xlu2 %981 }
0x1c7e   :  { %v984_v11 = vmul.f32 %v982_v10, %v978_v4  ;;  %v1055_v10 = vld [vmem:[%s5381_s8 + $0x58] sm:$0xff] }
0x1c80   :  { %986 = vrot.lane.b32.xlu1 %v984_v11, %s3522_s22 }
0x1c85   :  { %v572_v15 = vpop.permute.xlu2 %571 }
0x1c86   :  { %v574_v16 = vmul.f32 %v572_v15, %v557_v50  ;;  %v1049_v50 = vld [vmem:[%s5381_s8 + $0x28] sm:$0xff]  ;;  %v1104_v15 = vld [vmem:[%s5381_s8 + $0x1e0] sm:$0xff] }
0x1c88   :  { %576 = vrot.lane.b32.xlu1 %v574_v16, %s3522_s22  ;;  %v1098_v16 = vld [vmem:[%s5381_s8 + $0x1b0] sm:$0xff] }
0x1cf2   :  { %v987_v17 = vpop.permute.xlu1 %986 }
0x1cf3   :  { %v989_v18 = vadd.f32 %v987_v17, %v979_v53  ;;  %v1099_v53 = vld [vmem:[%s5381_s8 + $0x1b8] sm:$0xff] }
0x1cf4   :  { %v1107_v17 = vld [vmem:[%s5381_s8 + $0x1f8] sm:$0xff] }
0x1cf5   :  { %3391 = vtanh.f32 %v989_v18 }
0x1cfa   :  { %v577_v19 = vpop.permute.xlu1 %576 }
0x1cfb   :  { %v3392_v20 = vpop.eup %3391  ;;  %579 = vst.msk [vmem:[#allocation2 + $0x38] sm:$0xff] %vm178_vm4, %v577_v19  ;;  %v1082_v19 = vld [vmem:[%s5381_s8 + $0x130] sm:$0xff] }
0x1cfc   :  { %992 = vrot.lane.b32.xlu0 %v3392_v20, %s3521_s4  ;;  %v1083_v20 = vld [vmem:[%s5381_s8 + $0x138] sm:$0xff] }
0x1d02   :  { %v596_v54 = vld [vmem:[#allocation2 + $0x38] sm:$0xff] }
0x1d03   :  { %3218 = vmatmul.msk.f32.gmra.mxu3 %vm178_vm4, %v596_v54  ;;  %v1091_v54 = vld [vmem:[%s5381_s8 + $0x178] sm:$0xff] }
0x1d6e   :  { %v993_v21 = vpop.permute.xlu0 %992 }
0x1d6f   :  { %v995_v22 = vmul.f32 %v993_v21, %v978_v4  ;;  %v1071_v4 = vld [vmem:[%s5381_s8 + $0xd8] sm:$0xff]  ;;  %v1072_v21 = vld [vmem:[%s5381_s8 + $0xe0] sm:$0xff] }
0x1d70   :  { %1399 = vmatpush.msrb.mxu3 %v1071_v4 }
0x1d71   :  { %997 = vrot.lane.b32.xlu2 %v995_v22, %s3522_s22  ;;  %v1066_v22 = vld [vmem:[%s5381_s8 + $0xb0] sm:$0xff] }
0x1d72   :  { %1400 = vmatpush.msrb.mxu3 %v1055_v10 }
0x1d86   :  { %v662_v28 = vpop.f32.mrf.mxu3 }
0x1d87   :  { %v663_v29 = vadd.f32 %v3847_v33, %v662_v28  ;;  %v1075_v28 = vld [vmem:[%s5381_s8 + $0xf8] sm:$0xff] }
0x1dcb   :  { %v998_v23 = vpop.permute.xlu2 %997 }
0x1dcc   :  { %3225 = vmatmul.msk.f32.vlgmr.msra.gmra.mxu2 %vm178_vm4, %v998_v23  ;;  %v1067_v23 = vld [vmem:[%s5381_s8 + $0xb8] sm:$0xff] }
0x1dcd   :  { %1257 = vmatpush.msra.mxu2 %v1096_v26 }
0x1dcf   :  { %1258 = vmatpush.msra.mxu2 %v1080_v1  ;;  %v1139_v1 = vperm.slane %v4361_v0, 3 }
0x1dd1   :  { %1259 = vmatpush.msra.mxu2 %v1064_v3 }
0x1dd3   :  { %1260 = vmatpush.msra.mxu2 %v1048_v7 }
0x1e4f   :  { %v1018_v30 = vpop.f32.mrf.mxu2 }
0x1e50   :  { %v1021_v31 = vadd.f32 %v1018_v30, %v663_v29  ;;  %v1056_v29 = vld [vmem:[%s5381_s8 + $0x60] sm:$0xff]  ;;  %v1050_v30 = vld [vmem:[%s5381_s8 + $0x30] sm:$0xff] }
0x1e52   :  { %v1022_v32 = vmul.f32 %v1021_v31, %v3683_v14  ;;  %v1097_v14 = vld [vmem:[%s5381_s8 + $0x1a8] sm:$0xff]  ;;  %v4119_v31 = vld [vmem:[%s5383_s10 + $0x70] sm:$0xff] }
0x1e53   :  { %1277 = vmatpush.msrb.mxu0 %v1097_v14  ;;  %v4177_v14 = vld [vmem:[%s5383_s10 + $0x30] sm:$0xff] }
0x1e54   :  { %3393 = vtanh.f32 %v1022_v32  ;;  %v1101_v32 = vld [vmem:[%s5381_s8 + $0x1c8] sm:$0xff] }
0x1e55   :  { %1278 = vmatpush.msrb.mxu0 %v1081_v12  ;;  %v1105_v12 = vld [vmem:[%s5381_s8 + $0x1e8] sm:$0xff] }
0x1e57   :  { %1279 = vmatpush.msrb.mxu0 %v1065_v45  ;;  %v1070_v45 = vld [vmem:[%s5381_s8 + $0xd0] sm:$0xff] }
0x1e59   :  { %1280 = vmatpush.msrb.mxu0 %v1049_v50  ;;  %v4223_v50 = vld [vmem:[%s5383_s10 + $0x58] sm:$0xff] }
0x1e5a   :  { %v3394_v34 = vpop.eup %3393 }
0x1e5b   :  { %v1024_v35 = vadd.f32 1.0, %v3394_v34  ;;  %1337 = vmatpush.msra.mxu0 %v1100_v9  ;;  %v1106_v9 = vld [vmem:[%s5381_s8 + $0x1f0] sm:$0xff] }
0x1e5d   :  { %v1025_v36 = vmul.f32 0.5, %v1024_v35  ;;  %1338 = vmatpush.msra.mxu0 %v1084_v58  ;;  %v1059_v35 = vld [vmem:[%s5381_s8 + $0x78] sm:$0xff] }
0x1e5e   :  { %v4262_v58 = vld [vmem:[%s5383_s10 + $0x38] sm:$0xff] }
0x1e5f   :  { %v1026_v37 = vsel %vm3676_vm3, %v3394_v34, %v1025_v36  ;;  %1339 = vmatpush.msra.mxu0 %v1068_v61  ;;  %v1051_v34 = vld [vmem:[%s5381_s8 + $0x38] sm:$0xff]  ;;  %v4137_v36 = vld [vmem:[%s5383_s10 + $0x60] sm:$0xff] }
0x1e60   :  { %1029 = vrot.lane.b32.xlu0 %v1026_v37, %s3521_s4  ;;  %v1027_v40 = vmul.f32 %v1026_v37, %v989_v18  ;;  %v1088_v18 = vld [vmem:[%s5381_s8 + $0x160] sm:$0xff]  ;;  %v4282_v61 = vld [vmem:[%s5383_s10 + $0x18] sm:$0xff] }
0x1e61   :  { %1340 = vmatpush.msra.mxu0 %v1052_v27 }
0x1ed2   :  { %v1030_v38 = vpop.permute.xlu0 %1029 }
0x1ed3   :  { %v1032_v39 = vmul.f32 %v1030_v38, %v1026_v37  ;;  %v1102_v38 = vld [vmem:[%s5381_s8 + $0x1d0] sm:$0xff] }
0x1ed5   :  { %1034 = vrot.lane.b32.xlu1 %v1032_v39, %s3522_s22  ;;  %v4149_v39 = vld [vmem:[%s5383_s10 + $0x50] sm:$0xff] }
0x1f47   :  { %v1035_v41 = vpop.permute.xlu1 %1034 }
0x1f48   :  { %v1037_v33 = vadd.f32 %v1035_v41, %v1027_v40  ;;  %v1069_v40 = vld [vmem:[%s5381_s8 + $0xc8] sm:$0xff]  ;;  %v4158_v41 = vld [vmem:[%s5383_s10 + $0x78] sm:$0xff] }
0x1f4a   :  { %3395 = vtanh.f32 %v1037_v33  ;;  %v4163_v33 = vld [vmem:[%s5383_s10 + $0x40] sm:$0xff] }
0x1f50   :  { %v3396_v55 = vpop.eup %3395 }
0x1f51   :  { %1040 = vrot.lane.b32.xlu2 %v3396_v55, %s3521_s4  ;;  %v1053_v55 = vld [vmem:[%s5381_s8 + $0x48] sm:$0xff] }
0x1fab   :  { %v1041_v62 = vpop.permute.xlu2 %1040 }
0x1fac   :  { %v1043_v24 = vmul.f32 %v1041_v62, %v1026_v37  ;;  %v1085_v37 = vld [vmem:[%s5381_s8 + $0x148] sm:$0xff] }
0x1fad   :  { %v4291_v62 = vld [vmem:[%s5383_s10 + $0x8] sm:$0xff] }
0x1fae   :  { %1161 = vrot.lane.b32.xlu0 %v1043_v24, %s3522_s22 }
0x2020   :  { %v4060_v11 = vpop.permute.xlu0 %1161 }
0x2021   :  { %3226 = vmatmul.msk.f32.vlgmr.msrb.gmra.mxu1 %vm178_vm4, %v4060_v11  ;;  %3227 = vmatmul.msk.f32.vlgmr.msrb.gmra.mxu2 %vm178_vm4, %v4060_v11 }
0x2022   :  { %3228 = vmatmul.msk.f32.vlgmr.msra.gmra.mxu3 %vm178_vm4, %v4060_v11  ;;  %3231 = vmatmul.msk.f32.vlgmr.msrb.gmra.mxu0 %vm178_vm4, %v4060_v11 }
0x2023   :  { %1417 = vmatpush.msrb.mxu0 %v1104_v15  ;;  %1297 = vmatpush.msrb.mxu1 %v1098_v16 }
0x2024   :  { %1317 = vmatpush.msrb.mxu2 %v1099_v53  ;;  %1477 = vmatpush.msra.mxu3 %v1107_v17  ;;  %v4381_v53 = vld [vmem:[%s5382_s9] sm:$0xff]  ;;  %v1138_v17 = vperm.slane %v4361_v0, 2 }
0x2025   :  { %1418 = vmatpush.msrb.mxu0 %v1088_v18  ;;  %1298 = vmatpush.msrb.mxu1 %v1082_v19  ;;  %v1141_v18 = vperm.slane %v4361_v0, 5  ;;  %v1128_v19 = vperm.slane %v4381_v53, 0 }
0x2026   :  { %1318 = vmatpush.msrb.mxu2 %v1083_v20  ;;  %1478 = vmatpush.msra.mxu3 %v1091_v54 }
0x2027   :  { %1419 = vmatpush.msrb.mxu0 %v1072_v21  ;;  %1299 = vmatpush.msrb.mxu1 %v1066_v22 }
0x2028   :  { %1319 = vmatpush.msrb.mxu2 %v1067_v23  ;;  %1479 = vmatpush.msra.mxu3 %v1075_v28 }
0x2029   :  { %3229 = vmatmul.msk.f32.vlgmr.msra.gmra.mxu1 %vm178_vm4, %v4060_v11  ;;  %3230 = vmatmul.msk.f32.vlgmr.msra.gmra.mxu2 %vm178_vm4, %v4060_v11 }
0x202a   :  { %3234 = vmatmul.msk.f32.vlgmr.msra.gmra.mxu0 %vm178_vm4, %v4060_v11  ;;  %3237 = vmatmul.msk.f32.vlgmr.msrb.gmra.mxu3 %vm178_vm4, %v4060_v11 }
0x202b   :  { %1420 = vmatpush.msrb.mxu0 %v1056_v29  ;;  %1300 = vmatpush.msrb.mxu1 %v1050_v30  ;;  %v4391_v29 = vadd.s32 128, %v3666_v8 }
0x202c   :  { %1320 = vmatpush.msrb.mxu2 %v1051_v34  ;;  %1480 = vmatpush.msra.mxu3 %v1059_v35 }
0x202d   :  { %1496 = vmatpush.msra.mxu0 %v4119_v31  ;;  %1357 = vmatpush.msra.mxu1 %v1101_v32  ;;  %v1129_v32 = vperm.slane %v4381_v53, 1  ;;  %vm66_vm5 = vcmp.lt.s32.totalorder %v4391_v29, 192  ;;  %vm86_vm7 = vcmp.ge.s32.totalorder %v4391_v29, 160  ;;  %vm92_vm9 = vcmp.ge.s32.totalorder %v4391_v29, 224 }
0x202e   :  { %1377 = vmatpush.msra.mxu2 %v1102_v38  ;;  %1588 = vmatpush.msrb.mxu3 %v4158_v41  ;;  %vm88_vm8 = vmand %vm86_vm7, %vm66_vm5 }
0x202f   :  { %1497 = vmatpush.msra.mxu0 %v4137_v36  ;;  %1358 = vmatpush.msra.mxu1 %v1085_v37  ;;  %v4398_v37 = vsel %vm66_vm5, 1.0, %v3520_v13  ;;  %vm4893_vm10 = vmor %vm88_vm8, %vm92_vm9 }
0x2030   :  { %1378 = vmatpush.msra.mxu2 %v1086_v42  ;;  %1589 = vmatpush.msrb.mxu3 %v4205_v46 }
0x2031   :  { %1498 = vmatpush.msra.mxu0 %v4149_v39  ;;  %1359 = vmatpush.msra.mxu1 %v1069_v40 }
0x2032   :  { %3232 = vmatmul.msk.f32.vlgmr.msrb.gmra.mxu1 %vm178_vm4, %v4060_v11  ;;  %3233 = vmatmul.msk.f32.vlgmr.msrb.gmra.mxu2 %vm178_vm4, %v4060_v11 }
0x2033   :  { %1499 = vmatpush.msra.mxu0 %v4163_v33  ;;  %3241 = vmatmul.msk.f32.vlgmr.msra.gmra.mxu3 %vm178_vm4, %v4060_v11 }
0x2034   :  { %3238 = vmatmul.msk.f32.vlgmr.msrb.gmra.mxu0 %vm178_vm4, %v4060_v11  ;;  %1360 = vmatpush.msra.mxu1 %v1053_v55 }
0x2035   :  { %1500 = vmatpush.msra.mxu0 %v4177_v14  ;;  %1379 = vmatpush.msra.mxu2 %v1070_v45 }
0x2036   :  { %1437 = vmatpush.msrb.mxu1 %v1105_v12  ;;  %1590 = vmatpush.msrb.mxu3 %v4223_v50 }
0x2037   :  { %1501 = vmatpush.msra.mxu0 %v4193_v43  ;;  %1380 = vmatpush.msra.mxu2 %v1054_v49 }
0x2038   :  { %1438 = vmatpush.msrb.mxu1 %v1089_v44  ;;  %1591 = vmatpush.msrb.mxu3 %v4251_v5 }
0x2039   :  { %1502 = vmatpush.msra.mxu0 %v4210_v47  ;;  %1457 = vmatpush.msrb.mxu2 %v1106_v9 }
0x203a   :  { %1439 = vmatpush.msrb.mxu1 %v1073_v48  ;;  %3236 = vmatmul.msk.f32.vlgmr.msra.gmra.mxu2 %vm178_vm4, %v4060_v11 }
0x203b   :  { %3235 = vmatmul.msk.f32.vlgmr.msra.gmra.mxu1 %vm178_vm4, %v4060_v11  ;;  %1503 = vmatpush.msra.mxu0 %v4228_v51 }
0x203c   :  { %1440 = vmatpush.msrb.mxu1 %v1057_v52  ;;  %1504 = vmatmul.f32.vlgmr.msra.gmra.mxu0 %v3519_v6 }
0x203d   :  { %1640 = vmatpush.msrb.mxu0 %v4119_v31  ;;  %1458 = vmatpush.msrb.mxu2 %v1090_v56 }
0x203e   :  { %1516 = vmatpush.msra.mxu1 %v4158_v41  ;;  %1592 = vmatpush.msrb.mxu3 %v4262_v58 }
0x203f   :  { %1641 = vmatpush.msrb.mxu0 %v4137_v36  ;;  %1459 = vmatpush.msrb.mxu2 %v1074_v57 }
0x2040   :  { %1517 = vmatpush.msra.mxu1 %v4205_v46  ;;  %1593 = vmatpush.msrb.mxu3 %v4273_v60 }
0x2041   :  { %1460 = vmatpush.msrb.mxu2 %v1058_v59  ;;  %1642 = vmatpush.msrb.mxu0 %v4149_v39 }
0x2042   :  { %1518 = vmatpush.msra.mxu1 %v4223_v50  ;;  %3240 = vmatmul.msk.f32.vlgmr.msrb.gmra.mxu2 %vm178_vm4, %v4060_v11 }
0x2043   :  { %3239 = vmatmul.msk.f32.vlgmr.msrb.gmra.mxu1 %vm178_vm4, %v4060_v11  ;;  %1594 = vmatpush.msrb.mxu3 %v4282_v61 }
0x2044   :  { %1519 = vmatpush.msra.mxu1 %v4251_v5  ;;  %1568 = vmatpush.msra.mxu2 %v4119_v31 }
0x2045   :  { %1595 = vmatpush.msrb.mxu3 %v4291_v62  ;;  %1643 = vmatpush.msrb.mxu0 %v4163_v33 }
0x2046   :  { %1520 = vmatpush.msra.mxu1 %v4262_v58  ;;  %1569 = vmatpush.msra.mxu2 %v4137_v36 }
0x2047   :  { %1732 = vmatpush.msra.mxu3 %v4158_v41  ;;  %1644 = vmatpush.msrb.mxu0 %v4177_v14 }
0x2048   :  { %1521 = vmatpush.msra.mxu1 %v4273_v60  ;;  %1570 = vmatpush.msra.mxu2 %v4149_v39 }
0x2049   :  { %1733 = vmatpush.msra.mxu3 %v4205_v46  ;;  %1645 = vmatpush.msrb.mxu0 %v4193_v43 }
0x204a   :  { %1522 = vmatpush.msra.mxu1 %v4282_v61  ;;  %1571 = vmatpush.msra.mxu2 %v4163_v33 }
0x204b   :  { %1646 = vmatpush.msrb.mxu0 %v4210_v47  ;;  %1734 = vmatpush.msra.mxu3 %v4223_v50 }
0x204c   :  { %1523 = vmatpush.msra.mxu1 %v4291_v62  ;;  %1572 = vmatpush.msra.mxu2 %v4177_v14 }
0x204d   :  { %1524 = vmatmul.f32.vlgmr.msra.gmra.mxu1 %v3519_v6  ;;  %1647 = vmatpush.msrb.mxu0 %v4228_v51 }
0x204e   :  { %1660 = vmatpush.msrb.mxu1 %v4158_v41  ;;  %1573 = vmatpush.msra.mxu2 %v4193_v43 }
0x204f   :  { %1735 = vmatpush.msra.mxu3 %v4251_v5  ;;  %1784 = vmatpush.msra.mxu0 %v4119_v31 }
0x2050   :  { %1661 = vmatpush.msrb.mxu1 %v4205_v46  ;;  %1574 = vmatpush.msra.mxu2 %v4210_v47 }
0x2051   :  { %1736 = vmatpush.msra.mxu3 %v4262_v58  ;;  %1785 = vmatpush.msra.mxu0 %v4137_v36 }
0x2052   :  { %1662 = vmatpush.msrb.mxu1 %v4223_v50  ;;  %1575 = vmatpush.msra.mxu2 %v4228_v51 }
0x2053   :  { %1737 = vmatpush.msra.mxu3 %v4273_v60  ;;  %1786 = vmatpush.msra.mxu0 %v4149_v39 }
0x2054   :  { %1663 = vmatpush.msrb.mxu1 %v4251_v5  ;;  %1712 = vmatpush.msrb.mxu2 %v4119_v31 }
0x2055   :  { %1738 = vmatpush.msra.mxu3 %v4282_v61  ;;  %1787 = vmatpush.msra.mxu0 %v4163_v33 }
0x2056   :  { %1664 = vmatpush.msrb.mxu1 %v4262_v58  ;;  %1713 = vmatpush.msrb.mxu2 %v4137_v36 }
0x2057   :  { %1739 = vmatpush.msra.mxu3 %v4291_v62  ;;  %1788 = vmatpush.msra.mxu0 %v4177_v14 }
0x2058   :  { %1665 = vmatpush.msrb.mxu1 %v4273_v60  ;;  %1714 = vmatpush.msrb.mxu2 %v4149_v39 }
0x2059   :  { %1789 = vmatpush.msra.mxu0 %v4193_v43 }
0x205a   :  { %1666 = vmatpush.msrb.mxu1 %v4282_v61  ;;  %1715 = vmatpush.msrb.mxu2 %v4163_v33 }
0x205b   :  { %1790 = vmatpush.msra.mxu0 %v4210_v47 }
0x205c   :  { %1667 = vmatpush.msrb.mxu1 %v4291_v62  ;;  %1716 = vmatpush.msrb.mxu2 %v4177_v14 }
0x205d   :  { %1791 = vmatpush.msra.mxu0 %v4228_v51 }
0x205e   :  { %1804 = vmatpush.msra.mxu1 %v4158_v41  ;;  %1717 = vmatpush.msrb.mxu2 %v4193_v43 }
0x2060   :  { %1805 = vmatpush.msra.mxu1 %v4205_v46  ;;  %1718 = vmatpush.msrb.mxu2 %v4210_v47 }
0x2062   :  { %1806 = vmatpush.msra.mxu1 %v4223_v50  ;;  %1719 = vmatpush.msrb.mxu2 %v4228_v51 }
0x2064   :  { %1807 = vmatpush.msra.mxu1 %v4251_v5 }
0x2066   :  { %1808 = vmatpush.msra.mxu1 %v4262_v58 }
0x2068   :  { %1809 = vmatpush.msra.mxu1 %v4273_v60 }
0x206a   :  { %1810 = vmatpush.msra.mxu1 %v4282_v61 }
0x206c   :  { %1811 = vmatpush.msra.mxu1 %v4291_v62 }
0x209e   :  { %v1182_v24 = vpop.f32.mrf.mxu1 }
0x209f   :  { %v4352_v25 = vpop.f32.mrf.mxu0  ;;  %v1183_v28 = vadd.f32 %v1182_v24, %v1128_v19 }
0x20a4   :  { %v1202_v26 = vpop.f32.mrf.mxu2 }
0x20a5   :  { %v4354_v27 = vpop.f32.mrf.mxu3  ;;  %v1203_v35 = vadd.f32 %v1202_v26, %v1129_v32 }
0x20a6   :  { %v4356_v63 = vpop.f32.mrf.mxu1 }
0x20a7   :  { %v4364_v2 = vpop.f32.mrf.mxu0 }
0x20ac   :  { %v4366_v3 = vpop.f32.mrf.mxu2 }
0x20ad   :  { %v1402_v4 = vpop.f32.mrf.mxu3 }
0x20ae   :  { %v4368_v7 = vadd.f32 %v1402_v4, %v1139_v1 }
0x20af   :  { %v4370_v10 = vpop.f32.mrf.mxu1 }
0x20b1   :  { %v4374_v15 = vpop.f32.mrf.mxu0 }
0x20b5   :  { %v4372_v11 = vpop.f32.mrf.mxu2 }
0x20b6   :  { %v4427_v1 = vpop.f32.mrf.mxu3 }
0x20b8   :  { %v4376_v16 = vpop.f32.mrf.mxu1 }
0x20b9   :  { %v1505_v22 = vpop.f32.mrf.mxu0 }
0x20ba   :  { %v1528_v30 = vadd.f32 %v1505_v22, %v1183_v28 }
0x20bc   :  { %v1530_v34 = vmul.f32 0.5, %v1528_v30 }
0x20bd   :  { %v1382_v20 = vpop.f32.mrf.mxu2 }
0x20be   :  { %v4386_v54 = vadd.f32 %v1382_v20, %v1138_v17  ;;  %3397 = vtanh.f32 %v1530_v34  ;;  %v1130_v17 = vperm.slane %v4381_v53, 2 }
0x20c0   :  { %v1442_v21 = vpop.f32.mrf.mxu1  ;;  %v1223_v19 = vadd.f32 %v4354_v27, %v1130_v17 }
0x20c1   :  { %v4388_v23 = vadd.f32 %v1442_v21, %v1141_v18  ;;  %v1131_v18 = vperm.slane %v4381_v53, 3 }
0x20c3   :  { %v1243_v20 = vadd.f32 %v4356_v63, %v1131_v18 }
0x20c4   :  { %v3398_v12 = vpop.eup %3397 }
0x20c5   :  { %v1534_v44 = vadd.f32 1.0, %v3398_v12  ;;  %v4429_v4 = vpop.f32.mrf.mxu2 }
0x20c7   :  { %v1536_v49 = vmul.f32 0.5, %v1534_v44 }
0x20c9   :  { %v1540_v13 = vmul.f32 0.0, %v1536_v49 }
0x20ca   :  { %v1525_v38 = vpop.f32.mrf.mxu1 }
0x20cb   :  { %v1529_v40 = vadd.f32 %v1525_v38, %v1203_v35 }
0x20cd   :  { %v1531_v55 = vmul.f32 %v1529_v40, %v4398_v37 }
0x20cf   :  { %3399 = vtanh.f32 %v1531_v55 }
0x20d5   :  { %v3400_v42 = vpop.eup %3399 }
0x20d6   :  { %v1535_v45 = vadd.f32 1.0, %v3400_v42 }
0x20d8   :  { %v1537_v48 = vmul.f32 0.5, %v1535_v45 }
0x20da   :  { %v1539_v52 = vsel %vm66_vm5, %v3400_v42, %v1537_v48 }
0x20db   :  { %v1541_v9 = vmul.f32 %v1539_v52, %v1536_v49 }
0x20dd   :  { %1543 = vrot.lane.b32.xlu1 %v1541_v9, %s3521_s4 }
0x214f   :  { %v1544_v56 = vpop.permute.xlu1 %1543 }
0x2150   :  { %v1546_v57 = vadd.f32 %v1544_v56, %v1540_v13  ;;  %v1133_v13 = vperm.slane %v4381_v53, 5  ;;  %v1132_v56 = vperm.slane %v4381_v53, 4 }
0x2152   :  { %3401 = vtanh.f32 %v1546_v57 }
0x2158   :  { %v3402_v59 = vpop.eup %3401 }
0x2159   :  { %v4404_v24 = vmul.f32 %v3402_v59, %v1539_v52  ;;  %v1263_v59 = vadd.f32 %v4366_v3, %v1132_v56 }
0x215b   :  { %1550 = vrot.lane.b32.xlu2 %v4404_v24, %s3521_s4 }
0x21b5   :  { %v1551_v26 = vpop.permute.xlu2 %1550 }
0x21b6   :  { %1553 = vst.msk [vmem:[#allocation4] sm:$0xff] %vm178_vm4, %v1551_v26  ;;  %3242 = vmatmul.msk.f32.vlgmr.msra.gmra.mxu2 %vm1485_vm6, %v1551_v26  ;;  %3243 = vmatmul.msk.f32.vlgmr.msrb.gmra.mxu3 %vm1485_vm6, %v1551_v26 }
0x21b7   :  { %1856 = vmatpush.msra.mxu2 %v4119_v31  ;;  %1876 = vmatpush.msrb.mxu3 %v4158_v41 }
0x21b9   :  { %1857 = vmatpush.msra.mxu2 %v4137_v36  ;;  %1877 = vmatpush.msrb.mxu3 %v4205_v46 }
0x21bb   :  { %1858 = vmatpush.msra.mxu2 %v4149_v39  ;;  %1878 = vmatpush.msrb.mxu3 %v4223_v50 }
0x21bd   :  { %1859 = vmatpush.msra.mxu2 %v4163_v33  ;;  %1879 = vmatpush.msrb.mxu3 %v4251_v5 }
0x21bf   :  { %1860 = vmatpush.msra.mxu2 %v4177_v14  ;;  %1880 = vmatpush.msrb.mxu3 %v4262_v58 }
0x21c1   :  { %1861 = vmatpush.msra.mxu2 %v4193_v43  ;;  %1881 = vmatpush.msrb.mxu3 %v4273_v60 }
0x21c3   :  { %1862 = vmatpush.msra.mxu2 %v4210_v47  ;;  %1882 = vmatpush.msrb.mxu3 %v4282_v61 }
0x21c5   :  { %1863 = vmatpush.msra.mxu2 %v4228_v51  ;;  %1883 = vmatpush.msrb.mxu3 %v4291_v62 }
0x2239   :  { %v1577_v21 = vpop.f32.mrf.mxu2  ;;  %v1597_v22 = vpop.f32.mrf.mxu3 }
0x223a   :  { %v1600_v28 = vadd.f32 %v1577_v21, %v1223_v19  ;;  %v1601_v30 = vadd.f32 %v1597_v22, %v1243_v20 }
0x223c   :  { %v1602_v32 = vmul.f32 0.5, %v1600_v28  ;;  %v1603_v34 = vmul.f32 %v1601_v30, %v4398_v37 }
0x223e   :  { %3403 = vtanh.f32 %v1602_v32 }
0x223f   :  { %3405 = vtanh.f32 %v1603_v34 }
0x2244   :  { %v3404_v35 = vpop.eup %3403 }
0x2245   :  { %v3406_v38 = vpop.eup %3405  ;;  %v1606_v40 = vadd.f32 1.0, %v3404_v35 }
0x2246   :  { %v1607_v55 = vadd.f32 1.0, %v3406_v38 }
0x2247   :  { %v1608_v12 = vmul.f32 0.5, %v1606_v40 }
0x2248   :  { %v1609_v42 = vmul.f32 0.5, %v1607_v55 }
0x2249   :  { %v1612_v63 = vmul.f32 %v1608_v12, %v1546_v57  ;;  %v1283_v57 = vadd.f32 %v4352_v25, %v1133_v13  ;;  %v1137_v13 = vperm.slane %v4361_v0, 1 }
0x224a   :  { %v1611_v27 = vsel %vm66_vm5, %v3406_v38, %v1609_v42 }
0x224b   :  { %v1613_v44 = vmul.f32 %v1611_v27, %v1608_v12 }
0x224d   :  { %1615 = vrot.lane.b32.xlu0 %v1613_v44, %s3521_s4 }
0x22bf   :  { %v1616_v45 = vpop.permute.xlu0 %1615 }
0x22c0   :  { %v1618_v48 = vadd.f32 %v1616_v45, %v1612_v63 }
0x22c2   :  { %3407 = vtanh.f32 %v1618_v48 }
0x22c8   :  { %v3408_v49 = vpop.eup %3407 }
0x22c9   :  { %v4439_v52 = vmul.f32 %v3408_v49, %v1611_v27 }
0x22cb   :  { %1622 = vrot.lane.b32.xlu1 %v4439_v52, %s3521_s4 }
0x233d   :  { %v1623_v9 = vpop.permute.xlu1 %1622 }
0x233e   :  { %1625 = vst.msk [vmem:[#allocation4 + $0x8] sm:$0xff] %vm178_vm4, %v1623_v9  ;;  %3244 = vmatmul.msk.f32.vlgmr.msrb.gmra.mxu0 %vm1485_vm6, %v1623_v9  ;;  %3245 = vmatmul.msk.f32.vlgmr.msrb.gmra.mxu1 %vm1485_vm6, %v1623_v9  ;;  %v1136_v9 = vperm.slane %v4361_v0, 0 }
0x233f   :  { %1928 = vmatpush.msrb.mxu0 %v4119_v31  ;;  %1948 = vmatpush.msrb.mxu1 %v4158_v41 }
0x2340   :  { %v1343_v56 = vadd.f32 %v4364_v2, %v1136_v9 }
0x2341   :  { %1929 = vmatpush.msrb.mxu0 %v4137_v36  ;;  %1949 = vmatpush.msrb.mxu1 %v4205_v46 }
0x2343   :  { %1930 = vmatpush.msrb.mxu0 %v4149_v39  ;;  %1950 = vmatpush.msrb.mxu1 %v4223_v50 }
0x2345   :  { %1931 = vmatpush.msrb.mxu0 %v4163_v33  ;;  %1951 = vmatpush.msrb.mxu1 %v4251_v5 }
0x2347   :  { %1932 = vmatpush.msrb.mxu0 %v4177_v14  ;;  %1952 = vmatpush.msrb.mxu1 %v4262_v58 }
0x2349   :  { %1933 = vmatpush.msrb.mxu0 %v4193_v43  ;;  %1953 = vmatpush.msrb.mxu1 %v4273_v60 }
0x234b   :  { %1934 = vmatpush.msrb.mxu0 %v4210_v47  ;;  %1954 = vmatpush.msrb.mxu1 %v4282_v61 }
0x234d   :  { %1935 = vmatpush.msrb.mxu0 %v4228_v51  ;;  %1955 = vmatpush.msrb.mxu1 %v4291_v62 }
0x23bb   :  { %v1649_v26 = vpop.f32.mrf.mxu0  ;;  %v1669_v17 = vpop.f32.mrf.mxu1 }
0x23bc   :  { %v1672_v18 = vadd.f32 %v1649_v26, %v1263_v59  ;;  %v1673_v19 = vadd.f32 %v1669_v17, %v1283_v57  ;;  %v1363_v57 = vadd.f32 %v4376_v16, %v1137_v13 }
0x23be   :  { %v1674_v20 = vmul.f32 0.5, %v1672_v18  ;;  %v1675_v21 = vmul.f32 %v1673_v19, %v4398_v37 }
0x23c0   :  { %3409 = vtanh.f32 %v1674_v20 }
0x23c1   :  { %3411 = vtanh.f32 %v1675_v21 }
0x23c6   :  { %v3410_v22 = vpop.eup %3409 }
0x23c7   :  { %v3412_v28 = vpop.eup %3411  ;;  %v1678_v30 = vadd.f32 1.0, %v3410_v22 }
0x23c8   :  { %v1679_v32 = vadd.f32 1.0, %v3412_v28 }
0x23c9   :  { %v1680_v34 = vmul.f32 0.5, %v1678_v30 }
0x23ca   :  { %v1681_v35 = vmul.f32 0.5, %v1679_v32 }
0x23cb   :  { %v1684_v3 = vmul.f32 %v1680_v34, %v1618_v48 }
0x23cc   :  { %v1683_v25 = vsel %vm66_vm5, %v3412_v28, %v1681_v35 }
0x23cd   :  { %v1685_v38 = vmul.f32 %v1683_v25, %v1680_v34 }
0x23cf   :  { %1687 = vrot.lane.b32.xlu2 %v1685_v38, %s3521_s4 }
0x2429   :  { %v1688_v40 = vpop.permute.xlu2 %1687 }
0x242a   :  { %v1690_v55 = vadd.f32 %v1688_v40, %v1684_v3 }
0x242c   :  { %3413 = vtanh.f32 %v1690_v55 }
0x2432   :  { %v3414_v12 = vpop.eup %3413 }
0x2433   :  { %v4470_v42 = vmul.f32 %v3414_v12, %v1683_v25 }
0x2435   :  { %1694 = vrot.lane.b32.xlu0 %v4470_v42, %s3521_s4 }
0x24a7   :  { %v1695_v27 = vpop.permute.xlu0 %1694 }
0x24a8   :  { %1697 = vst.msk [vmem:[#allocation4 + $0x10] sm:$0xff] %vm178_vm4, %v1695_v27  ;;  %3246 = vmatmul.msk.f32.vlgmr.msrb.gmra.mxu2 %vm1485_vm6, %v1695_v27  ;;  %3247 = vmatmul.msk.f32.vlgmr.msra.gmra.mxu3 %vm1485_vm6, %v1695_v27 }
0x24a9   :  { %2000 = vmatpush.msrb.mxu2 %v4119_v31  ;;  %2020 = vmatpush.msra.mxu3 %v4158_v41  ;;  %v1134_v31 = vperm.slane %v4381_v53, 6 }
0x24ab   :  { %2001 = vmatpush.msrb.mxu2 %v4137_v36  ;;  %2021 = vmatpush.msra.mxu3 %v4205_v46  ;;  %v1135_v36 = vperm.slane %v4381_v53, 7 }
0x24ad   :  { %2002 = vmatpush.msrb.mxu2 %v4149_v39  ;;  %2022 = vmatpush.msra.mxu3 %v4223_v50  ;;  %v1303_v39 = vadd.f32 %v4370_v10, %v1134_v31  ;;  %v1323_v41 = vadd.f32 %v4372_v11, %v1135_v36 }
0x24af   :  { %2003 = vmatpush.msrb.mxu2 %v4163_v33  ;;  %2023 = vmatpush.msra.mxu3 %v4251_v5 }
0x24b1   :  { %2004 = vmatpush.msrb.mxu2 %v4177_v14  ;;  %2024 = vmatpush.msra.mxu3 %v4262_v58 }
0x24b3   :  { %2005 = vmatpush.msrb.mxu2 %v4193_v43  ;;  %2025 = vmatpush.msra.mxu3 %v4273_v60 }
0x24b5   :  { %2006 = vmatpush.msrb.mxu2 %v4210_v47  ;;  %2026 = vmatpush.msra.mxu3 %v4282_v61 }
0x24b7   :  { %2007 = vmatpush.msrb.mxu2 %v4228_v51  ;;  %2027 = vmatpush.msra.mxu3 %v4291_v62 }
0x252b   :  { %v1721_v33 = vpop.f32.mrf.mxu2  ;;  %v1741_v14 = vpop.f32.mrf.mxu3 }
0x252c   :  { %v1744_v43 = vadd.f32 %v1721_v33, %v1303_v39  ;;  %v1745_v46 = vadd.f32 %v1741_v14, %v1323_v41 }
0x252e   :  { %v1746_v50 = vmul.f32 0.5, %v1744_v43  ;;  %v1747_v47 = vmul.f32 %v1745_v46, %v4398_v37 }
0x2530   :  { %3415 = vtanh.f32 %v1746_v50 }
0x2531   :  { %3417 = vtanh.f32 %v1747_v47 }
0x2536   :  { %v3416_v51 = vpop.eup %3415 }
0x2537   :  { %v3418_v5 = vpop.eup %3417  ;;  %v1750_v58 = vadd.f32 1.0, %v3416_v51 }
0x2538   :  { %v1751_v60 = vadd.f32 1.0, %v3418_v5 }
0x2539   :  { %v1752_v61 = vmul.f32 0.5, %v1750_v58 }
0x253a   :  { %v1753_v62 = vmul.f32 0.5, %v1751_v60 }
0x253b   :  { %v1756_v11 = vmul.f32 %v1752_v61, %v1690_v55 }
0x253c   :  { %v1755_v10 = vsel %vm66_vm5, %v3418_v5, %v1753_v62 }
0x253d   :  { %v1757_v53 = vmul.f32 %v1755_v10, %v1752_v61 }
0x253f   :  { %1759 = vrot.lane.b32.xlu1 %v1757_v53, %s3521_s4 }
0x25b1   :  { %v1760_v44 = vpop.permute.xlu1 %1759 }
0x25b2   :  { %v1762_v63 = vadd.f32 %v1760_v44, %v1756_v11 }
0x25b4   :  { %3419 = vtanh.f32 %v1762_v63 }
0x25ba   :  { %v3420_v45 = vpop.eup %3419 }
0x25bb   :  { %v4501_v48 = vmul.f32 %v3420_v45, %v1755_v10  ;;  %v1140_v10 = vperm.slane %v4361_v0, 4 }
0x25bd   :  { %1766 = vrot.lane.b32.xlu2 %v4501_v48, %s3521_s4  ;;  %v1423_v53 = vadd.f32 %v4374_v15, %v1140_v10 }
0x2617   :  { %v1767_v49 = vpop.permute.xlu2 %1766 }
0x2618   :  { %1769 = vst.msk [vmem:[#allocation4 + $0x18] sm:$0xff] %vm178_vm4, %v1767_v49  ;;  %3248 = vmatmul.msk.f32.vlgmr.msra.gmra.mxu0 %vm1485_vm6, %v1767_v49  ;;  %3249 = vmatmul.msk.f32.vlgmr.msra.gmra.mxu1 %vm1485_vm6, %v1767_v49 }
0x2695   :  { %v1793_v59 = vpop.f32.mrf.mxu0  ;;  %v1813_v26 = vpop.f32.mrf.mxu1 }
0x2696   :  { %v1816_v17 = vadd.f32 %v1793_v59, %v1343_v56  ;;  %v1817_v18 = vadd.f32 %v1813_v26, %v1363_v57 }
0x2698   :  { %v1818_v19 = vmul.f32 0.5, %v1816_v17  ;;  %v1819_v20 = vmul.f32 %v1817_v18, %v4398_v37 }
0x269a   :  { %3421 = vtanh.f32 %v1818_v19 }
0x269b   :  { %3423 = vtanh.f32 %v1819_v20 }
0x26a0   :  { %v3422_v21 = vpop.eup %3421 }
0x26a1   :  { %v3424_v22 = vpop.eup %3423  ;;  %v1822_v28 = vadd.f32 1.0, %v3422_v21 }
0x26a2   :  { %v1823_v30 = vadd.f32 1.0, %v3424_v22 }
0x26a3   :  { %v1824_v32 = vmul.f32 0.5, %v1822_v28 }
0x26a4   :  { %v1825_v34 = vmul.f32 0.5, %v1823_v30  ;;  %v2077_v30 = vld [vmem:[%s5384_s11 + $0x78] sm:$0xff] }
0x26a5   :  { %v1828_v16 = vmul.f32 %v1824_v32, %v1762_v63  ;;  %2188 = vmatpush.msra.mxu1 %v2077_v30 }
0x26a6   :  { %v1827_v2 = vsel %vm66_vm5, %v3424_v22, %v1825_v34  ;;  %v2075_v34 = vld [vmem:[%s5384_s11 + $0x68] sm:$0xff] }
0x26a7   :  { %v1829_v35 = vmul.f32 %v1827_v2, %v1824_v32  ;;  %v2069_v32 = vld [vmem:[%s5384_s11 + $0x38] sm:$0xff]  ;;  %2189 = vmatpush.msra.mxu1 %v2075_v34 }
0x26a9   :  { %1831 = vrot.lane.b32.xlu0 %v1829_v35, %s3521_s4  ;;  %v2065_v35 = vld [vmem:[%s5384_s11 + $0x18] sm:$0xff] }
0x271b   :  { %v1832_v25 = vpop.permute.xlu0 %1831 }
0x271c   :  { %v1834_v38 = vadd.f32 %v1832_v25, %v1828_v16  ;;  %v2071_v16 = vld [vmem:[%s5384_s11 + $0x48] sm:$0xff] }
0x271d   :  { %v2063_v25 = vld [vmem:[%s5384_s11 + $0x8] sm:$0xff] }
0x271e   :  { %3425 = vtanh.f32 %v1834_v38 }
0x2724   :  { %v3426_v3 = vpop.eup %3425 }
0x2725   :  { %v4516_v40 = vmul.f32 %v3426_v3, %v1827_v2  ;;  %v2073_v2 = vld [vmem:[%s5384_s11 + $0x58] sm:$0xff] }
0x2726   :  { %2190 = vmatpush.msra.mxu1 %v2073_v2 }
0x2727   :  { %1838 = vrot.lane.b32.xlu1 %v4516_v40, %s3521_s4 }
0x2728   :  { %2191 = vmatpush.msra.mxu1 %v2071_v16 }
0x2799   :  { %v1839_v55 = vpop.permute.xlu1 %1838 }
0x279a   :  { %1841 = vst.msk [vmem:[#allocation4 + $0x20] sm:$0xff] %vm178_vm4, %v1839_v55  ;;  %3250 = vmatmul.msk.f32.vlgmr.msra.gmra.mxu2 %vm1485_vm6, %v1839_v55  ;;  %3251 = vmatmul.msk.f32.vlgmr.msrb.gmra.mxu3 %vm1485_vm6, %v1839_v55 }
0x279b   :  { %3319 = vmatpush.msra.mxu2 %v2077_v30  ;;  %2294 = vmatpush.msrb.mxu3 %v2069_v32  ;;  %v2070_v30 = vld [vmem:[%s5384_s11 + $0x40] sm:$0xff]  ;;  %v4697_v32 = vld [vmem:[%s5386_s13 + $0x70] sm:$0xff] }
0x279d   :  { %3320 = vmatpush.msra.mxu2 %v2075_v34  ;;  %v4706_v34 = vld [vmem:[%s5386_s13 + $0x60] sm:$0xff] }
0x279f   :  { %3321 = vmatpush.msra.mxu2 %v2073_v2  ;;  %v4718_v2 = vld [vmem:[%s5386_s13 + $0x78] sm:$0xff] }
0x27a1   :  { %3322 = vmatpush.msra.mxu2 %v2071_v16 }
0x281d   :  { %v1865_v12 = vpop.f32.mrf.mxu2  ;;  %v1885_v27 = vpop.f32.mrf.mxu3 }
0x281e   :  { %v1888_v31 = vadd.f32 %v1865_v12, %v4386_v54  ;;  %v1889_v36 = vadd.f32 %v1885_v27, %v4368_v7  ;;  %v4586_v12 = vld [vmem:[#allocation4] sm:$0xff] }
0x2820   :  { %v1890_v39 = vmul.f32 0.5, %v1888_v31  ;;  %v1891_v41 = vmul.f32 %v1889_v36, %v4398_v37  ;;  %v4595_v31 = vld [vmem:[#allocation4 + $0x8] sm:$0xff]  ;;  %v4601_v36 = vld [vmem:[#allocation4 + $0x10] sm:$0xff] }
0x2822   :  { %3427 = vtanh.f32 %v1890_v39  ;;  %v4605_v39 = vld [vmem:[#allocation4 + $0x18] sm:$0xff] }
0x2823   :  { %3429 = vtanh.f32 %v1891_v41  ;;  %v4609_v41 = vld [vmem:[#allocation4 + $0x20] sm:$0xff] }
0x2828   :  { %v3428_v33 = vpop.eup %3427 }
0x2829   :  { %v3430_v14 = vpop.eup %3429  ;;  %v1894_v43 = vadd.f32 1.0, %v3428_v33 }
0x282a   :  { %v1895_v46 = vadd.f32 1.0, %v3430_v14 }
0x282b   :  { %v1896_v50 = vmul.f32 0.5, %v1894_v43  ;;  %v1143_v43 = vperm.slane %v4361_v0, 7 }
0x282c   :  { %v1897_v47 = vmul.f32 0.5, %v1895_v46  ;;  %v1142_v46 = vperm.slane %v4361_v0, 6 }
0x282d   :  { %v1900_v54 = vmul.f32 %v1896_v50, %v1834_v38 }
0x282e   :  { %v1899_v51 = vsel %vm66_vm5, %v3430_v14, %v1897_v47  ;;  %v1463_v47 = vadd.f32 %v4429_v4, %v1142_v46  ;;  %v4800_v46 = vld [vmem:[%s5386_s13 + $0x20] sm:$0xff] }
0x282f   :  { %v1901_v5 = vmul.f32 %v1899_v51, %v1896_v50  ;;  %v1483_v50 = vadd.f32 %v4427_v1, %v1143_v43 }
0x2831   :  { %1903 = vrot.lane.b32.xlu2 %v1901_v5, %s3521_s4 }
0x288b   :  { %v1904_v58 = vpop.permute.xlu2 %1903 }
0x288c   :  { %v1906_v7 = vadd.f32 %v1904_v58, %v1900_v54 }
0x288e   :  { %3431 = vtanh.f32 %v1906_v7 }
0x2894   :  { %v3432_v60 = vpop.eup %3431 }
0x2895   :  { %v1908_v61 = vmul.f32 %v3432_v60, %v1899_v51 }
0x2897   :  { %1910 = vrot.lane.b32.xlu0 %v1908_v61, %s3521_s4 }
0x2909   :  { %v1911_v62 = vpop.permute.xlu0 %1910 }
0x290a   :  { %1913 = vst.msk [vmem:[#allocation4 + $0x28] sm:$0xff] %vm178_vm4, %v1911_v62  ;;  %3252 = vmatmul.msk.f32.vlgmr.msrb.gmra.mxu0 %vm1485_vm6, %v1911_v62  ;;  %3253 = vmatmul.msk.f32.vlgmr.msrb.gmra.mxu1 %vm1485_vm6, %v1911_v62 }
0x290b   :  { %2374 = vmatpush.msrb.mxu1 %v4718_v2 }
0x2911   :  { %v4613_v33 = vld [vmem:[#allocation4 + $0x28] sm:$0xff] }
0x2987   :  { %v1937_v11 = vpop.f32.mrf.mxu0  ;;  %v1957_v44 = vpop.f32.mrf.mxu1 }
0x2988   :  { %v1960_v63 = vadd.f32 %v1937_v11, %v1423_v53  ;;  %v1961_v45 = vadd.f32 %v1957_v44, %v4388_v23 }
0x298a   :  { %v1962_v49 = vmul.f32 0.5, %v1960_v63  ;;  %v1963_v9 = vmul.f32 %v1961_v45, %v4398_v37 }
0x298c   :  { %3433 = vtanh.f32 %v1962_v49 }
0x298d   :  { %3435 = vtanh.f32 %v1963_v9 }
0x2992   :  { %v3434_v13 = vpop.eup %3433 }
0x2993   :  { %v3436_v56 = vpop.eup %3435  ;;  %v1966_v57 = vadd.f32 1.0, %v3434_v13 }
0x2994   :  { %v1967_v59 = vadd.f32 1.0, %v3436_v56 }
0x2995   :  { %v1968_v26 = vmul.f32 0.5, %v1966_v57  ;;  %v2068_v57 = vld [vmem:[%s5384_s11 + $0x30] sm:$0xff] }
0x2996   :  { %v1969_v17 = vmul.f32 0.5, %v1967_v59  ;;  %v2066_v59 = vld [vmem:[%s5384_s11 + $0x20] sm:$0xff] }
0x2997   :  { %v1972_v23 = vmul.f32 %v1968_v26, %v1906_v7 }
0x2998   :  { %v1971_v18 = vsel %vm66_vm5, %v3436_v56, %v1969_v17 }
0x2999   :  { %v1973_v15 = vmul.f32 %v1971_v18, %v1968_v26  ;;  %v2062_v26 = vld [vmem:[%s5384_s11] sm:$0xff] }
0x299b   :  { %1975 = vrot.lane.b32.xlu1 %v1973_v15, %s3521_s4 }
0x29a3   :  { %1770 = vrot.lane.b32.xlu1 %v4501_v48, %s3522_s22 }
0x29ab   :  { %1554 = vrot.lane.b32.xlu1 %v4404_v24, %s3522_s22 }
0x29b3   :  { %1914 = vrot.lane.b32.xlu1 %v1908_v61, %s3522_s22 }
0x2a0d   :  { %v1976_v19 = vpop.permute.xlu1 %1975 }
0x2a0e   :  { %v4545_v20 = vadd.f32 %v1976_v19, %v1972_v23 }
0x2a10   :  { %3437 = vtanh.f32 %v4545_v20 }
0x2a15   :  { %v1771_v21 = vpop.permute.xlu1 %1770 }
0x2a16   :  { %v3438_v22 = vpop.eup %3437  ;;  %1773 = vst.msk [vmem:[#allocation6 + $0x20] sm:$0xff] %vm178_vm4, %v1771_v21 }
0x2a17   :  { %v4549_v28 = vmul.f32 %v3438_v22, %v1971_v18 }
0x2a19   :  { %1982 = vrot.lane.b32.xlu2 %v4549_v28, %s3521_s4 }
0x2a1d   :  { %v1555_v48 = vpop.permute.xlu1 %1554  ;;  %v4584_v55 = vld [vmem:[#allocation6 + $0x20] sm:$0xff] }
0x2a1e   :  { %1557 = vst.msk [vmem:[#allocation6 + $0x38] sm:$0xff] %vm178_vm4, %v1555_v48  ;;  %v2074_v48 = vld [vmem:[%s5384_s11 + $0x60] sm:$0xff] }
0x2a21   :  { %1698 = vrot.lane.b32.xlu2 %v4470_v42, %s3522_s22  ;;  %v2067_v42 = vld [vmem:[%s5384_s11 + $0x28] sm:$0xff] }
0x2a22   :  { %2295 = vmatpush.msrb.mxu3 %v2067_v42  ;;  %v4713_v42 = vld [vmem:[%s5386_s13 + $0x50] sm:$0xff] }
0x2a24   :  { %2296 = vmatpush.msrb.mxu3 %v2065_v35  ;;  %v4723_v35 = vld [vmem:[%s5386_s13 + $0x68] sm:$0xff] }
0x2a25   :  { %v1915_v24 = vpop.permute.xlu1 %1914  ;;  %2375 = vmatpush.msrb.mxu1 %v4723_v35 }
0x2a26   :  { %1917 = vst.msk [vmem:[#allocation6 + $0x10] sm:$0xff] %vm178_vm4, %v1915_v24  ;;  %2297 = vmatpush.msrb.mxu3 %v2063_v25  ;;  %v2072_v24 = vld [vmem:[%s5384_s11 + $0x50] sm:$0xff]  ;;  %v4735_v25 = vld [vmem:[%s5386_s13 + $0x58] sm:$0xff] }
0x2a27   :  { %2376 = vmatpush.msrb.mxu1 %v4735_v25 }
0x2a73   :  { %v1983_v38 = vpop.permute.xlu2 %1982 }
0x2a74   :  { %1985 = vst.msk [vmem:[#allocation4 + $0x30] sm:$0xff] %vm178_vm4, %v1983_v38  ;;  %3254 = vmatmul.msk.f32.vlgmr.msrb.gmra.mxu2 %vm1485_vm6, %v1983_v38  ;;  %3255 = vmatmul.msk.f32.vlgmr.msra.gmra.mxu3 %vm1485_vm6, %v1983_v38  ;;  %v4740_v38 = vld [vmem:[%s5386_s13 + $0x40] sm:$0xff] }
0x2a75   :  { %2253 = vmatpush.msrb.mxu2 %v2068_v57  ;;  %2448 = vmatpush.msra.mxu3 %v4718_v2 }
0x2a77   :  { %2254 = vmatpush.msrb.mxu2 %v2066_v59  ;;  %2449 = vmatpush.msra.mxu3 %v4723_v35 }
0x2a79   :  { %2450 = vmatpush.msra.mxu3 %v4735_v25 }
0x2a7b   :  { %v1699_v3 = vpop.permute.xlu2 %1698  ;;  %v4617_v14 = vld [vmem:[#allocation4 + $0x30] sm:$0xff] }
0x2a7c   :  { %1701 = vst.msk [vmem:[#allocation6 + $0x28] sm:$0xff] %vm178_vm4, %v1699_v3  ;;  %3268 = vmatmul.msk.f32.vlgmr.msra.gmra.mxu2 %vm178_vm4, %v4584_v55  ;;  %3280 = vmatmul.msk.f32.vlgmr.msrb.gmra.mxu3 %vm178_vm4, %v4586_v12  ;;  %v4746_v3 = vld [vmem:[%s5386_s13 + $0x48] sm:$0xff] }
0x2a7d   :  { %2377 = vmatpush.msrb.mxu1 %v4746_v3  ;;  %2451 = vmatpush.msra.mxu3 %v4746_v3 }
0x2a83   :  { %v4593_v27 = vld [vmem:[#allocation6 + $0x28] sm:$0xff] }
0x2a84   :  { %3269 = vmatmul.msk.f32.gmra.mxu2 %vm178_vm4, %v4593_v27  ;;  %3281 = vmatmul.msk.f32.gmra.mxu3 %vm178_vm4, %v4595_v31 }
0x2a8c   :  { %3282 = vmatmul.msk.f32.gmra.mxu3 %vm178_vm4, %v4601_v36 }
0x2a94   :  { %3283 = vmatmul.msk.f32.gmra.mxu3 %vm178_vm4, %v4605_v39 }
0x2a9c   :  { %3284 = vmatmul.msk.f32.gmra.mxu3 %vm178_vm4, %v4609_v41 }
0x2aa4   :  { %3285 = vmatmul.msk.f32.gmra.mxu3 %vm178_vm4, %v4613_v33 }
0x2aac   :  { %3286 = vmatmul.msk.f32.gmra.mxu3 %vm178_vm4, %v4617_v14 }
0x2af7   :  { %v2009_v51 = vpop.f32.mrf.mxu2  ;;  %v2029_v5 = vpop.f32.mrf.mxu3 }
0x2af8   :  { %v2032_v54 = vadd.f32 %v2009_v51, %v1463_v47  ;;  %v2033_v58 = vadd.f32 %v2029_v5, %v1483_v50  ;;  %v2105_v47 = vld [vmem:[#allocation6 + $0x10] sm:$0xff] }
0x2af9   :  { %v4816_v51 = vld [vmem:[%s5386_s13 + $0x10] sm:$0xff] }
0x2afa   :  { %v2034_v7 = vmul.f32 0.5, %v2032_v54  ;;  %v2035_v60 = vmul.f32 %v2033_v58, %v4398_v37  ;;  %v4831_v58 = vld [vmem:[%s5386_s13] sm:$0xff] }
0x2afc   :  { %3439 = vtanh.f32 %v2034_v7 }
0x2afd   :  { %3441 = vtanh.f32 %v2035_v60 }
0x2aff   :  { %v4626_v61 = vpop.f32.mrf.mxu3  ;;  %v2205_v9 = vpop.f32.mrf.mxu2 }
0x2b02   :  { %v3440_v62 = vpop.eup %3439 }
0x2b03   :  { %v3442_v10 = vpop.eup %3441  ;;  %v2038_v53 = vadd.f32 1.0, %v3440_v62 }
0x2b04   :  { %v2039_v11 = vadd.f32 1.0, %v3442_v10 }
0x2b05   :  { %v2040_v0 = vmul.f32 0.5, %v2038_v53 }
0x2b06   :  { %v2041_v44 = vmul.f32 0.5, %v2039_v11  ;;  %v2078_v11 = vld [vmem:[%s5385_s12] sm:$0x3] }
0x2b07   :  { %v4628_v1 = vpop.f32.mrf.mxu3  ;;  %v2044_v17 = vmul.f32 %v2040_v0, %v4545_v20  ;;  %v4666_v20 = vld [vmem:[#allocation6 + $0x38] sm:$0xff]  ;;  %v4890_v57 = vperm.slane %v2078_v11, 0 }
0x2b08   :  { %v2043_v4 = vsel %vm66_vm5, %v3442_v10, %v2041_v44 }
0x2b09   :  { %v2045_v63 = vmul.f32 %v2043_v4, %v2040_v0 }
0x2b0b   :  { %2047 = vrot.lane.b32.xlu0 %v2045_v63, %s3521_s4 }
0x2b0f   :  { %v4633_v45 = vpop.f32.mrf.mxu3 }
0x2b13   :  { %1626 = vrot.lane.b32.xlu0 %v4439_v52, %s3522_s22  ;;  %v2064_v52 = vld [vmem:[%s5384_s11 + $0x10] sm:$0xff] }
0x2b14   :  { %2255 = vmatpush.msrb.mxu2 %v2064_v52 }
0x2b16   :  { %2256 = vmatpush.msrb.mxu2 %v2062_v26 }
0x2b17   :  { %v4637_v49 = vpop.f32.mrf.mxu3 }
0x2b18   :  { %2428 = vmatpush.msra.mxu2 %v4697_v32 }
0x2b1a   :  { %2429 = vmatpush.msra.mxu2 %v4706_v34 }
0x2b1b   :  { %1986 = vrot.lane.b32.xlu0 %v4549_v28, %s3522_s22 }
0x2b1c   :  { %2430 = vmatpush.msra.mxu2 %v4713_v42 }
0x2b1e   :  { %2431 = vmatpush.msra.mxu2 %v4740_v38 }
0x2b1f   :  { %v2311_v13 = vpop.f32.mrf.mxu3 }
0x2b20   :  { %v4641_v56 = vadd.f32 %v2311_v13, %v2205_v9  ;;  %v2325_v13 = vperm.slane %v2078_v11, 1 }
0x2b27   :  { %v2314_v60 = vpop.f32.mrf.mxu3 }
0x2b2f   :  { %v2317_v0 = vpop.f32.mrf.mxu3 }
0x2b7d   :  { %v2048_v18 = vpop.permute.xlu0 %2047 }
0x2b7e   :  { %v2050_v15 = vadd.f32 %v2048_v18, %v2044_v17 }
0x2b80   :  { %3443 = vtanh.f32 %v2050_v15 }
0x2b85   :  { %v1627_v23 = vpop.permute.xlu0 %1626 }
0x2b86   :  { %v3444_v19 = vpop.eup %3443  ;;  %1629 = vst.msk [vmem:[#allocation6 + $0x30] sm:$0xff] %vm178_vm4, %v1627_v23 }
0x2b87   :  { %v2052_v21 = vmul.f32 %v3444_v19, %v2043_v4 }
0x2b89   :  { %2054 = vrot.lane.b32.xlu0 %v2052_v21, %s3521_s4  ;;  %2058 = vrot.lane.b32.xlu2 %v2052_v21, %s3522_s22 }
0x2b8d   :  { %v1987_v22 = vpop.permute.xlu0 %1986  ;;  %v4659_v28 = vld [vmem:[#allocation6 + $0x30] sm:$0xff] }
0x2b8e   :  { %1989 = vst.msk [vmem:[#allocation6 + $0x8] sm:$0xff] %vm178_vm4, %v1987_v22  ;;  %3270 = vmatmul.msk.f32.gmra.mxu2 %vm178_vm4, %v4659_v28 }
0x2b91   :  { %1842 = vrot.lane.b32.xlu2 %v4516_v40, %s3522_s22  ;;  %v2076_v40 = vld [vmem:[%s5384_s11 + $0x70] sm:$0xff] }
0x2b92   :  { %2147 = vmatpush.msra.mxu0 %v2076_v40 }
0x2b94   :  { %2148 = vmatpush.msra.mxu0 %v2074_v48 }
0x2b95   :  { %v2104_v43 = vld [vmem:[#allocation6 + $0x8] sm:$0xff] }
0x2b96   :  { %3271 = vmatmul.msk.f32.gmra.mxu2 %vm178_vm4, %v4666_v20  ;;  %2149 = vmatpush.msra.mxu0 %v2072_v24 }
0x2b98   :  { %2150 = vmatpush.msra.mxu0 %v2070_v30 }
0x2b9a   :  { %2354 = vmatpush.msrb.mxu0 %v4697_v32 }
0x2b9c   :  { %2355 = vmatpush.msrb.mxu0 %v4706_v34 }
0x2b9e   :  { %3272 = vmatmul.msk.f32.vlgmr.msrb.gmra.mxu2 %vm178_vm4, %v4586_v12  ;;  %2356 = vmatpush.msrb.mxu0 %v4713_v42  ;;  %v4753_v12 = vld [vmem:[%s5386_s13 + $0x38] sm:$0xff] }
0x2b9f   :  { %2378 = vmatpush.msrb.mxu1 %v4753_v12  ;;  %2452 = vmatpush.msra.mxu3 %v4753_v12 }
0x2ba0   :  { %2357 = vmatpush.msrb.mxu0 %v4740_v38 }
0x2ba6   :  { %3273 = vmatmul.msk.f32.gmra.mxu2 %vm178_vm4, %v4595_v31  ;;  %v4761_v31 = vld [vmem:[%s5386_s13 + $0x28] sm:$0xff] }
0x2ba7   :  { %2379 = vmatpush.msrb.mxu1 %v4761_v31  ;;  %2453 = vmatpush.msra.mxu3 %v4761_v31 }
0x2bae   :  { %3274 = vmatmul.msk.f32.gmra.mxu2 %vm178_vm4, %v4601_v36 }
0x2bb6   :  { %3275 = vmatmul.msk.f32.gmra.mxu2 %vm178_vm4, %v4605_v39 }
0x2bbe   :  { %3276 = vmatmul.msk.f32.gmra.mxu2 %vm178_vm4, %v4609_v41  ;;  %v4773_v41 = vld [vmem:[%s5386_s13 + $0x30] sm:$0xff] }
0x2bbf   :  { %2358 = vmatpush.msrb.mxu0 %v4773_v41  ;;  %2432 = vmatpush.msra.mxu2 %v4773_v41 }
0x2bc1   :  { %2359 = vmatpush.msrb.mxu0 %v4800_v46  ;;  %2433 = vmatpush.msra.mxu2 %v4800_v46 }
0x2bc3   :  { %2360 = vmatpush.msrb.mxu0 %v4816_v51  ;;  %2434 = vmatpush.msra.mxu2 %v4816_v51 }
0x2bc5   :  { %2361 = vmatpush.msrb.mxu0 %v4831_v58  ;;  %2435 = vmatpush.msra.mxu2 %v4831_v58 }
0x2bc6   :  { %3277 = vmatmul.msk.f32.gmra.mxu2 %vm178_vm4, %v4613_v33  ;;  %v4778_v33 = vld [vmem:[%s5386_s13 + $0x18] sm:$0xff] }
0x2bc7   :  { %2380 = vmatpush.msrb.mxu1 %v4778_v33  ;;  %2454 = vmatpush.msra.mxu3 %v4778_v33 }
0x2bc8   :  { %2576 = vmatpush.msrb.mxu2 %v4697_v32 }
0x2bca   :  { %2577 = vmatpush.msrb.mxu2 %v4706_v34 }
0x2bcc   :  { %2578 = vmatpush.msrb.mxu2 %v4713_v42 }
0x2bce   :  { %3278 = vmatmul.msk.f32.gmra.mxu2 %vm178_vm4, %v4617_v14  ;;  %v4783_v14 = vld [vmem:[%s5386_s13 + $0x8] sm:$0xff] }
0x2bcf   :  { %2381 = vmatpush.msrb.mxu1 %v4783_v14  ;;  %2455 = vmatpush.msra.mxu3 %v4783_v14 }
0x2bd0   :  { %2579 = vmatpush.msrb.mxu2 %v4740_v38 }
0x2bd1   :  { %2596 = vmatpush.msrb.mxu3 %v4718_v2 }
0x2bd2   :  { %2580 = vmatpush.msrb.mxu2 %v4773_v41 }
0x2bd3   :  { %2597 = vmatpush.msrb.mxu3 %v4723_v35 }
0x2bd4   :  { %2581 = vmatpush.msrb.mxu2 %v4800_v46 }
0x2bd5   :  { %2598 = vmatpush.msrb.mxu3 %v4735_v25 }
0x2bd6   :  { %2582 = vmatpush.msrb.mxu2 %v4816_v51 }
0x2bd7   :  { %2599 = vmatpush.msrb.mxu3 %v4746_v3 }
0x2bd8   :  { %2583 = vmatpush.msrb.mxu2 %v4831_v58 }
0x2bd9   :  { %2600 = vmatpush.msrb.mxu3 %v4753_v12 }
0x2bdb   :  { %2601 = vmatpush.msrb.mxu3 %v4761_v31 }
0x2bdd   :  { %2602 = vmatpush.msrb.mxu3 %v4778_v33 }
0x2bdf   :  { %2603 = vmatpush.msrb.mxu3 %v4783_v14 }
0x2be3   :  { %v2059_v16 = vpop.permute.xlu2 %2058 }
0x2be4   :  { %2061 = vst.msk [vmem:[#allocation6] sm:$0xff] %vm178_vm4, %v2059_v16 }
0x2beb   :  { %v1843_v36 = vpop.permute.xlu2 %1842  ;;  %v2103_v39 = vld [vmem:[#allocation6] sm:$0xff] }
0x2bec   :  { %1845 = vst.msk [vmem:[#allocation6 + $0x18] sm:$0xff] %vm178_vm4, %v1843_v36  ;;  %3256 = vmatmul.msk.f32.vlgmr.msra.gmra.mxu0 %vm178_vm4, %v2103_v39  ;;  %3264 = vmatmul.msk.f32.vlgmr.msra.gmra.mxu1 %vm178_vm4, %v2103_v39 }
0x2bed   :  { %2522 = vmatpush.msra.mxu1 %v4718_v2  ;;  %2502 = vmatpush.msra.mxu0 %v4697_v32 }
0x2bef   :  { %2523 = vmatpush.msra.mxu1 %v4723_v35  ;;  %2503 = vmatpush.msra.mxu0 %v4706_v34 }
0x2bf1   :  { %2524 = vmatpush.msra.mxu1 %v4735_v25  ;;  %2504 = vmatpush.msra.mxu0 %v4713_v42 }
0x2bf3   :  { %2525 = vmatpush.msra.mxu1 %v4746_v3  ;;  %v2106_v5 = vld [vmem:[#allocation6 + $0x18] sm:$0xff]  ;;  %2505 = vmatpush.msra.mxu0 %v4740_v38 }
0x2bf4   :  { %3257 = vmatmul.msk.f32.gmra.mxu0 %vm178_vm4, %v2104_v43  ;;  %3265 = vmatmul.msk.f32.gmra.mxu1 %vm178_vm4, %v2104_v43 }
0x2bf5   :  { %2526 = vmatpush.msra.mxu1 %v4753_v12  ;;  %2506 = vmatpush.msra.mxu0 %v4773_v41 }
0x2bf7   :  { %2527 = vmatpush.msra.mxu1 %v4761_v31  ;;  %2507 = vmatpush.msra.mxu0 %v4800_v46 }
0x2bf9   :  { %2528 = vmatpush.msra.mxu1 %v4778_v33  ;;  %2508 = vmatpush.msra.mxu0 %v4816_v51 }
0x2bfb   :  { %v2055_v50 = vpop.permute.xlu0 %2054  ;;  %2529 = vmatpush.msra.mxu1 %v4783_v14  ;;  %2509 = vmatpush.msra.mxu0 %v4831_v58 }
0x2bfc   :  { %2057 = vst.msk [vmem:[#allocation4 + $0x38] sm:$0xff] %vm178_vm4, %v2055_v50  ;;  %3258 = vmatmul.msk.f32.gmra.mxu0 %vm178_vm4, %v2105_v47  ;;  %3266 = vmatmul.msk.f32.gmra.mxu1 %vm178_vm4, %v2105_v47  ;;  %v4930_v47 = vadd.f32 %v2325_v13, %v4641_v56 }
0x2c03   :  { %v2102_v54 = vld [vmem:[#allocation4 + $0x38] sm:$0xff] }
0x2c04   :  { %3259 = vmatmul.msk.f32.gmra.mxu0 %vm178_vm4, %v2106_v5  ;;  %3267 = vmatmul.msk.f32.gmra.mxu1 %vm178_vm4, %v2106_v5 }
0x2c05   :  { %3279 = vmatmul.msk.f32.gmra.mxu2 %vm178_vm4, %v2102_v54  ;;  %3287 = vmatmul.msk.f32.gmra.mxu3 %vm178_vm4, %v2102_v54 }
0x2c0c   :  { %3260 = vmatmul.msk.f32.gmra.mxu0 %vm178_vm4, %v4584_v55  ;;  %2382 = vmatmul.f32.vlgmr.msrb.gmra.mxu1 %v3519_v6  ;;  %v2208_v55 = vpop.f32.mrf.mxu2 }
0x2c0d   :  { %2670 = vmatpush.msrb.mxu1 %v4718_v2  ;;  %v2315_v19 = vadd.f32 %v2314_v60, %v2208_v55 }
0x2c0f   :  { %2671 = vmatpush.msrb.mxu1 %v4723_v35  ;;  %v4913_v48 = vadd.f32 %v2325_v13, %v2315_v19 }
0x2c11   :  { %2672 = vmatpush.msrb.mxu1 %v4735_v25 }
0x2c13   :  { %2673 = vmatpush.msrb.mxu1 %v4746_v3 }
0x2c14   :  { %3261 = vmatmul.msk.f32.gmra.mxu0 %vm178_vm4, %v4593_v27  ;;  %v2211_v27 = vpop.f32.mrf.mxu2 }
0x2c15   :  { %2674 = vmatpush.msrb.mxu1 %v4753_v12  ;;  %v2318_v44 = vadd.f32 %v2317_v0, %v2211_v27 }
0x2c17   :  { %2675 = vmatpush.msrb.mxu1 %v4761_v31  ;;  %v4897_v17 = vadd.f32 %v2325_v13, %v2318_v44 }
0x2c19   :  { %2676 = vmatpush.msrb.mxu1 %v4778_v33 }
0x2c1b   :  { %2677 = vmatpush.msrb.mxu1 %v4783_v14 }
0x2c1c   :  { %3262 = vmatmul.msk.f32.gmra.mxu0 %vm178_vm4, %v4659_v28  ;;  %v2214_v7 = vpop.f32.mrf.mxu2 }
0x2c24   :  { %3263 = vmatmul.msk.f32.gmra.mxu0 %vm178_vm4, %v4666_v20 }
0x2c2c   :  { %2362 = vmatmul.f32.vlgmr.msrb.gmra.mxu0 %v3519_v6  ;;  %v4879_v6 = vpop.f32.mrf.mxu2 }
0x2c2d   :  { %2650 = vmatpush.msrb.mxu0 %v4697_v32 }
0x2c2f   :  { %2651 = vmatpush.msrb.mxu0 %v4706_v34 }
0x2c31   :  { %2652 = vmatpush.msrb.mxu0 %v4713_v42 }
0x2c33   :  { %2653 = vmatpush.msrb.mxu0 %v4740_v38 }
0x2c34   :  { %v2261_v62 = vpop.f32.mrf.mxu2 }
0x2c35   :  { %2654 = vmatpush.msrb.mxu0 %v4773_v41 }
0x2c37   :  { %2655 = vmatpush.msrb.mxu0 %v4800_v46 }
0x2c39   :  { %2656 = vmatpush.msrb.mxu0 %v4816_v51 }
0x2c3b   :  { %2657 = vmatpush.msrb.mxu0 %v4831_v58 }
0x2c3c   :  { %v2264_v4 = vpop.f32.mrf.mxu2 }
0x2c44   :  { %v2267_v40 = vpop.f32.mrf.mxu2 }
0x2c4c   :  { %v2270_v55 = vpop.f32.mrf.mxu2 }
0x2c69   :  { %v4881_v10 = vpop.f32.mrf.mxu0  ;;  %v2193_v53 = vpop.f32.mrf.mxu1 }
0x2c6a   :  { %v2300_v56 = vadd.f32 %v4626_v61, %v2193_v53  ;;  %v2273_v53 = vpop.f32.mrf.mxu2 }
0x2c6c   :  { %v4949_v44 = vadd.f32 %v2325_v13, %v2300_v56  ;;  %v2259_v56 = vadd.f32 %v4879_v6, %v4881_v10 }
0x2c71   :  { %v2155_v63 = vpop.f32.mrf.mxu0  ;;  %v2196_v9 = vpop.f32.mrf.mxu1 }
0x2c72   :  { %v2262_v59 = vadd.f32 %v2261_v62, %v2155_v63  ;;  %v2303_v52 = vadd.f32 %v4628_v1, %v2196_v9 }
0x2c74   :  { %v4900_v18 = vadd.f32 %v4890_v57, %v2262_v59  ;;  %v4902_v15 = vadd.f32 %v2325_v13, %v2303_v52 }
0x2c76   :  { %v2417_v23 = vsel %vm4893_vm10, %v4897_v17, %v4902_v15  ;;  %v2787_v1 = vsel %vm4893_vm10, %v4902_v15, %v4897_v17 }
0x2c79   :  { %v2158_v21 = vpop.f32.mrf.mxu0  ;;  %v2199_v22 = vpop.f32.mrf.mxu1 }
0x2c7a   :  { %v2265_v28 = vadd.f32 %v2264_v4, %v2158_v21  ;;  %v2306_v20 = vadd.f32 %v4633_v45, %v2199_v22  ;;  %v2276_v22 = vpop.f32.mrf.mxu2 }
0x2c7c   :  { %v4916_v24 = vadd.f32 %v4890_v57, %v2265_v28  ;;  %v4918_v30 = vadd.f32 %v2325_v13, %v2306_v20 }
0x2c7e   :  { %v2491_v16 = vsel %vm4893_vm10, %v4913_v48, %v4918_v30  ;;  %v2713_v36 = vsel %vm4893_vm10, %v4918_v30, %v4913_v48 }
0x2c81   :  { %v2161_v39 = vpop.f32.mrf.mxu0  ;;  %v2202_v45 = vpop.f32.mrf.mxu1 }
0x2c82   :  { %v2268_v43 = vadd.f32 %v2267_v40, %v2161_v39  ;;  %v2309_v50 = vadd.f32 %v4637_v49, %v2202_v45 }
0x2c84   :  { %v4933_v5 = vadd.f32 %v4890_v57, %v2268_v43  ;;  %v4935_v54 = vadd.f32 %v2325_v13, %v2309_v50 }
0x2c86   :  { %v2565_v27 = vsel %vm4893_vm10, %v4930_v47, %v4935_v54  ;;  %v2639_v49 = vsel %vm4893_vm10, %v4935_v54, %v4930_v47 }
0x2c88   :  { %v2320_v60 = vpop.f32.mrf.mxu3 }
0x2c89   :  { %v2321_v62 = vadd.f32 %v2320_v60, %v2214_v7  ;;  %v2164_v11 = vpop.f32.mrf.mxu0  ;;  %v2383_v39 = vpop.f32.mrf.mxu1 }
0x2c8a   :  { %v2271_v0 = vadd.f32 %v2270_v55, %v2164_v11  ;;  %v2279_v60 = vpop.f32.mrf.mxu2 }
0x2c8b   :  { %v4951_v4 = vadd.f32 %v2325_v13, %v2321_v62 }
0x2c8c   :  { %v4958_v9 = vadd.f32 %v4890_v57, %v2271_v0 }
0x2c8d   :  { %v2345_v40 = vsel %vm4893_vm10, %v4951_v4, %v4949_v44 }
0x2c8e   :  { %v2564_v8 = vsel %vm4953_vm15, %v4958_v9, %v4933_v5  ;;  %v2638_v7 = vsel %vm4953_vm15, %v4933_v5, %v4958_v9  ;;  %v2387_v55 = vadd.f32 %v2383_v39, %v2345_v40 }
0x2c90   :  { %v2389_v0 = vmul.f32 %v2387_v55, %v4398_v37 }
0x2c91   :  { %v2167_v13 = vpop.f32.mrf.mxu0 }
0x2c92   :  { %v2274_v59 = vadd.f32 %v2273_v53, %v2167_v13  ;;  %v5002_v53 = vadd.f32 %v4890_v57, %v2259_v56  ;;  %3445 = vtanh.f32 %v2389_v0 }
0x2c94   :  { %v4973_v52 = vadd.f32 %v4890_v57, %v2274_v59 }
0x2c96   :  { %v2490_v19 = vsel %vm4953_vm15, %v4973_v52, %v4916_v24  ;;  %v2712_v21 = vsel %vm4953_vm15, %v4916_v24, %v4973_v52 }
0x2c99   :  { %v2170_v28 = vpop.f32.mrf.mxu0 }
0x2c9a   :  { %v2277_v20 = vadd.f32 %v2276_v22, %v2170_v28 }
0x2c9c   :  { %v4988_v45 = vadd.f32 %v4890_v57, %v2277_v20  ;;  %v3446_v20 = vpop.eup %3445 }
0x2c9d   :  { %v2393_v40 = vadd.f32 1.0, %v3446_v20 }
0x2c9e   :  { %v2416_v43 = vsel %vm4953_vm15, %v4988_v45, %v4900_v18  ;;  %v2786_v50 = vsel %vm4953_vm15, %v4900_v18, %v4988_v45 }
0x2ca1   :  { %v2173_v62 = vpop.f32.mrf.mxu0 }
0x2ca2   :  { %v2280_v11 = vadd.f32 %v2279_v60, %v2173_v62 }
0x2ca4   :  { %v5005_v13 = vadd.f32 %v4890_v57, %v2280_v11  ;;  %v2395_v57 = vmul.f32 0.5, %v2393_v40 }
0x2ca6   :  { %v2344_v6 = vsel %vm4953_vm15, %v5005_v13, %v5002_v53  ;;  %v2397_v60 = vsel %vm66_vm5, %v3446_v20, %v2395_v57 }
0x2ca9   :  { %v2363_v10 = vpop.f32.mrf.mxu0 }
0x2caa   :  { %v2386_v22 = vadd.f32 %v2363_v10, %v2344_v6 }
0x2cac   :  { %v2388_v28 = vmul.f32 0.5, %v2386_v22 }
0x2cae   :  { %3447 = vtanh.f32 %v2388_v28 }
0x2cb4   :  { %v3448_v39 = vpop.eup %3447 }
0x2cb5   :  { %v2392_v55 = vadd.f32 1.0, %v3448_v39 }
0x2cb7   :  { %v2394_v56 = vmul.f32 0.5, %v2392_v55 }
0x2cb9   :  { %v2399_v62 = vmul.f32 %v2397_v60, %v2394_v56  ;;  %v2398_v11 = vmul.f32 0.0, %v2394_v56 }
0x2cbb   :  { %2401 = vrot.lane.b32.xlu1 %v2399_v62, %s3521_s4 }
0x2d2d   :  { %v2402_v0 = vpop.permute.xlu1 %2401 }
0x2d2e   :  { %v2404_v61 = vadd.f32 %v2402_v0, %v2398_v11 }
0x2d30   :  { %3449 = vtanh.f32 %v2404_v61 }
0x2d36   :  { %v3450_v59 = vpop.eup %3449 }
0x2d37   :  { %v5018_v6 = vmul.f32 %v3450_v59, %v2397_v60 }
0x2d39   :  { %2408 = vrot.lane.b32.xlu2 %v5018_v6, %s3521_s4 }
0x2d93   :  { %v2409_v10 = vpop.permute.xlu2 %2408 }
0x2d94   :  { %2411 = vst.msk [vmem:[#allocation5] sm:$0xff] %vm178_vm4, %v2409_v10  ;;  %3288 = vmatmul.msk.f32.vlgmr.msra.gmra.mxu2 %vm1485_vm6, %v2409_v10  ;;  %3289 = vmatmul.msk.f32.vlgmr.msra.gmra.mxu3 %vm1485_vm6, %v2409_v10 }
0x2d95   :  { %2724 = vmatpush.msra.mxu2 %v4697_v32  ;;  %2744 = vmatpush.msra.mxu3 %v4718_v2 }
0x2d97   :  { %2725 = vmatpush.msra.mxu2 %v4706_v34  ;;  %2745 = vmatpush.msra.mxu3 %v4723_v35 }
0x2d99   :  { %2726 = vmatpush.msra.mxu2 %v4713_v42  ;;  %2746 = vmatpush.msra.mxu3 %v4735_v25 }
0x2d9b   :  { %2727 = vmatpush.msra.mxu2 %v4740_v38  ;;  %2747 = vmatpush.msra.mxu3 %v4746_v3 }
0x2d9d   :  { %2728 = vmatpush.msra.mxu2 %v4773_v41  ;;  %2748 = vmatpush.msra.mxu3 %v4753_v12 }
0x2d9f   :  { %2729 = vmatpush.msra.mxu2 %v4800_v46  ;;  %2749 = vmatpush.msra.mxu3 %v4761_v31 }
0x2da1   :  { %2730 = vmatpush.msra.mxu2 %v4816_v51  ;;  %2750 = vmatpush.msra.mxu3 %v4778_v33 }
0x2da3   :  { %2731 = vmatpush.msra.mxu2 %v4831_v58  ;;  %2751 = vmatpush.msra.mxu3 %v4783_v14 }
0x2e17   :  { %v2437_v59 = vpop.f32.mrf.mxu2  ;;  %v2457_v22 = vpop.f32.mrf.mxu3 }
0x2e18   :  { %v2460_v28 = vadd.f32 %v2437_v59, %v2416_v43  ;;  %v2461_v20 = vadd.f32 %v2457_v22, %v2417_v23 }
0x2e1a   :  { %v2462_v40 = vmul.f32 0.5, %v2460_v28  ;;  %v2463_v39 = vmul.f32 %v2461_v20, %v4398_v37 }
0x2e1c   :  { %3451 = vtanh.f32 %v2462_v40 }
0x2e1d   :  { %3453 = vtanh.f32 %v2463_v39 }
0x2e22   :  { %v3452_v57 = vpop.eup %3451 }
0x2e23   :  { %v3454_v55 = vpop.eup %3453  ;;  %v2466_v56 = vadd.f32 1.0, %v3452_v57 }
0x2e24   :  { %v2467_v60 = vadd.f32 1.0, %v3454_v55 }
0x2e25   :  { %v2468_v62 = vmul.f32 0.5, %v2466_v56 }
0x2e26   :  { %v2469_v11 = vmul.f32 0.5, %v2467_v60 }
0x2e27   :  { %v2472_v10 = vmul.f32 %v2468_v62, %v2404_v61 }
0x2e28   :  { %v2471_v43 = vsel %vm66_vm5, %v3454_v55, %v2469_v11 }
0x2e29   :  { %v2473_v0 = vmul.f32 %v2471_v43, %v2468_v62 }
0x2e2b   :  { %2475 = vrot.lane.b32.xlu0 %v2473_v0, %s3521_s4 }
0x2e9d   :  { %v2476_v59 = vpop.permute.xlu0 %2475 }
0x2e9e   :  { %v2478_v23 = vadd.f32 %v2476_v59, %v2472_v10 }
0x2ea0   :  { %3455 = vtanh.f32 %v2478_v23 }
0x2ea6   :  { %v3456_v22 = vpop.eup %3455 }
0x2ea7   :  { %v5050_v28 = vmul.f32 %v3456_v22, %v2471_v43 }
0x2ea9   :  { %2482 = vrot.lane.b32.xlu1 %v5050_v28, %s3521_s4 }
0x2f1b   :  { %v2483_v20 = vpop.permute.xlu1 %2482 }
0x2f1c   :  { %2485 = vst.msk [vmem:[#allocation5 + $0x8] sm:$0xff] %vm178_vm4, %v2483_v20  ;;  %3290 = vmatmul.msk.f32.vlgmr.msra.gmra.mxu0 %vm1485_vm6, %v2483_v20  ;;  %3291 = vmatmul.msk.f32.vlgmr.msra.gmra.mxu1 %vm1485_vm6, %v2483_v20 }
0x2f1d   :  { %2798 = vmatpush.msra.mxu0 %v4697_v32  ;;  %2818 = vmatpush.msra.mxu1 %v4718_v2 }
0x2f1f   :  { %2799 = vmatpush.msra.mxu0 %v4706_v34  ;;  %2819 = vmatpush.msra.mxu1 %v4723_v35 }
0x2f21   :  { %2800 = vmatpush.msra.mxu0 %v4713_v42  ;;  %2820 = vmatpush.msra.mxu1 %v4735_v25 }
0x2f23   :  { %2801 = vmatpush.msra.mxu0 %v4740_v38  ;;  %2821 = vmatpush.msra.mxu1 %v4746_v3 }
0x2f25   :  { %2802 = vmatpush.msra.mxu0 %v4773_v41  ;;  %2822 = vmatpush.msra.mxu1 %v4753_v12 }
0x2f27   :  { %2803 = vmatpush.msra.mxu0 %v4800_v46  ;;  %2823 = vmatpush.msra.mxu1 %v4761_v31 }
0x2f29   :  { %2804 = vmatpush.msra.mxu0 %v4816_v51  ;;  %2824 = vmatpush.msra.mxu1 %v4778_v33 }
0x2f2b   :  { %2805 = vmatpush.msra.mxu0 %v4831_v58  ;;  %2825 = vmatpush.msra.mxu1 %v4783_v14 }
0x2f99   :  { %v2511_v61 = vpop.f32.mrf.mxu0  ;;  %v2531_v40 = vpop.f32.mrf.mxu1 }
0x2f9a   :  { %v2534_v39 = vadd.f32 %v2511_v61, %v2490_v19  ;;  %v2535_v57 = vadd.f32 %v2531_v40, %v2491_v16 }
0x2f9c   :  { %v2536_v55 = vmul.f32 0.5, %v2534_v39  ;;  %v2537_v56 = vmul.f32 %v2535_v57, %v4398_v37 }
0x2f9e   :  { %3457 = vtanh.f32 %v2536_v55 }
0x2f9f   :  { %3459 = vtanh.f32 %v2537_v56 }
0x2fa4   :  { %v3458_v60 = vpop.eup %3457 }
0x2fa5   :  { %v3460_v62 = vpop.eup %3459  ;;  %v2540_v11 = vadd.f32 1.0, %v3458_v60 }
0x2fa6   :  { %v2541_v43 = vadd.f32 1.0, %v3460_v62 }
0x2fa7   :  { %v2542_v0 = vmul.f32 0.5, %v2540_v11 }
0x2fa8   :  { %v2543_v10 = vmul.f32 0.5, %v2541_v43 }
0x2fa9   :  { %v2546_v22 = vmul.f32 %v2542_v0, %v2478_v23 }
0x2faa   :  { %v2545_v19 = vsel %vm66_vm5, %v3460_v62, %v2543_v10 }
0x2fab   :  { %v2547_v59 = vmul.f32 %v2545_v19, %v2542_v0 }
0x2fad   :  { %2549 = vrot.lane.b32.xlu2 %v2547_v59, %s3521_s4 }
0x3007   :  { %v2550_v20 = vpop.permute.xlu2 %2549 }
0x3008   :  { %v2552_v16 = vadd.f32 %v2550_v20, %v2546_v22 }
0x300a   :  { %3461 = vtanh.f32 %v2552_v16 }
0x3010   :  { %v3462_v61 = vpop.eup %3461 }
0x3011   :  { %v5087_v40 = vmul.f32 %v3462_v61, %v2545_v19 }
0x3013   :  { %2556 = vrot.lane.b32.xlu0 %v5087_v40, %s3521_s4 }
0x3085   :  { %v2557_v39 = vpop.permute.xlu0 %2556 }
0x3086   :  { %2559 = vst.msk [vmem:[#allocation5 + $0x10] sm:$0xff] %vm178_vm4, %v2557_v39  ;;  %3292 = vmatmul.msk.f32.vlgmr.msrb.gmra.mxu2 %vm1485_vm6, %v2557_v39  ;;  %3293 = vmatmul.msk.f32.vlgmr.msrb.gmra.mxu3 %vm1485_vm6, %v2557_v39 }
0x3087   :  { %2872 = vmatpush.msrb.mxu2 %v4697_v32  ;;  %2892 = vmatpush.msrb.mxu3 %v4718_v2 }
0x3089   :  { %2873 = vmatpush.msrb.mxu2 %v4706_v34  ;;  %2893 = vmatpush.msrb.mxu3 %v4723_v35 }
0x308b   :  { %2874 = vmatpush.msrb.mxu2 %v4713_v42  ;;  %2894 = vmatpush.msrb.mxu3 %v4735_v25 }
0x308d   :  { %2875 = vmatpush.msrb.mxu2 %v4740_v38  ;;  %2895 = vmatpush.msrb.mxu3 %v4746_v3 }
0x308f   :  { %2876 = vmatpush.msrb.mxu2 %v4773_v41  ;;  %2896 = vmatpush.msrb.mxu3 %v4753_v12 }
0x3091   :  { %2877 = vmatpush.msrb.mxu2 %v4800_v46  ;;  %2897 = vmatpush.msrb.mxu3 %v4761_v31 }
0x3093   :  { %2878 = vmatpush.msrb.mxu2 %v4816_v51  ;;  %2898 = vmatpush.msrb.mxu3 %v4778_v33 }
0x3095   :  { %2879 = vmatpush.msrb.mxu2 %v4831_v58  ;;  %2899 = vmatpush.msrb.mxu3 %v4783_v14 }
0x3109   :  { %v2585_v32 = vpop.f32.mrf.mxu2  ;;  %v2605_v34 = vpop.f32.mrf.mxu3 }
0x310a   :  { %v2608_v42 = vadd.f32 %v2585_v32, %v2564_v8  ;;  %v2609_v2 = vadd.f32 %v2605_v34, %v2565_v27 }
0x310c   :  { %v2610_v35 = vmul.f32 0.5, %v2608_v42  ;;  %v2611_v25 = vmul.f32 %v2609_v2, %v4398_v37 }
0x310e   :  { %3463 = vtanh.f32 %v2610_v35 }
0x310f   :  { %3465 = vtanh.f32 %v2611_v25 }
0x3114   :  { %v3464_v38 = vpop.eup %3463 }
0x3115   :  { %v3466_v3 = vpop.eup %3465  ;;  %v2614_v12 = vadd.f32 1.0, %v3464_v38 }
0x3116   :  { %v2615_v31 = vadd.f32 1.0, %v3466_v3 }
0x3117   :  { %v2616_v41 = vmul.f32 0.5, %v2614_v12 }
0x3118   :  { %v2617_v33 = vmul.f32 0.5, %v2615_v31 }
0x3119   :  { %v2620_v51 = vmul.f32 %v2616_v41, %v2552_v16 }
0x311a   :  { %v2619_v14 = vsel %vm66_vm5, %v3466_v3, %v2617_v33 }
0x311b   :  { %v2621_v46 = vmul.f32 %v2619_v14, %v2616_v41 }
0x311d   :  { %2623 = vrot.lane.b32.xlu1 %v2621_v46, %s3521_s4  ;;  %v2952_v46 = vld [vmem:[%s5387_s14 + $0x10] sm:$0xff] }
0x318f   :  { %v2624_v58 = vpop.permute.xlu1 %2623 }
0x3190   :  { %v2626_v27 = vadd.f32 %v2624_v58, %v2620_v51  ;;  %v2951_v51 = vld [vmem:[%s5387_s14 + $0x8] sm:$0xff]  ;;  %v2950_v58 = vld [vmem:[%s5387_s14] sm:$0xff] }
0x3192   :  { %3467 = vtanh.f32 %v2626_v27 }
0x3198   :  { %v3468_v8 = vpop.eup %3467 }
0x3199   :  { %v5124_v23 = vmul.f32 %v3468_v8, %v2619_v14  ;;  %v2953_v14 = vld [vmem:[%s5387_s14 + $0x18] sm:$0xff]  ;;  %v2934_v8 = vld [vmem:[#allocation5] sm:$0xff] }
0x319b   :  { %2630 = vrot.lane.b32.xlu2 %v5124_v23, %s3521_s4 }
0x31f5   :  { %v2631_v57 = vpop.permute.xlu2 %2630 }
0x31f6   :  { %2633 = vst.msk [vmem:[#allocation5 + $0x18] sm:$0xff] %vm178_vm4, %v2631_v57  ;;  %3294 = vmatmul.msk.f32.vlgmr.msrb.gmra.mxu0 %vm1485_vm6, %v2631_v57  ;;  %3295 = vmatmul.msk.f32.vlgmr.msrb.gmra.mxu1 %vm1485_vm6, %v2631_v57  ;;  %v2935_v57 = vld [vmem:[#allocation5 + $0x8] sm:$0xff] }
0x31f7   :  { %3059 = vmatpush.msrb.mxu1 %v2953_v14 }
0x31f9   :  { %3060 = vmatpush.msrb.mxu1 %v2952_v46 }
0x31fb   :  { %3061 = vmatpush.msrb.mxu1 %v2951_v51 }
0x31fd   :  { %3062 = vmatpush.msrb.mxu1 %v2950_v58 }
0x3273   :  { %v2659_v55 = vpop.f32.mrf.mxu0  ;;  %v2679_v56 = vpop.f32.mrf.mxu1 }
0x3274   :  { %v2682_v60 = vadd.f32 %v2659_v55, %v2638_v7  ;;  %v2683_v62 = vadd.f32 %v2679_v56, %v2639_v49  ;;  %v2936_v55 = vld [vmem:[#allocation5 + $0x10] sm:$0xff]  ;;  %v2937_v56 = vld [vmem:[#allocation5 + $0x18] sm:$0xff] }
0x3276   :  { %v2684_v11 = vmul.f32 0.5, %v2682_v60  ;;  %v2685_v43 = vmul.f32 %v2683_v62, %v4398_v37 }
0x3278   :  { %3469 = vtanh.f32 %v2684_v11 }
0x3279   :  { %3471 = vtanh.f32 %v2685_v43 }
0x327e   :  { %v3470_v0 = vpop.eup %3469 }
0x327f   :  { %v3472_v10 = vpop.eup %3471  ;;  %v2688_v19 = vadd.f32 1.0, %v3470_v0 }
0x3280   :  { %v2689_v59 = vadd.f32 1.0, %v3472_v10 }
0x3281   :  { %v2690_v22 = vmul.f32 0.5, %v2688_v19 }
0x3282   :  { %v2691_v20 = vmul.f32 0.5, %v2689_v59 }
0x3283   :  { %v2694_v7 = vmul.f32 %v2690_v22, %v2626_v27 }
0x3284   :  { %v2693_v5 = vsel %vm66_vm5, %v3472_v10, %v2691_v20 }
0x3285   :  { %v2695_v9 = vmul.f32 %v2693_v5, %v2690_v22 }
0x3287   :  { %2697 = vrot.lane.b32.xlu0 %v2695_v9, %s3521_s4 }
0x32f9   :  { %v2698_v47 = vpop.permute.xlu0 %2697 }
0x32fa   :  { %v2700_v54 = vadd.f32 %v2698_v47, %v2694_v7 }
0x32fc   :  { %3473 = vtanh.f32 %v2700_v54 }
0x3302   :  { %v3474_v49 = vpop.eup %3473 }
0x3303   :  { %v5145_v16 = vmul.f32 %v3474_v49, %v2693_v5 }
0x3305   :  { %2704 = vrot.lane.b32.xlu1 %v5145_v16, %s3521_s4 }
0x3377   :  { %v2705_v61 = vpop.permute.xlu1 %2704 }
0x3378   :  { %2707 = vst.msk [vmem:[#allocation5 + $0x20] sm:$0xff] %vm178_vm4, %v2705_v61  ;;  %3296 = vmatmul.msk.f32.vlgmr.msra.gmra.mxu2 %vm1485_vm6, %v2705_v61  ;;  %3297 = vmatmul.msk.f32.vlgmr.msra.gmra.mxu3 %vm1485_vm6, %v2705_v61 }
0x337f   :  { %v2938_v60 = vld [vmem:[#allocation5 + $0x20] sm:$0xff] }
0x33fb   :  { %v2733_v39 = vpop.f32.mrf.mxu2  ;;  %v2753_v32 = vpop.f32.mrf.mxu3 }
0x33fc   :  { %v2756_v34 = vadd.f32 %v2733_v39, %v2712_v21  ;;  %v2757_v42 = vadd.f32 %v2753_v32, %v2713_v36 }
0x33fe   :  { %v2758_v2 = vmul.f32 0.5, %v2756_v34  ;;  %v2759_v35 = vmul.f32 %v2757_v42, %v4398_v37  ;;  %v5402_v42 = vsel %vm4953_vm15, %v5002_v53, %v5005_v13 }
0x3400   :  { %3475 = vtanh.f32 %v2758_v2 }
0x3401   :  { %3477 = vtanh.f32 %v2759_v35  ;;  %v5403_v35 = vsel %vm4893_vm10, %v4949_v44, %v4951_v4 }
0x3406   :  { %v3476_v25 = vpop.eup %3475 }
0x3407   :  { %v3478_v38 = vpop.eup %3477  ;;  %v2762_v3 = vadd.f32 1.0, %v3476_v25 }
0x3408   :  { %v2763_v12 = vadd.f32 1.0, %v3478_v38 }
0x3409   :  { %v2764_v31 = vmul.f32 0.5, %v2762_v3 }
0x340a   :  { %v2765_v41 = vmul.f32 0.5, %v2763_v12 }
0x340b   :  { %v2768_v21 = vmul.f32 %v2764_v31, %v2700_v54 }
0x340c   :  { %v2767_v24 = vsel %vm66_vm5, %v3478_v38, %v2765_v41 }
0x340d   :  { %v2769_v52 = vmul.f32 %v2767_v24, %v2764_v31 }
0x340f   :  { %2771 = vrot.lane.b32.xlu2 %v2769_v52, %s3521_s4 }
0x3469   :  { %v2772_v48 = vpop.permute.xlu2 %2771 }
0x346a   :  { %v2774_v30 = vadd.f32 %v2772_v48, %v2768_v21 }
0x346c   :  { %3479 = vtanh.f32 %v2774_v30 }
0x3472   :  { %v3480_v36 = vpop.eup %3479 }
0x3473   :  { %v5166_v33 = vmul.f32 %v3480_v36, %v2767_v24  ;;  %v2955_v36 = vld [vmem:[%s5387_s14 + $0x28] sm:$0xff] }
0x3475   :  { %2778 = vrot.lane.b32.xlu0 %v5166_v33, %s3521_s4 }
0x34e7   :  { %v2779_v27 = vpop.permute.xlu0 %2778 }
0x34e8   :  { %2781 = vst.msk [vmem:[#allocation5 + $0x28] sm:$0xff] %vm178_vm4, %v2779_v27  ;;  %3298 = vmatmul.msk.f32.vlgmr.msra.gmra.mxu0 %vm1485_vm6, %v2779_v27  ;;  %3299 = vmatmul.msk.f32.vlgmr.msra.gmra.mxu1 %vm1485_vm6, %v2779_v27 }
0x34ef   :  { %v2939_v62 = vld [vmem:[#allocation5 + $0x28] sm:$0xff] }
0x34f0   :  { %3310 = vmatmul.msk.f32.vlgmr.msrb.gmra.mxu1 %vm178_vm4, %v2934_v8 }
0x34f8   :  { %3311 = vmatmul.msk.f32.gmra.mxu1 %vm178_vm4, %v2935_v57 }
0x3500   :  { %3312 = vmatmul.msk.f32.gmra.mxu1 %vm178_vm4, %v2936_v55 }
0x3508   :  { %3313 = vmatmul.msk.f32.gmra.mxu1 %vm178_vm4, %v2937_v56 }
0x3510   :  { %3314 = vmatmul.msk.f32.gmra.mxu1 %vm178_vm4, %v2938_v60 }
0x3518   :  { %3315 = vmatmul.msk.f32.gmra.mxu1 %vm178_vm4, %v2939_v62 }
0x3565   :  { %v2807_v11 = vpop.f32.mrf.mxu0  ;;  %v2827_v43 = vpop.f32.mrf.mxu1 }
0x3566   :  { %v2830_v0 = vadd.f32 %v2807_v11, %v2786_v50  ;;  %v2831_v10 = vadd.f32 %v2827_v43, %v2787_v1  ;;  %v5272_v43 = vld [vmem:[%s5388_s15] ss:$0 sm:$0xff] }
0x3568   :  { %v2832_v19 = vmul.f32 0.5, %v2830_v0  ;;  %v2833_v59 = vmul.f32 %v2831_v10, %v4398_v37 }
0x356a   :  { %3481 = vtanh.f32 %v2832_v19 }
0x356b   :  { %3483 = vtanh.f32 %v2833_v59 }
0x356d   :  { %v3064_v11 = vpop.f32.mrf.mxu1 }
0x3570   :  { %v3482_v22 = vpop.eup %3481 }
0x3571   :  { %v3484_v20 = vpop.eup %3483  ;;  %v2836_v5 = vadd.f32 1.0, %v3482_v22 }
0x3572   :  { %v2837_v9 = vadd.f32 1.0, %v3484_v20 }
0x3573   :  { %v2838_v7 = vmul.f32 0.5, %v2836_v5 }
0x3574   :  { %v2839_v47 = vmul.f32 0.5, %v2837_v9 }
0x3575   :  { %v2842_v50 = vmul.f32 %v2838_v7, %v2774_v30  ;;  %v2956_v30 = vld [vmem:[%s5387_s14 + $0x30] sm:$0xff]  ;;  %v3067_v0 = vpop.f32.mrf.mxu1 }
0x3576   :  { %v2841_v18 = vsel %vm66_vm5, %v3484_v20, %v2839_v47 }
0x3577   :  { %v2843_v45 = vmul.f32 %v2841_v18, %v2838_v7 }
0x3579   :  { %2845 = vrot.lane.b32.xlu1 %v2843_v45, %s3521_s4 }
0x357d   :  { %v3070_v5 = vpop.f32.mrf.mxu1 }
0x3585   :  { %v3073_v45 = vpop.f32.mrf.mxu1 }
0x35eb   :  { %v2846_v17 = vpop.permute.xlu1 %2845 }
0x35ec   :  { %v2848_v15 = vadd.f32 %v2846_v17, %v2842_v50 }
0x35ee   :  { %3485 = vtanh.f32 %v2848_v15 }
0x35f4   :  { %v3486_v1 = vpop.eup %3485 }
0x35f5   :  { %v2850_v54 = vmul.f32 %v3486_v1, %v2841_v18  ;;  %v3076_v1 = vpop.f32.mrf.mxu1 }
0x35f7   :  { %2852 = vrot.lane.b32.xlu2 %v2850_v54, %s3521_s4 }
0x35ff   :  { %2856 = vrot.lane.b32.xlu2 %v2850_v54, %s3522_s22 }
0x3607   :  { %2634 = vrot.lane.b32.xlu2 %v5124_v23, %s3522_s22 }
0x360f   :  { %2412 = vrot.lane.b32.xlu2 %v5018_v6, %s3522_s22 }
0x3651   :  { %v2853_v49 = vpop.permute.xlu2 %2852 }
0x3652   :  { %2855 = vst.msk [vmem:[#allocation5 + $0x30] sm:$0xff] %vm178_vm4, %v2853_v49  ;;  %3300 = vmatmul.msk.f32.vlgmr.msrb.gmra.mxu2 %vm1485_vm6, %v2853_v49  ;;  %3301 = vmatmul.msk.f32.vlgmr.msrb.gmra.mxu3 %vm1485_vm6, %v2853_v49 }
0x3659   :  { %v2857_v61 = vpop.permute.xlu2 %2856  ;;  %v2940_v39 = vld [vmem:[#allocation5 + $0x30] sm:$0xff] }
0x365a   :  { %2859 = vst.msk [vmem:[#allocation7 + $0x8] sm:$0xff] %vm178_vm4, %v2857_v61  ;;  %3316 = vmatmul.msk.f32.gmra.mxu1 %vm178_vm4, %v2940_v39  ;;  %v3109_v39 = vld [vmem:[%s5395_s18 + $0x8] sm:$0xff] }
0x3661   :  { %v2635_v32 = vpop.permute.xlu2 %2634  ;;  %v2943_v27 = vld [vmem:[#allocation7 + $0x8] sm:$0xff] }
0x3662   :  { %2637 = vst.msk [vmem:[#allocation7 + $0x20] sm:$0xff] %vm178_vm4, %v2635_v32  ;;  %v3079_v32 = vpop.f32.mrf.mxu1 }
0x3669   :  { %v2413_v23 = vpop.permute.xlu2 %2412  ;;  %v2946_v55 = vld [vmem:[#allocation7 + $0x20] sm:$0xff] }
0x366a   :  { %2415 = vst.msk [vmem:[#allocation7 + $0x38] sm:$0xff] %vm178_vm4, %v2413_v23  ;;  %v3108_v23 = vld [vmem:[%s5395_s18] sm:$0xff] }
0x3671   :  { %v2949_v62 = vld [vmem:[#allocation7 + $0x38] sm:$0xff] }
0x36d5   :  { %v2881_v6 = vpop.f32.mrf.mxu2  ;;  %v2901_v34 = vpop.f32.mrf.mxu3 }
0x36d6   :  { %v2904_v2 = vadd.f32 %v2881_v6, %v5402_v42  ;;  %v2905_v25 = vadd.f32 %v2901_v34, %v5403_v35  ;;  %v3110_v6 = vld [vmem:[%s5395_s18 + $0x10] sm:$0xff]  ;;  %v3125_v35 = vld [vmem:[%s5404_s28 + $0x8] sm:$0xff] }
0x36d8   :  { %v2906_v38 = vmul.f32 0.5, %v2904_v2  ;;  %v2907_v3 = vmul.f32 %v2905_v25, %v4398_v37  ;;  %v3111_v25 = vld [vmem:[%s5395_s18 + $0x18] sm:$0xff] }
0x36da   :  { %3487 = vtanh.f32 %v2906_v38 }
0x36db   :  { %3489 = vtanh.f32 %v2907_v3 }
0x36e0   :  { %v3488_v12 = vpop.eup %3487 }
0x36e1   :  { %v3490_v31 = vpop.eup %3489  ;;  %v2910_v41 = vadd.f32 1.0, %v3488_v12 }
0x36e2   :  { %v2911_v24 = vadd.f32 1.0, %v3490_v31 }
0x36e3   :  { %v2912_v63 = vmul.f32 0.5, %v2910_v41  ;;  %v3126_v41 = vld [vmem:[%s5404_s28 + $0x10] sm:$0xff] }
0x36e4   :  { %v2913_v52 = vmul.f32 0.5, %v2911_v24  ;;  %v3112_v24 = vld [vmem:[%s5395_s18 + $0x20] sm:$0xff] }
0x36e5   :  { %v2916_v37 = vmul.f32 %v2912_v63, %v2848_v15 }
0x36e6   :  { %v2915_v53 = vsel %vm66_vm5, %v3490_v31, %v2913_v52  ;;  %v3124_v31 = vld [vmem:[%s5404_s28] sm:$0xff] }
0x36e7   :  { %v2917_v13 = vmul.f32 %v2915_v53, %v2912_v63 }
0x36e9   :  { %2919 = vrot.lane.b32.xlu0 %v2917_v13, %s3521_s4  ;;  %v3113_v13 = vld [vmem:[%s5395_s18 + $0x28] sm:$0xff] }
0x36f1   :  { %2782 = vrot.lane.b32.xlu0 %v5166_v33, %s3522_s22 }
0x36f9   :  { %2560 = vrot.lane.b32.xlu0 %v5087_v40, %s3522_s22  ;;  %v2957_v40 = vld [vmem:[%s5387_s14 + $0x38] sm:$0xff] }
0x36fa   :  { %2994 = vmatpush.msrb.mxu0 %v2957_v40 }
0x36fc   :  { %2995 = vmatpush.msrb.mxu0 %v2956_v30 }
0x36fe   :  { %2996 = vmatpush.msrb.mxu0 %v2955_v36 }
0x375b   :  { %v2920_v26 = vpop.permute.xlu0 %2919 }
0x375c   :  { %v2922_v44 = vadd.f32 %v2920_v26, %v2916_v37 }
0x375e   :  { %3491 = vtanh.f32 %v2922_v44 }
0x3763   :  { %v2783_v4 = vpop.permute.xlu0 %2782 }
0x3764   :  { %v3492_v21 = vpop.eup %3491  ;;  %2785 = vst.msk [vmem:[#allocation7 + $0x10] sm:$0xff] %vm178_vm4, %v2783_v4  ;;  %v3082_v4 = vpop.f32.mrf.mxu1 }
0x3765   :  { %v2924_v48 = vmul.f32 %v3492_v21, %v2915_v53  ;;  %v3127_v53 = vld [vmem:[%s5404_s28 + $0x18] sm:$0xff]  ;;  %v3128_v21 = vld [vmem:[%s5404_s28 + $0x20] sm:$0xff] }
0x3767   :  { %2926 = vrot.lane.b32.xlu0 %v2924_v48, %s3521_s4  ;;  %2930 = vrot.lane.b32.xlu1 %v2924_v48, %s3522_s22 }
0x376b   :  { %v2561_v29 = vpop.permute.xlu0 %2560  ;;  %v2944_v8 = vld [vmem:[#allocation7 + $0x10] sm:$0xff] }
0x376c   :  { %2563 = vst.msk [vmem:[#allocation7 + $0x28] sm:$0xff] %vm178_vm4, %v2561_v29 }
0x376f   :  { %2708 = vrot.lane.b32.xlu1 %v5145_v16, %s3522_s22  ;;  %v2954_v16 = vld [vmem:[%s5387_s14 + $0x20] sm:$0xff] }
0x3770   :  { %2997 = vmatpush.msrb.mxu0 %v2954_v16  ;;  %v3129_v16 = vld [vmem:[%s5404_s28 + $0x28] sm:$0xff] }
0x3773   :  { %v2947_v56 = vld [vmem:[#allocation7 + $0x28] sm:$0xff] }
0x3777   :  { %2486 = vrot.lane.b32.xlu1 %v5050_v28, %s3522_s22 }
0x37d9   :  { %v2927_v28 = vpop.permute.xlu0 %2926  ;;  %v2931_v33 = vpop.permute.xlu1 %2930 }
0x37da   :  { %2929 = vst.msk [vmem:[#allocation5 + $0x38] sm:$0xff] %vm178_vm4, %v2927_v28  ;;  %v3114_v28 = vld [vmem:[%s5395_s18 + $0x30] sm:$0xff] }
0x37db   :  { %2933 = vst.msk [vmem:[#allocation7] sm:$0xff] %vm178_vm4, %v2931_v33 }
0x37e1   :  { %v2709_v14 = vpop.permute.xlu1 %2708  ;;  %v2941_v46 = vld [vmem:[#allocation5 + $0x38] sm:$0xff] }
0x37e2   :  { %2711 = vst.msk [vmem:[#allocation7 + $0x18] sm:$0xff] %vm178_vm4, %v2709_v14  ;;  %v2942_v51 = vld [vmem:[#allocation7] sm:$0xff]  ;;  %3317 = vmatmul.msk.f32.gmra.mxu1 %vm178_vm4, %v2941_v46 }
0x37e3   :  { %3302 = vmatmul.msk.f32.vlgmr.msrb.gmra.mxu0 %vm178_vm4, %v2942_v51 }
0x37e9   :  { %v2487_v58 = vpop.permute.xlu1 %2486  ;;  %v2945_v57 = vld [vmem:[#allocation7 + $0x18] sm:$0xff] }
0x37ea   :  { %2489 = vst.msk [vmem:[#allocation7 + $0x30] sm:$0xff] %vm178_vm4, %v2487_v58  ;;  %v3130_v58 = vld [vmem:[%s5404_s28 + $0x30] sm:$0xff] }
0x37eb   :  { %3303 = vmatmul.msk.f32.gmra.mxu0 %vm178_vm4, %v2943_v27 }
0x37f1   :  { %v2948_v60 = vld [vmem:[#allocation7 + $0x30] sm:$0xff] }
0x37f3   :  { %3304 = vmatmul.msk.f32.gmra.mxu0 %vm178_vm4, %v2944_v8 }
0x37fb   :  { %3305 = vmatmul.msk.f32.gmra.mxu0 %vm178_vm4, %v2945_v57 }
0x3803   :  { %3306 = vmatmul.msk.f32.gmra.mxu0 %vm178_vm4, %v2946_v55 }
0x380b   :  { %3307 = vmatmul.msk.f32.gmra.mxu0 %vm178_vm4, %v2947_v56 }
0x3813   :  { %3308 = vmatmul.msk.f32.gmra.mxu0 %vm178_vm4, %v2948_v60 }
0x381b   :  { %3309 = vmatmul.msk.f32.gmra.mxu0 %vm178_vm4, %v2949_v62 }
0x3860   :  { %v2999_v10 = vpop.f32.mrf.mxu0 }
0x3861   :  { %v3065_v19 = vadd.f32 %v3064_v11, %v2999_v10 }
0x3863   :  { %v3092_v59 = vadd.f32 %v5272_v43, %v3065_v19 }
0x3865   :  { %3100 = vst.msk [vmem:[%s5389_s16] sm:$0xff] %vm112_vm0, %v3092_v59  ;;  %v3116_v38 = vsub.f32 %v3092_v59, %v3108_v23 }
0x3867   :  { %v3132_v37 = vmul.f32 %v3124_v31, %v3116_v38 }
0x3868   :  { %v3002_v22 = vpop.f32.mrf.mxu0 }
0x3869   :  { %v3068_v20 = vadd.f32 %v3067_v0, %v3002_v22  ;;  %v3140_v33 = vmul.f32 %v3132_v37, %v3132_v37  ;;  %v3085_v0 = vpop.f32.mrf.mxu1 }
0x386b   :  { %v3093_v9 = vadd.f32 %v5272_v43, %v3068_v20  ;;  %v3148_v56 = vsel %vm112_vm0, %v3140_v33, 0.0 }
0x386d   :  { %3101 = vst.msk [vmem:[%s5389_s16 + $0x8] sm:$0xff] %vm112_vm0, %v3093_v9  ;;  %v3117_v42 = vsub.f32 %v3093_v9, %v3109_v39  ;;  %v3115_v9 = vld [vmem:[%s5395_s18 + $0x38] sm:$0xff] }
0x386f   :  { %v3133_v63 = vmul.f32 %v3125_v35, %v3117_v42 }
0x3870   :  { %v3005_v7 = vpop.f32.mrf.mxu0 }
0x3871   :  { %v3071_v47 = vadd.f32 %v3070_v5, %v3005_v7  ;;  %v3141_v29 = vmul.f32 %v3133_v63, %v3133_v63 }
0x3873   :  { %v3094_v18 = vadd.f32 %v5272_v43, %v3071_v47  ;;  %v3149_v27 = vsel %vm112_vm0, %v3141_v29, 0.0 }
0x3874   :  { %v3150_v10 = vadd.f32 %v3149_v27, %v3148_v56 }
0x3875   :  { %3102 = vst.msk [vmem:[%s5389_s16 + $0x10] sm:$0xff] %vm112_vm0, %v3094_v18  ;;  %v3118_v3 = vsub.f32 %v3094_v18, %v3110_v6 }
0x3877   :  { %v3134_v26 = vmul.f32 %v3126_v41, %v3118_v3 }
0x3878   :  { %v3008_v50 = vpop.f32.mrf.mxu0 }
0x3879   :  { %v3074_v17 = vadd.f32 %v3073_v45, %v3008_v50  ;;  %v3142_v14 = vmul.f32 %v3134_v26, %v3134_v26  ;;  %v3131_v45 = vld [vmem:[%s5404_s28 + $0x38] sm:$0xff] }
0x387b   :  { %v3095_v15 = vadd.f32 %v5272_v43, %v3074_v17  ;;  %v3151_v60 = vsel %vm112_vm0, %v3142_v14, 0.0 }
0x387c   :  { %v3152_v5 = vadd.f32 %v3151_v60, %v3150_v10 }
0x387d   :  { %3103 = vst.msk [vmem:[%s5389_s16 + $0x18] sm:$0xff] %vm112_vm0, %v3095_v15  ;;  %v3119_v52 = vsub.f32 %v3095_v15, %v3111_v25 }
0x387f   :  { %v3135_v40 = vmul.f32 %v3127_v53, %v3119_v52 }
0x3880   :  { %v3011_v54 = vpop.f32.mrf.mxu0 }
0x3881   :  { %v3077_v49 = vadd.f32 %v3076_v1, %v3011_v54  ;;  %v3143_v8 = vmul.f32 %v3135_v40, %v3135_v40 }
0x3883   :  { %v3096_v61 = vadd.f32 %v5272_v43, %v3077_v49  ;;  %v3153_v59 = vsel %vm112_vm0, %v3143_v8, 0.0 }
0x3884   :  { %v3154_v50 = vadd.f32 %v3153_v59, %v3152_v5 }
0x3885   :  { %3104 = vst.msk [vmem:[%s5389_s16 + $0x20] sm:$0xff] %vm112_vm0, %v3096_v61  ;;  %v3120_v44 = vsub.f32 %v3096_v61, %v3112_v24 }
0x3887   :  { %v3136_v46 = vmul.f32 %v3128_v21, %v3120_v44 }
0x3888   :  { %v3014_v34 = vpop.f32.mrf.mxu0 }
0x3889   :  { %v3080_v2 = vadd.f32 %v3079_v32, %v3014_v34  ;;  %v3144_v62 = vmul.f32 %v3136_v46, %v3136_v46 }
0x388b   :  { %v3097_v12 = vadd.f32 %v5272_v43, %v3080_v2  ;;  %v3155_v18 = vsel %vm112_vm0, %v3144_v62, 0.0 }
0x388c   :  { %v3156_v1 = vadd.f32 %v3155_v18, %v3154_v50 }
0x388d   :  { %3105 = vst.msk [vmem:[%s5389_s16 + $0x28] sm:$0xff] %vm112_vm0, %v3097_v12  ;;  %v3121_v30 = vsub.f32 %v3097_v12, %v3113_v13 }
0x388f   :  { %v3137_v57 = vmul.f32 %v3129_v16, %v3121_v30 }
0x3890   :  { %v3017_v48 = vpop.f32.mrf.mxu0 }
0x3891   :  { %v3083_v36 = vadd.f32 %v3082_v4, %v3017_v48  ;;  %v3145_v22 = vmul.f32 %v3137_v57, %v3137_v57 }
0x3893   :  { %v3098_v51 = vadd.f32 %v5272_v43, %v3083_v36  ;;  %v3157_v15 = vsel %vm112_vm0, %v3145_v22, 0.0 }
0x3894   :  { %v3158_v49 = vadd.f32 %v3157_v15, %v3156_v1 }
0x3895   :  { %3106 = vst.msk [vmem:[%s5389_s16 + $0x30] sm:$0xff] %vm112_vm0, %v3098_v51  ;;  %v3122_v55 = vsub.f32 %v3098_v51, %v3114_v28 }
0x3897   :  { %v3138_v11 = vmul.f32 %v3130_v58, %v3122_v55 }
0x3898   :  { %v3020_v19 = vpop.f32.mrf.mxu0 }
0x3899   :  { %v3086_v20 = vadd.f32 %v3085_v0, %v3020_v19  ;;  %v3146_v47 = vmul.f32 %v3138_v11, %v3138_v11 }
0x389b   :  { %v3099_v7 = vadd.f32 %v5272_v43, %v3086_v20  ;;  %v3159_v43 = vsel %vm112_vm0, %v3146_v47, 0.0 }
0x389c   :  { %v3160_v39 = vadd.f32 %v3159_v43, %v3158_v49 }
0x389d   :  { %3107 = vst.msk [vmem:[%s5389_s16 + $0x38] sm:$0xff] %vm112_vm0, %v3099_v7  ;;  %v3123_v17 = vsub.f32 %v3099_v7, %v3115_v9  ;;  %s3523_s16 = smov [#allocation8]  }
0x389e   :  { %s3183_s18 = sshll.u32 %s3523_s16, 4  ;;  %s3184_s18 = int_to_ptr.vmem [resolvable:$true] %s3183_s18 }
0x389f   :  { %v3139_v54 = vmul.f32 %v3131_v45, %v3123_v17 }
0x38a1   :  { %v3147_v61 = vmul.f32 %v3139_v54, %v3139_v54 }
0x38a3   :  { %v3161_v32 = vsel %vm112_vm0, %v3147_v61, 0.0 }
0x38a4   :  { %v3162_v23 = vadd.f32 %v3161_v32, %v3160_v39 }
0x38a6   :  { %3163 = vadd.xlane.f32.xlu1 %v3162_v23 }
0x3919   :  { %v3164_v6 = vpop.xlane.xlu1 %3163 }
0x391a   :  { %v3165_v34 = vrot.slane %v3164_v6, 4 }
0x391c   :  { %v3166_v42 = vadd.f32 %v3165_v34, %v3164_v6 }
0x391e   :  { %v3167_v2 = vrot.slane %v3166_v42, 2 }
0x3920   :  { %v3168_v35 = vadd.f32 %v3167_v2, %v3166_v42 }
0x3922   :  { %v3169_v25 = vrot.slane %v3168_v35, 1 }
0x3924   :  { %v3170_v38 = vadd.f32 %v3169_v25, %v3168_v35 }
0x3926   :  { %3323 = vpush %v3170_v38 }
0x3957   :  { %s3324_s19 = spop %3323 }
0x3958   :  { %v3172_v3 = vstv %s3324_s19 }
0x3959   :  { %v3173_v12 = vmul.f32 0.00390625, %v3172_v3 }
0x395b   :  { %3175 = vst.msk [vmem:[#allocation8] sm:$0x1] %vm3174_vm1, %v3173_v12 }
0x395c   :  { %3188 = dma.vmem_to_hbm [thread:$0]  %s3184_s18, 16, %s3186_s30, [#allocation9]  }
0x395d   :  { %3517 = dma.done.wait [#allocation9], 16  }
0x395e   :  { %3518 = vsyncadd [#allocation9], 4294967280 }
0x395f   :  { %3195 = vsyncpa [#allocation9], 1 }

</bundles_post_ra>
